<compile_context>
chip_gen: v6e
topology: v6e:2x2x1
jax: 0.10.0
libtpu: 0.0.40
codegen_flags: <defaults>
</compile_context>

<pallas_src>
import jax
import jax.numpy as jnp
from jax.experimental import pallas as pl
from jax.experimental.pallas import tpu as pltpu

IMG_H = 87
IMG_W = 87
IN_FEATURES = IMG_H * IMG_W        # 7569, matches nn.Linear(in_features=7569, ...)
H1, H2, H3 = 256, 128, 64
NUM_ACTIONS = 2                    # cartpole

LANE = 128


def _round_up(x, m):
    return (x + m - 1) // m * m


K_PAD = _round_up(IN_FEATURES, LANE)   # 7680 = 60 * 128 (lane-aligned K)
N_OUT_PAD = LANE                       # lane-dense output slab; slice [:, :2] outside


def dqn_mlp_kernel(x_ref,
                   w1_ref, b1_ref,
                   w2_ref, b2_ref,
                   w3_ref, b3_ref,
                   w4_ref, b4_ref,
                   o_ref):
    # fc1 + ReLU  (bf16 operands, fp32 accumulation on the MXU)
    h = jnp.dot(x_ref[...], w1_ref[...], preferred_element_type=jnp.float32)
    h = jnp.maximum(h + b1_ref[...], 0.0)
    # fc2 + ReLU
    h = jnp.dot(h.astype(jnp.bfloat16), w2_ref[...],
                preferred_element_type=jnp.float32)
    h = jnp.maximum(h + b2_ref[...], 0.0)
    # fc3 + ReLU
    h = jnp.dot(h.astype(jnp.bfloat16), w3_ref[...],
                preferred_element_type=jnp.float32)
    h = jnp.maximum(h + b3_ref[...], 0.0)
    # out + ReLU (yes, the reference applies ReLU to the final layer too)
    h = jnp.dot(h.astype(jnp.bfloat16), w4_ref[...],
                preferred_element_type=jnp.float32)
    o_ref[...] = jnp.maximum(h + b4_ref[...], 0.0)


def _pad_and_cast_params(params):
    """Zero-pad W1 rows to K_PAD, W4/b4 cols to N_OUT_PAD; weights -> bf16."""
    (w1, b1), (w2, b2), (w3, b3), (w4, b4) = params
    w1p = jnp.pad(w1, ((0, K_PAD - IN_FEATURES), (0, 0))).astype(jnp.bfloat16)
    w4p = jnp.pad(w4, ((0, 0), (0, N_OUT_PAD - NUM_ACTIONS))).astype(jnp.bfloat16)
    b4p = jnp.pad(b4, ((0, 0), (0, N_OUT_PAD - NUM_ACTIONS))).astype(jnp.float32)
    return (w1p, b1.astype(jnp.float32),
            w2.astype(jnp.bfloat16), b2.astype(jnp.float32),
            w3.astype(jnp.bfloat16), b3.astype(jnp.float32),
            w4p, b4p)


def dqn_forward(t, params):
    """t: (B, 1, H, W) float32 NCHW. Returns (B, NUM_ACTIONS) float32."""
    B = t.shape[0]
    x = t.reshape(B, -1).astype(jnp.float32)       # flatten(start_dim=1)

    # Pad batch to the bf16 sublane multiple (16) and K to the lane multiple
    # (128). Zero padding keeps the real rows/columns bit-identical.
    if B <= 128:
        b_pad = _round_up(B, 16)
        tile_b = b_pad
    else:
        tile_b = 128
        b_pad = _round_up(B, tile_b)
    x = jnp.pad(x, ((0, b_pad - B), (0, K_PAD - IN_FEATURES)))
    x = x.astype(jnp.bfloat16)

    w1, b1, w2, b2, w3, b3, w4, b4 = _pad_and_cast_params(params)
    n_blocks = b_pad // tile_b

    # Weights/biases use a constant index_map so they stay VMEM-resident
    # across the batch grid steps (fetched once, not re-streamed per tile).
    resident = lambda shape: pl.BlockSpec(shape, lambda i: (0,) * len(shape))

    out = pl.pallas_call(
        dqn_mlp_kernel,
        out_shape=jax.ShapeDtypeStruct((b_pad, N_OUT_PAD), jnp.float32),
        grid_spec=pltpu.PrefetchScalarGridSpec(
            num_scalar_prefetch=0,
            grid=(n_blocks,),
            in_specs=[
                pl.BlockSpec((tile_b, K_PAD), lambda i: (i, 0)),
                resident(w1.shape), resident(b1.shape),
                resident(w2.shape), resident(b2.shape),
                resident(w3.shape), resident(b3.shape),
                resident(w4.shape), resident(b4.shape),
            ],
            out_specs=pl.BlockSpec((tile_b, N_OUT_PAD), lambda i: (i, 0)),
        ),
        compiler_params=pltpu.CompilerParams(
            dimension_semantics=("parallel",),   # lets v7x's 2nd TC shard batch
            vmem_limit_bytes=32 << 20,
        ),
    )(x, w1, b1, w2, b2, w3, b3, w4, b4)

    return out[:B, :NUM_ACTIONS]


def init_params(key):
    """Deterministic synthetic init (weights ~ N(0, 1/sqrt(fan_in)), biases 0)."""
    dims = [(IN_FEATURES, H1), (H1, H2), (H2, H3), (H3, NUM_ACTIONS)]
    params = []
    for i, (din, dout) in enumerate(dims):
        k = jax.random.fold_in(key, i)
        std = 1.0 / (din ** 0.5)
        w = std * jax.random.normal(k, (din, dout), dtype=jnp.float32)
        b = jnp.zeros((1, dout), dtype=jnp.float32)
        params.append((w, b))
    return params


def reference_forward(t, params):
    """Same math in plain XLA with the same bf16 weight/activation casts."""
    B = t.shape[0]
    x = t.reshape(B, -1).astype(jnp.float32)
    x = jnp.pad(x, ((0, 0), (0, K_PAD - IN_FEATURES))).astype(jnp.bfloat16)
    w1, b1, w2, b2, w3, b3, w4, b4 = _pad_and_cast_params(params)
    h = jnp.maximum(jnp.dot(x, w1, preferred_element_type=jnp.float32) + b1, 0.0)
    h = jnp.maximum(jnp.dot(h.astype(jnp.bfloat16), w2,
                            preferred_element_type=jnp.float32) + b2, 0.0)
    h = jnp.maximum(jnp.dot(h.astype(jnp.bfloat16), w3,
                            preferred_element_type=jnp.float32) + b3, 0.0)
    h = jnp.maximum(jnp.dot(h.astype(jnp.bfloat16), w4,
                            preferred_element_type=jnp.float32) + b4, 0.0)
    return h[:, :NUM_ACTIONS]


if __name__ == "__main__":
    key = jax.random.PRNGKey(0)
    kx, kp = jax.random.split(key)

    B = 2
    t = jax.random.normal(kx, (B, 1, IMG_H, IMG_W), dtype=jnp.float32)
    params = init_params(kp)

    out = dqn_forward(t, params)
    out = jax.block_until_ready(out)

    ref = reference_forward(t, params)
    assert out.shape == (B, NUM_ACTIONS)
    # bf16 weights are intentional (perf); compare against the same-precision
    # XLA path, differences are only fp32 accumulation order.
    assert jnp.allclose(out, ref, atol=1e-2, rtol=1e-2), "mismatch vs reference"

    print("KERNEL_OK")
</pallas_src>

<mosaic_0001>
module attributes {stable_mosaic.version = 11 : i64} {
  func.func @dqn_mlp_kernel(%arg0: i32, %arg1: memref<16x7680xbf16, #tpu.memory_space<vmem>>, %arg2: memref<7680x256xbf16, #tpu.memory_space<vmem>>, %arg3: memref<1x256xf32, #tpu.memory_space<vmem>>, %arg4: memref<256x128xbf16, #tpu.memory_space<vmem>>, %arg5: memref<1x128xf32, #tpu.memory_space<vmem>>, %arg6: memref<128x64xbf16, #tpu.memory_space<vmem>>, %arg7: memref<1x64xf32, #tpu.memory_space<vmem>>, %arg8: memref<64x128xbf16, #tpu.memory_space<vmem>>, %arg9: memref<1x128xf32, #tpu.memory_space<vmem>>, %arg10: memref<16x128xf32, #tpu.memory_space<vmem>>) attributes {dimension_semantics = [#tpu.dimension_semantics<parallel>], iteration_bounds = array<i64: 1>, scalar_prefetch = 0 : i64, scratch_operands = 0 : i64, tpu.core_type = #tpu.core_type<tc>, window_params = [{transform_indices = @transform_0, window_bounds = array<i64: 16, 7680>}, {pipeline_mode = #tpu.pipeline_mode<synchronous>, transform_indices = @transform_1, window_bounds = array<i64: 7680, 256>}, {pipeline_mode = #tpu.pipeline_mode<synchronous>, transform_indices = @transform_2, window_bounds = array<i64: 1, 256>}, {pipeline_mode = #tpu.pipeline_mode<synchronous>, transform_indices = @transform_3, window_bounds = array<i64: 256, 128>}, {pipeline_mode = #tpu.pipeline_mode<synchronous>, transform_indices = @transform_4, window_bounds = array<i64: 1, 128>}, {pipeline_mode = #tpu.pipeline_mode<synchronous>, transform_indices = @transform_5, window_bounds = array<i64: 128, 64>}, {pipeline_mode = #tpu.pipeline_mode<synchronous>, transform_indices = @transform_6, window_bounds = array<i64: 1, 64>}, {pipeline_mode = #tpu.pipeline_mode<synchronous>, transform_indices = @transform_7, window_bounds = array<i64: 64, 128>}, {pipeline_mode = #tpu.pipeline_mode<synchronous>, transform_indices = @transform_8, window_bounds = array<i64: 1, 128>}, {transform_indices = @transform_9, window_bounds = array<i64: 16, 128>}]} {
    %c0 = arith.constant 0 : index
    %c0_0 = arith.constant 0 : index
    %0 = vector.load %arg1[%c0, %c0_0] : memref<16x7680xbf16, #tpu.memory_space<vmem>>, vector<16x7680xbf16>
    %c0_1 = arith.constant 0 : index
    %c0_2 = arith.constant 0 : index
    %1 = vector.load %arg2[%c0_1, %c0_2] : memref<7680x256xbf16, #tpu.memory_space<vmem>>, vector<7680x256xbf16>
    %cst = arith.constant dense<0.000000e+00> : vector<16x256xf32>
    %2 = tpu.matmul %0, %1, %cst {dimension_numbers = #tpu.dot_dimension_numbers<[1], [0], [0], [1], [0, 0, 1, 1], [], []>} : vector<16x7680xbf16>, vector<7680x256xbf16>, vector<16x256xf32> -> vector<16x256xf32>
    %c0_3 = arith.constant 0 : index
    %c0_4 = arith.constant 0 : index
    %3 = vector.load %arg3[%c0_3, %c0_4] : memref<1x256xf32, #tpu.memory_space<vmem>>, vector<1x256xf32>
    %4 = vector.broadcast %3 : vector<1x256xf32> to vector<16x256xf32>
    %5 = arith.addf %2, %4 : vector<16x256xf32>
    %cst_5 = arith.constant 0.000000e+00 : f32
    %6 = vector.broadcast %cst_5 : f32 to vector<16x256xf32>
    %7 = arith.maximumf %5, %6 : vector<16x256xf32>
    %8 = arith.truncf %7 : vector<16x256xf32> to vector<16x256xbf16>
    %c0_6 = arith.constant 0 : index
    %c0_7 = arith.constant 0 : index
    %9 = vector.load %arg4[%c0_6, %c0_7] : memref<256x128xbf16, #tpu.memory_space<vmem>>, vector<256x128xbf16>
    %cst_8 = arith.constant dense<0.000000e+00> : vector<16x128xf32>
    %10 = tpu.matmul %8, %9, %cst_8 {dimension_numbers = #tpu.dot_dimension_numbers<[1], [0], [0], [1], [0, 0, 1, 1], [], []>} : vector<16x256xbf16>, vector<256x128xbf16>, vector<16x128xf32> -> vector<16x128xf32>
    %c0_9 = arith.constant 0 : index
    %c0_10 = arith.constant 0 : index
    %11 = vector.load %arg5[%c0_9, %c0_10] : memref<1x128xf32, #tpu.memory_space<vmem>>, vector<1x128xf32>
    %12 = vector.broadcast %11 : vector<1x128xf32> to vector<16x128xf32>
    %13 = arith.addf %10, %12 : vector<16x128xf32>
    %cst_11 = arith.constant 0.000000e+00 : f32
    %14 = vector.broadcast %cst_11 : f32 to vector<16x128xf32>
    %15 = arith.maximumf %13, %14 : vector<16x128xf32>
    %16 = arith.truncf %15 : vector<16x128xf32> to vector<16x128xbf16>
    %c0_12 = arith.constant 0 : index
    %c0_13 = arith.constant 0 : index
    %17 = vector.load %arg6[%c0_12, %c0_13] : memref<128x64xbf16, #tpu.memory_space<vmem>>, vector<128x64xbf16>
    %cst_14 = arith.constant dense<0.000000e+00> : vector<16x64xf32>
    %18 = tpu.matmul %16, %17, %cst_14 {dimension_numbers = #tpu.dot_dimension_numbers<[1], [0], [0], [1], [0, 0, 1, 1], [], []>} : vector<16x128xbf16>, vector<128x64xbf16>, vector<16x64xf32> -> vector<16x64xf32>
    %c0_15 = arith.constant 0 : index
    %c0_16 = arith.constant 0 : index
    %19 = vector.load %arg7[%c0_15, %c0_16] : memref<1x64xf32, #tpu.memory_space<vmem>>, vector<1x64xf32>
    %20 = vector.broadcast %19 : vector<1x64xf32> to vector<16x64xf32>
    %21 = arith.addf %18, %20 : vector<16x64xf32>
    %cst_17 = arith.constant 0.000000e+00 : f32
    %22 = vector.broadcast %cst_17 : f32 to vector<16x64xf32>
    %23 = arith.maximumf %21, %22 : vector<16x64xf32>
    %24 = arith.truncf %23 : vector<16x64xf32> to vector<16x64xbf16>
    %c0_18 = arith.constant 0 : index
    %c0_19 = arith.constant 0 : index
    %25 = vector.load %arg8[%c0_18, %c0_19] : memref<64x128xbf16, #tpu.memory_space<vmem>>, vector<64x128xbf16>
    %cst_20 = arith.constant dense<0.000000e+00> : vector<16x128xf32>
    %26 = tpu.matmul %24, %25, %cst_20 {dimension_numbers = #tpu.dot_dimension_numbers<[1], [0], [0], [1], [0, 0, 1, 1], [], []>} : vector<16x64xbf16>, vector<64x128xbf16>, vector<16x128xf32> -> vector<16x128xf32>
    %c0_21 = arith.constant 0 : index
    %c0_22 = arith.constant 0 : index
    %27 = vector.load %arg9[%c0_21, %c0_22] : memref<1x128xf32, #tpu.memory_space<vmem>>, vector<1x128xf32>
    %28 = vector.broadcast %27 : vector<1x128xf32> to vector<16x128xf32>
    %29 = arith.addf %26, %28 : vector<16x128xf32>
    %cst_23 = arith.constant 0.000000e+00 : f32
    %30 = vector.broadcast %cst_23 : f32 to vector<16x128xf32>
    %31 = arith.maximumf %29, %30 : vector<16x128xf32>
    %c0_24 = arith.constant 0 : index
    %c0_25 = arith.constant 0 : index
    %32 = vector.load %arg10[%c0_24, %c0_25] : memref<16x128xf32, #tpu.memory_space<vmem>>, vector<16x128xf32>
    tpu.vector_store %arg10[%c0_24, %c0_25], %31 {strides = array<i32>} : memref<16x128xf32, #tpu.memory_space<vmem>>, vector<16x128xf32>,
    return
  }
  func.func @transform_0(%arg0: i32) -> (i32, i32) {
    %c0_i32 = arith.constant 0 : i32
    %c0_i32_0 = arith.constant 0 : i32
    return %arg0, %c0_i32 : i32, i32
  }
  func.func @transform_1(%arg0: i32) -> (i32, i32) {
    %c0_i32 = arith.constant 0 : i32
    %c0_i32_0 = arith.constant 0 : i32
    %c0_i32_1 = arith.constant 0 : i32
    return %c0_i32, %c0_i32_0 : i32, i32
  }
  func.func @transform_2(%arg0: i32) -> (i32, i32) {
    %c0_i32 = arith.constant 0 : i32
    %c0_i32_0 = arith.constant 0 : i32
    %c0_i32_1 = arith.constant 0 : i32
    return %c0_i32, %c0_i32_0 : i32, i32
  }
  func.func @transform_3(%arg0: i32) -> (i32, i32) {
    %c0_i32 = arith.constant 0 : i32
    %c0_i32_0 = arith.constant 0 : i32
    %c0_i32_1 = arith.constant 0 : i32
    return %c0_i32, %c0_i32_0 : i32, i32
  }
  func.func @transform_4(%arg0: i32) -> (i32, i32) {
    %c0_i32 = arith.constant 0 : i32
    %c0_i32_0 = arith.constant 0 : i32
    %c0_i32_1 = arith.constant 0 : i32
    return %c0_i32, %c0_i32_0 : i32, i32
  }
  func.func @transform_5(%arg0: i32) -> (i32, i32) {
    %c0_i32 = arith.constant 0 : i32
    %c0_i32_0 = arith.constant 0 : i32
    %c0_i32_1 = arith.constant 0 : i32
    return %c0_i32, %c0_i32_0 : i32, i32
  }
  func.func @transform_6(%arg0: i32) -> (i32, i32) {
    %c0_i32 = arith.constant 0 : i32
    %c0_i32_0 = arith.constant 0 : i32
    %c0_i32_1 = arith.constant 0 : i32
    return %c0_i32, %c0_i32_0 : i32, i32
  }
  func.func @transform_7(%arg0: i32) -> (i32, i32) {
    %c0_i32 = arith.constant 0 : i32
    %c0_i32_0 = arith.constant 0 : i32
    %c0_i32_1 = arith.constant 0 : i32
    return %c0_i32, %c0_i32_0 : i32, i32
  }
  func.func @transform_8(%arg0: i32) -> (i32, i32) {
    %c0_i32 = arith.constant 0 : i32
    %c0_i32_0 = arith.constant 0 : i32
    %c0_i32_1 = arith.constant 0 : i32
    return %c0_i32, %c0_i32_0 : i32, i32
  }
  func.func @transform_9(%arg0: i32) -> (i32, i32) {
    %c0_i32 = arith.constant 0 : i32
    %c0_i32_0 = arith.constant 0 : i32
    return %arg0, %c0_i32 : i32, i32
  }
}

</mosaic_0001>

<bundles_post_ra>
// kernel: tpu_custom_call.1
= control target key start
LH: loop header
LB: loop body
LE: loop exit
PB: predicated region body
PF: predicated region fallthrough
CT: control target
= control target key end

     0   :  { %14 = vsyncpa [#allocation3], 0  ;;  %s11246_s0 = inlined_call_operand.hbm [shape: bf16[16,7680], index: 0, kind: input, shape index: {}]   ;;  %s11247_s1 = inlined_call_operand.hbm [shape: bf16[7680,256], index: 1, kind: input, shape index: {}]   ;;  %s11248_s2 = inlined_call_operand.hbm [shape: f32[1,256], index: 2, kind: input, shape index: {}]   ;;  %s11249_s3 = inlined_call_operand.hbm [shape: bf16[256,128], index: 3, kind: input, shape index: {}]   ;;  %s11250_s4 = inlined_call_operand.hbm [shape: f32[1,128], index: 4, kind: input, shape index: {}]   ;;  %s11251_s5 = inlined_call_operand.vmem [shape: bf16[128,64], index: 5, kind: input, shape index: {}]   ;;  %s11252_s6 = inlined_call_operand.hbm [shape: f32[1,64], index: 6, kind: input, shape index: {}]   ;;  %s11253_s7 = inlined_call_operand.hbm [shape: bf16[64,128], index: 7, kind: input, shape index: {}]   ;;  %s11254_s8 = inlined_call_operand.hbm [shape: f32[1,128], index: 8, kind: input, shape index: {}]   ;;  %s11255_s9 = inlined_call_operand.hbm [shape: f32[16,128], index: 9, kind: output, shape index: {}]  }
   0x1   :  { %15 = vsyncpa [#allocation6], 0 }
   0x2   :  { %16 = vsyncpa [#allocation9], 0 }
   0x3   :  { %17 = vsyncpa [#allocation12], 0 }
   0x4   :  { %18 = vsyncpa [#allocation15], 0 }
   0x5   :  { %19 = vsyncpa [#allocation4], 0  ;;  %s10853_s30 = smov [#allocation5]  }
   0x6   :  { %s37_s10 = sshll.u32 %s10853_s30, 4  ;;  %s38_s10 = int_to_ptr.vmem [resolvable:$true] %s37_s10 }
   0x7   :  { %s10669_s11 = scalar_lea.vmem %s38_s10, 122880  ;;  %p10674_p1 = scmp.lt.s32.totalorder %s38_s10, %s38_s10 }
   0x8   :  { %p10670_p0 = scmp.ne.s32.totalorder %s38_s10, %s10669_s11  ;;  %p10675_p2 = scmp.lt.s32.totalorder %s10669_s11, %s10669_s11 }
   0xa   :  { %p10676_p3 = por %p10675_p2, %p10674_p1 }
   0xc   :  { %p10677_p4 = pnand %p10676_p3, %p10670_p0 }
   0xe   :  { %10680 = shalt.err (!%p10677_p4)
}
   0xf   :  { %s10854_s12 = smov 128   ;;  %s10855_s13 = smov 8  }
  0x10   :  { %43 = dma.hbm_to_vmem [thread:$0]  %s11247_s1, 122880, %s38_s10, [#allocation6], %s10854_s12, %s10854_s12, %s10855_s13  }
  0x11   :  { %s10856_s16 = smov [#allocation8]  }
  0x12   :  { %s59_s17 = sshll.u32 %s10856_s16, 4  ;;  %s60_s17 = int_to_ptr.vmem [resolvable:$true] %s59_s17 }
  0x13   :  { %s10689_s18 = scalar_lea.vmem %s60_s17, 2048  ;;  %p10694_p6 = scmp.lt.s32.totalorder %s60_s17, %s60_s17 }
  0x14   :  { %p10690_p5 = scmp.ne.s32.totalorder %s60_s17, %s10689_s18  ;;  %p10695_p7 = scmp.lt.s32.totalorder %s10689_s18, %s10689_s18 }
  0x16   :  { %p10696_p8 = por %p10695_p7, %p10694_p6 }
  0x18   :  { %p10697_p9 = pnand %p10696_p8, %p10690_p5 }
  0x1a   :  { %10700 = shalt.err (!%p10697_p9)
}
  0x1b   :  { %s10857_s19 = smov 64   ;;  %s10858_s20 = smov 4  }
  0x1c   :  { %65 = dma.hbm_to_vmem [thread:$0]  %s11249_s3, 2048, %s60_s17, [#allocation9], %s10857_s19, %s10857_s19, %s10858_s20  }
  0x1d   :  { %s10859_s1 = smov [#allocation11]   ;;  %s10860_s24 = smov [#allocation2]  }
  0x1e   :  { %s84_s23 = sshll.u32 %s10859_s1, 4  ;;  %s25_s25 = sshll.u32 %s10860_s24, 4  ;;  %s85_s23 = int_to_ptr.vmem [resolvable:$true] %s84_s23  ;;  %s26_s25 = int_to_ptr.vmem [resolvable:$true] %s25_s25 }
  0x1f   :  { %s10709_s26 = scalar_lea.vmem %s85_s23, 16  ;;  %s10713_s27 = scalar_lea.vmem %s85_s23, 32 }
  0x20   :  { %p10710_p10 = scmp.ne.s32.totalorder %s85_s23, %s10709_s26  ;;  %p10714_p11 = scmp.lt.s32.totalorder %s85_s23, %s85_s23 }
  0x21   :  { %p10715_p12 = scmp.lt.s32.totalorder %s10713_s27, %s10709_s26 }
  0x23   :  { %p10716_p13 = por %p10715_p12, %p10714_p11 }
  0x25   :  { %p10717_p0 = pnand %p10716_p13, %p10710_p10 }
  0x27   :  { %10720 = shalt.err (!%p10717_p0)
}
  0x28   :  { %87 = dma.hbm_to_vmem [thread:$0]  %s11252_s6, 16, %s85_s23, [#allocation12]  }
  0x29   :  { %s10729_s30 = scalar_lea.vmem %s26_s25, 7680  ;;  %p10734_p2 = scmp.lt.s32.totalorder %s26_s25, %s26_s25 }
  0x2a   :  { %p10730_p1 = scmp.ne.s32.totalorder %s26_s25, %s10729_s30  ;;  %p10735_p3 = scmp.lt.s32.totalorder %s10729_s30, %s10729_s30 }
  0x2c   :  { %p10736_p4 = por %p10735_p3, %p10734_p2 }
  0x2e   :  { %p10737_p5 = pnand %p10736_p4, %p10730_p1 }
  0x30   :  { %10740 = shalt.err (!%p10737_p5)
}
  0x31   :  { %s10861_s3 = smov 3840   ;;  %s10862_s10 = smov 240  }
  0x32   :  { %31 = dma.hbm_to_vmem [thread:$0]  %s11246_s0, 7680, %s26_s25, [#allocation3], %s10861_s3, %s10861_s3, %s10862_s10  }
  0x33   :  { %s10863_s15 = smov [#allocation7]   ;;  %s10864_s17 = smov [#allocation10]  }
  0x34   :  { %s50_s16 = sshll.u32 %s10863_s15, 4  ;;  %s72_s18 = sshll.u32 %s10864_s17, 4  ;;  %s51_s16 = int_to_ptr.vmem [resolvable:$true] %s50_s16  ;;  %s73_s18 = int_to_ptr.vmem [resolvable:$true] %s72_s18 }
  0x35   :  { %s10749_s6 = scalar_lea.vmem %s51_s16, 32  ;;  %p10754_p7 = scmp.lt.s32.totalorder %s51_s16, %s51_s16 }
  0x36   :  { %p10750_p6 = scmp.ne.s32.totalorder %s51_s16, %s10749_s6  ;;  %p10755_p8 = scmp.lt.s32.totalorder %s10749_s6, %s10749_s6 }
  0x38   :  { %p10756_p9 = por %p10755_p8, %p10754_p7 }
  0x3a   :  { %p10757_p10 = pnand %p10756_p9, %p10750_p6 }
  0x3c   :  { %10760 = shalt.err (!%p10757_p10)
}
  0x3d   :  { %53 = dma.hbm_to_vmem [thread:$0]  %s11248_s2, 32, %s51_s16, [#allocation6]  }
  0x3e   :  { %s10769_s1 = scalar_lea.vmem %s73_s18, 16  ;;  %s10773_s0 = scalar_lea.vmem %s73_s18, 32 }
  0x3f   :  { %p10770_p11 = scmp.ne.s32.totalorder %s73_s18, %s10769_s1  ;;  %p10774_p12 = scmp.lt.s32.totalorder %s73_s18, %s73_s18 }
  0x40   :  { %p10775_p13 = scmp.lt.s32.totalorder %s10773_s0, %s10769_s1 }
  0x42   :  { %p10776_p0 = por %p10775_p13, %p10774_p12 }
  0x44   :  { %p10777_p1 = pnand %p10776_p0, %p10770_p11 }
  0x46   :  { %10780 = shalt.err (!%p10777_p1)
}
  0x47   :  { %75 = dma.hbm_to_vmem [thread:$0]  %s11250_s4, 16, %s73_s18, [#allocation9]  }
  0x48   :  { %s10865_s25 = smov [#allocation13]   ;;  %s10866_s27 = smov [#allocation14]  }
  0x49   :  { %s93_s26 = sshll.u32 %s10865_s25, 4  ;;  %s106_s28 = sshll.u32 %s10866_s27, 4  ;;  %s94_s26 = int_to_ptr.vmem [resolvable:$true] %s93_s26  ;;  %s107_s28 = int_to_ptr.vmem [resolvable:$true] %s106_s28 }
  0x4a   :  { %s10789_s29 = scalar_lea.vmem %s94_s26, 512  ;;  %p10794_p3 = scmp.lt.s32.totalorder %s94_s26, %s94_s26 }
  0x4b   :  { %p10790_p2 = scmp.ne.s32.totalorder %s94_s26, %s10789_s29  ;;  %p10795_p4 = scmp.lt.s32.totalorder %s10789_s29, %s10789_s29 }
  0x4d   :  { %p10796_p5 = por %p10795_p4, %p10794_p3 }
  0x4f   :  { %p10797_p6 = pnand %p10796_p5, %p10790_p2 }
  0x51   :  { %10800 = shalt.err (!%p10797_p6)
}
  0x52   :  { %99 = dma.hbm_to_vmem [thread:$0]  %s11253_s7, 512, %s94_s26, [#allocation12], %s10857_s19, %s10857_s19, %s10858_s20  }
  0x53   :  { %s10809_s4 = scalar_lea.vmem %s107_s28, 16  ;;  %s10813_s3 = scalar_lea.vmem %s107_s28, 32 }
  0x54   :  { %p10810_p7 = scmp.ne.s32.totalorder %s107_s28, %s10809_s4  ;;  %p10814_p8 = scmp.lt.s32.totalorder %s107_s28, %s107_s28 }
  0x55   :  { %p10815_p9 = scmp.lt.s32.totalorder %s10813_s3, %s10809_s4 }
  0x57   :  { %p10816_p10 = por %p10815_p9, %p10814_p8 }
  0x59   :  { %p10817_p11 = pnand %p10816_p10, %p10810_p7 }
  0x5b   :  { %10820 = shalt.err (!%p10817_p11)
}
  0x5c   :  { %109 = dma.hbm_to_vmem [thread:$0]  %s11254_s8, 16, %s107_s28, [#allocation15]  }
  0x5d   :  { %10841 = dma.done.wait [#allocation3], 7680  }
  0x5e   :  { %10842 = vsyncadd [#allocation3], 4294959616 }
  0x5f   :  { %10843 = dma.done.wait [#allocation6], 122912  }
  0x60   :  { %10844 = vsyncadd [#allocation6], 4294844384 }
  0x61   :  { %10845 = dma.done.wait [#allocation9], 2064  }
  0x62   :  { %10846 = vsyncadd [#allocation9], 4294965232 }
  0x63   :  { %10847 = dma.done.wait [#allocation12], 528  }
  0x64   :  { %10848 = vsyncadd [#allocation12], 4294966768 }
  0x65   :  { %10849 = dma.done.wait [#allocation15], 16  }
  0x66   :  { %10850 = vsyncadd [#allocation15], 4294967280  ;;  %v9103_v0 = vld [vmem:[#allocation5 + $0x74] ss:$8 sps:$4 sm:$0xff]   ;;  %v9107_v2 = vld [vmem:[#allocation5 + $0x70] ss:$8 sps:$4 sm:$0xff]  }
  0x67   :  { %v9105_v1 = vld [vmem:[#allocation5 + $0x174] ss:$8 sps:$4 sm:$0xff]   ;;  %6267 = vmatprep.subr.bf16.mxu0 %v9103_v0  ;;  %v9108_v3 = vld [vmem:[#allocation5 + $0x170] ss:$8 sps:$4 sm:$0xff]   ;;  %v9109_v4 = vld [vmem:[#allocation5 + $0x64] ss:$8 sps:$4 sm:$0xff]  }
  0x68   :  { %6310 = vmatprep.subr.bf16.mxu1 %v9105_v1  ;;  %6268 = vmatpush1.bf16.msra.mxu0 %v9107_v2  ;;  %v9111_v5 = vld [vmem:[#allocation5 + $0x164] ss:$8 sps:$4 sm:$0xff]   ;;  %v9113_v6 = vld [vmem:[#allocation5 + $0x60] ss:$8 sps:$4 sm:$0xff]   ;;  %v9115_v8 = vld [vmem:[#allocation5 + $0x54] ss:$8 sps:$4 sm:$0xff]  }
  0x69   :  { %6311 = vmatpush1.bf16.msra.mxu1 %v9108_v3  ;;  %6269 = vmatprep.subr.bf16.mxu0 %v9109_v4  ;;  %v9114_v7 = vld [vmem:[#allocation5 + $0x160] ss:$8 sps:$4 sm:$0xff]   ;;  %v9117_v9 = vld [vmem:[#allocation5 + $0x154] ss:$8 sps:$4 sm:$0xff]   ;;  %v9119_v10 = vld [vmem:[#allocation5 + $0x50] ss:$8 sps:$4 sm:$0xff]  }
  0x6a   :  { %6312 = vmatprep.subr.bf16.mxu1 %v9111_v5  ;;  %v9120_v11 = vld [vmem:[#allocation5 + $0x150] ss:$8 sps:$4 sm:$0xff]   ;;  %v9121_v12 = vld [vmem:[#allocation5 + $0x44] ss:$8 sps:$4 sm:$0xff]   ;;  %v9125_v14 = vld [vmem:[#allocation5 + $0x40] ss:$8 sps:$4 sm:$0xff]  }
  0x6b   :  { %v9123_v13 = vld [vmem:[#allocation5 + $0x144] ss:$8 sps:$4 sm:$0xff]   ;;  %v9126_v15 = vld [vmem:[#allocation5 + $0x140] ss:$8 sps:$4 sm:$0xff]   ;;  %v9127_v16 = vld [vmem:[#allocation5 + $0x34] ss:$8 sps:$4 sm:$0xff]  }
  0x6c   :  { %6270 = vmatpush1.bf16.msra.mxu0 %v9113_v6  ;;  %v9129_v17 = vld [vmem:[#allocation5 + $0x134] ss:$8 sps:$4 sm:$0xff]   ;;  %v9131_v18 = vld [vmem:[#allocation5 + $0x30] ss:$8 sps:$4 sm:$0xff]   ;;  %v9133_v20 = vld [vmem:[#allocation5 + $0x24] ss:$8 sps:$4 sm:$0xff]  }
  0x6d   :  { %6313 = vmatpush1.bf16.msra.mxu1 %v9114_v7  ;;  %6271 = vmatprep.subr.bf16.mxu0 %v9115_v8  ;;  %v9132_v19 = vld [vmem:[#allocation5 + $0x130] ss:$8 sps:$4 sm:$0xff]   ;;  %v9135_v21 = vld [vmem:[#allocation5 + $0x124] ss:$8 sps:$4 sm:$0xff]   ;;  %v9137_v22 = vld [vmem:[#allocation5 + $0x20] ss:$8 sps:$4 sm:$0xff]  }
  0x6e   :  { %6314 = vmatprep.subr.bf16.mxu1 %v9117_v9  ;;  %v9138_v23 = vld [vmem:[#allocation5 + $0x120] ss:$8 sps:$4 sm:$0xff]   ;;  %v9139_v24 = vld [vmem:[#allocation5 + $0x14] ss:$8 sps:$4 sm:$0xff]   ;;  %v9143_v26 = vld [vmem:[#allocation5 + $0x10] ss:$8 sps:$4 sm:$0xff]  }
  0x6f   :  { %v9141_v25 = vld [vmem:[#allocation5 + $0x114] ss:$8 sps:$4 sm:$0xff]   ;;  %v9144_v27 = vld [vmem:[#allocation5 + $0x110] ss:$8 sps:$4 sm:$0xff]   ;;  %v9145_v28 = vld [vmem:[#allocation5 + $0x4] ss:$8 sps:$4 sm:$0xff]  }
  0x70   :  { %6272 = vmatpush1.bf16.msra.mxu0 %v9119_v10  ;;  %v9147_v29 = vld [vmem:[#allocation5 + $0x104] ss:$8 sps:$4 sm:$0xff]   ;;  %v9149_v30 = vld [vmem:[#allocation5] ss:$8 sps:$4 sm:$0xff]   ;;  %v9151_v32 = vld [vmem:[#allocation5 + $0xf4] ss:$8 sps:$4 sm:$0xff]  }
  0x71   :  { %6315 = vmatpush1.bf16.msra.mxu1 %v9120_v11  ;;  %6273 = vmatprep.subr.bf16.mxu0 %v9121_v12  ;;  %v9150_v31 = vld [vmem:[#allocation5 + $0x100] ss:$8 sps:$4 sm:$0xff]   ;;  %v9153_v33 = vld [vmem:[#allocation5 + $0x1f4] ss:$8 sps:$4 sm:$0xff]   ;;  %v9155_v34 = vld [vmem:[#allocation5 + $0xf0] ss:$8 sps:$4 sm:$0xff]  }
  0x72   :  { %6316 = vmatprep.subr.bf16.mxu1 %v9123_v13  ;;  %v9156_v35 = vld [vmem:[#allocation5 + $0x1f0] ss:$8 sps:$4 sm:$0xff]   ;;  %v9157_v36 = vld [vmem:[#allocation5 + $0xe4] ss:$8 sps:$4 sm:$0xff]   ;;  %v9161_v38 = vld [vmem:[#allocation5 + $0xe0] ss:$8 sps:$4 sm:$0xff]  }
  0x73   :  { %v9159_v37 = vld [vmem:[#allocation5 + $0x1e4] ss:$8 sps:$4 sm:$0xff]   ;;  %v9162_v39 = vld [vmem:[#allocation5 + $0x1e0] ss:$8 sps:$4 sm:$0xff]   ;;  %v9163_v40 = vld [vmem:[#allocation5 + $0xd4] ss:$8 sps:$4 sm:$0xff]  }
  0x74   :  { %6274 = vmatpush1.bf16.msra.mxu0 %v9125_v14  ;;  %v9165_v41 = vld [vmem:[#allocation5 + $0x1d4] ss:$8 sps:$4 sm:$0xff]   ;;  %v9167_v42 = vld [vmem:[#allocation5 + $0xd0] ss:$8 sps:$4 sm:$0xff]   ;;  %v9169_v44 = vld [vmem:[#allocation5 + $0xc4] ss:$8 sps:$4 sm:$0xff]  }
  0x75   :  { %6317 = vmatpush1.bf16.msra.mxu1 %v9126_v15  ;;  %6275 = vmatprep.subr.bf16.mxu0 %v9127_v16  ;;  %v9168_v43 = vld [vmem:[#allocation5 + $0x1d0] ss:$8 sps:$4 sm:$0xff]   ;;  %v9171_v45 = vld [vmem:[#allocation5 + $0x1c4] ss:$8 sps:$4 sm:$0xff]   ;;  %v9173_v46 = vld [vmem:[#allocation5 + $0xc0] ss:$8 sps:$4 sm:$0xff]  }
  0x76   :  { %6318 = vmatprep.subr.bf16.mxu1 %v9129_v17  ;;  %v9174_v47 = vld [vmem:[#allocation5 + $0x1c0] ss:$8 sps:$4 sm:$0xff]   ;;  %v9175_v48 = vld [vmem:[#allocation5 + $0xb4] ss:$8 sps:$4 sm:$0xff]   ;;  %v9179_v52 = vld [vmem:[#allocation5 + $0xb0] ss:$8 sps:$4 sm:$0xff]  }
  0x77   :  { %v9201_v49 = vld [vmem:[#allocation2 + $0x4] ss:$240 sps:$4 sm:$0xff]   ;;  %v9204_v51 = vld [vmem:[#allocation2 + $0xc] ss:$240 sps:$4 sm:$0xff]   ;;  %v9180_v53 = vld [vmem:[#allocation5 + $0x1b0] ss:$8 sps:$4 sm:$0xff]  }
  0x78   :  { %6276 = vmatpush1.bf16.msra.mxu0 %v9131_v18  ;;  %v9177_v50 = vld [vmem:[#allocation5 + $0x1b4] ss:$8 sps:$4 sm:$0xff]   ;;  %6299 = vmatprep.mubr.bf16.mxu0 %v9201_v49  ;;  %v9181_v54 = vld [vmem:[#allocation5 + $0xa4] ss:$8 sps:$4 sm:$0xff]   ;;  %v9185_v56 = vld [vmem:[#allocation5 + $0xa0] ss:$8 sps:$4 sm:$0xff]  }
  0x79   :  { %6319 = vmatpush1.bf16.msra.mxu1 %v9132_v19  ;;  %6277 = vmatprep.subr.bf16.mxu0 %v9133_v20  ;;  %v9183_v55 = vld [vmem:[#allocation5 + $0x1a4] ss:$8 sps:$4 sm:$0xff]   ;;  %v9186_v57 = vld [vmem:[#allocation5 + $0x1a0] ss:$8 sps:$4 sm:$0xff]   ;;  %v9187_v58 = vld [vmem:[#allocation5 + $0x94] ss:$8 sps:$4 sm:$0xff]  }
  0x7a   :  { %6320 = vmatprep.subr.bf16.mxu1 %v9135_v21  ;;  %6342 = vmatprep.mubr.bf16.mxu1 %v9204_v51  ;;  %v9189_v59 = vld [vmem:[#allocation5 + $0x194] ss:$8 sps:$4 sm:$0xff]   ;;  %v9191_v60 = vld [vmem:[#allocation5 + $0x90] ss:$8 sps:$4 sm:$0xff]   ;;  %v9193_v62 = vld [vmem:[#allocation5 + $0x84] ss:$8 sps:$4 sm:$0xff]  }
  0x7b   :  { %v9192_v61 = vld [vmem:[#allocation5 + $0x190] ss:$8 sps:$4 sm:$0xff]   ;;  %v9195_v63 = vld [vmem:[#allocation5 + $0x184] ss:$8 sps:$4 sm:$0xff]   ;;  %v9197_v0 = vld [vmem:[#allocation5 + $0x80] ss:$8 sps:$4 sm:$0xff]  }
  0x7c   :  { %6278 = vmatpush1.bf16.msra.mxu0 %v9137_v22  ;;  %v9198_v1 = vld [vmem:[#allocation5 + $0x180] ss:$8 sps:$4 sm:$0xff]   ;;  %v9207_v2 = vld [vmem:[#allocation5 + $0x274] ss:$8 sps:$4 sm:$0xff]   ;;  %v9205_v6 = vld [vmem:[#allocation5 + $0x270] ss:$8 sps:$4 sm:$0xff]  }
  0x7d   :  { %6321 = vmatpush1.bf16.msra.mxu1 %v9138_v23  ;;  %6279 = vmatprep.subr.bf16.mxu0 %v9139_v24  ;;  %v9210_v3 = vld [vmem:[#allocation5 + $0x374] ss:$8 sps:$4 sm:$0xff]   ;;  %v9199_v4 = vld [vmem:[#allocation2] ss:$240 sps:$4 sm:$0xff]   ;;  %v9202_v5 = vld [vmem:[#allocation2 + $0x8] ss:$240 sps:$4 sm:$0xff]  }
  0x7e   :  { %6322 = vmatprep.subr.bf16.mxu1 %v9141_v25  ;;  %v9208_v7 = vld [vmem:[#allocation5 + $0x370] ss:$8 sps:$4 sm:$0xff]   ;;  %v9213_v8 = vld [vmem:[#allocation5 + $0x264] ss:$8 sps:$4 sm:$0xff]   ;;  %v9211_v10 = vld [vmem:[#allocation5 + $0x260] ss:$8 sps:$4 sm:$0xff]  }
  0x7f   :  { %v9216_v9 = vld [vmem:[#allocation5 + $0x364] ss:$8 sps:$4 sm:$0xff]   ;;  %v9214_v11 = vld [vmem:[#allocation5 + $0x360] ss:$8 sps:$4 sm:$0xff]   ;;  %v9219_v12 = vld [vmem:[#allocation5 + $0x254] ss:$8 sps:$4 sm:$0xff]  }
  0x80   :  { %6280 = vmatpush1.bf16.msra.mxu0 %v9143_v26  ;;  %v9222_v13 = vld [vmem:[#allocation5 + $0x354] ss:$8 sps:$4 sm:$0xff]   ;;  %v9217_v14 = vld [vmem:[#allocation5 + $0x250] ss:$8 sps:$4 sm:$0xff]   ;;  %v9225_v16 = vld [vmem:[#allocation5 + $0x244] ss:$8 sps:$4 sm:$0xff]  }
  0x81   :  { %6323 = vmatpush1.bf16.msra.mxu1 %v9144_v27  ;;  %6281 = vmatprep.subr.bf16.mxu0 %v9145_v28  ;;  %v9220_v15 = vld [vmem:[#allocation5 + $0x350] ss:$8 sps:$4 sm:$0xff]   ;;  %v9228_v17 = vld [vmem:[#allocation5 + $0x344] ss:$8 sps:$4 sm:$0xff]   ;;  %v9223_v18 = vld [vmem:[#allocation5 + $0x240] ss:$8 sps:$4 sm:$0xff]  }
  0x82   :  { %6324 = vmatprep.subr.bf16.mxu1 %v9147_v29  ;;  %v9226_v19 = vld [vmem:[#allocation5 + $0x340] ss:$8 sps:$4 sm:$0xff]   ;;  %v9231_v20 = vld [vmem:[#allocation5 + $0x234] ss:$8 sps:$4 sm:$0xff]   ;;  %v9229_v22 = vld [vmem:[#allocation5 + $0x230] ss:$8 sps:$4 sm:$0xff]  }
  0x83   :  { %v9234_v21 = vld [vmem:[#allocation5 + $0x334] ss:$8 sps:$4 sm:$0xff]   ;;  %v9232_v23 = vld [vmem:[#allocation5 + $0x330] ss:$8 sps:$4 sm:$0xff]   ;;  %v9237_v24 = vld [vmem:[#allocation5 + $0x224] ss:$8 sps:$4 sm:$0xff]  }
  0x84   :  { %6282 = vmatpush1.bf16.msra.mxu0 %v9149_v30  ;;  %v9240_v25 = vld [vmem:[#allocation5 + $0x324] ss:$8 sps:$4 sm:$0xff]   ;;  %v9235_v26 = vld [vmem:[#allocation5 + $0x220] ss:$8 sps:$4 sm:$0xff]   ;;  %v9243_v28 = vld [vmem:[#allocation5 + $0x214] ss:$8 sps:$4 sm:$0xff]  }
  0x85   :  { %6325 = vmatpush1.bf16.msra.mxu1 %v9150_v31  ;;  %6283 = vmatprep.subr.bf16.mxu0 %v9151_v32  ;;  %v9238_v27 = vld [vmem:[#allocation5 + $0x320] ss:$8 sps:$4 sm:$0xff]   ;;  %v9246_v29 = vld [vmem:[#allocation5 + $0x314] ss:$8 sps:$4 sm:$0xff]   ;;  %v9241_v30 = vld [vmem:[#allocation5 + $0x210] ss:$8 sps:$4 sm:$0xff]  }
  0x86   :  { %6326 = vmatprep.subr.bf16.mxu1 %v9153_v33  ;;  %v9244_v31 = vld [vmem:[#allocation5 + $0x310] ss:$8 sps:$4 sm:$0xff]   ;;  %v9249_v32 = vld [vmem:[#allocation5 + $0x204] ss:$8 sps:$4 sm:$0xff]   ;;  %vm10868_vm0 = vmmov 0   ;;  %vm7896_vm1 = vcmask 523264  }
  0x87   :  { %v9252_v33 = vld [vmem:[#allocation5 + $0x304] ss:$8 sps:$4 sm:$0xff]   ;;  %v9268_v49 = vld [vmem:[#allocation5 + $0x3d0] ss:$8 sps:$4 sm:$0xff]  }
  0x88   :  { %6284 = vmatpush2.bf16.msra.mxu0 %v9155_v34  ;;  %v9303_v34 = vld [vmem:[#allocation2 + $0x14] ss:$240 sps:$4 sm:$0xff]  }
  0x89   :  { %6327 = vmatpush2.bf16.msra.mxu1 %v9156_v35  ;;  %6285 = vmatprep.subr.bf16.mxu0 %v9157_v36  ;;  %v9306_v35 = vld [vmem:[#allocation2 + $0x1c] ss:$240 sps:$4 sm:$0xff]   ;;  %v9247_v36 = vld [vmem:[#allocation5 + $0x200] ss:$8 sps:$4 sm:$0xff]  }
  0x8a   :  { %6328 = vmatprep.subr.bf16.mxu1 %v9159_v37  ;;  %v9250_v37 = vld [vmem:[#allocation5 + $0x300] ss:$8 sps:$4 sm:$0xff]   ;;  %v9276_v51 = vld [vmem:[#allocation5 + $0x3c4] ss:$8 sps:$4 sm:$0xff]  }
  0x8c   :  { %6286 = vmatpush2.bf16.msra.mxu0 %v9161_v38  ;;  %v9255_v38 = vld [vmem:[#allocation5 + $0x2f4] ss:$8 sps:$4 sm:$0xff]  }
  0x8d   :  { %6329 = vmatpush2.bf16.msra.mxu1 %v9162_v39  ;;  %6287 = vmatprep.subr.bf16.mxu0 %v9163_v40  ;;  %v9258_v39 = vld [vmem:[#allocation5 + $0x3f4] ss:$8 sps:$4 sm:$0xff]   ;;  %v9253_v40 = vld [vmem:[#allocation5 + $0x2f0] ss:$8 sps:$4 sm:$0xff]  }
  0x8e   :  { %6330 = vmatprep.subr.bf16.mxu1 %v9165_v41  ;;  %v9256_v41 = vld [vmem:[#allocation5 + $0x3f0] ss:$8 sps:$4 sm:$0xff]  }
  0x90   :  { %6288 = vmatpush2.bf16.msra.mxu0 %v9167_v42  ;;  %v9261_v42 = vld [vmem:[#allocation5 + $0x2e4] ss:$8 sps:$4 sm:$0xff]  }
  0x91   :  { %6331 = vmatpush2.bf16.msra.mxu1 %v9168_v43  ;;  %6289 = vmatprep.subr.bf16.mxu0 %v9169_v44  ;;  %v9264_v43 = vld [vmem:[#allocation5 + $0x3e4] ss:$8 sps:$4 sm:$0xff]   ;;  %v9259_v44 = vld [vmem:[#allocation5 + $0x2e0] ss:$8 sps:$4 sm:$0xff]  }
  0x92   :  { %6332 = vmatprep.subr.bf16.mxu1 %v9171_v45  ;;  %v9262_v45 = vld [vmem:[#allocation5 + $0x3e0] ss:$8 sps:$4 sm:$0xff]  }
  0x94   :  { %6290 = vmatpush2.bf16.msra.mxu0 %v9173_v46  ;;  %v9267_v46 = vld [vmem:[#allocation5 + $0x2d4] ss:$8 sps:$4 sm:$0xff]  }
  0x95   :  { %6333 = vmatpush2.bf16.msra.mxu1 %v9174_v47  ;;  %6291 = vmatprep.subr.bf16.mxu0 %v9175_v48  ;;  %v9270_v47 = vld [vmem:[#allocation5 + $0x3d4] ss:$8 sps:$4 sm:$0xff]   ;;  %v9265_v48 = vld [vmem:[#allocation5 + $0x2d0] ss:$8 sps:$4 sm:$0xff]  }
  0x96   :  { %6334 = vmatprep.subr.bf16.mxu1 %v9177_v50  ;;  %v9273_v50 = vld [vmem:[#allocation5 + $0x2c4] ss:$8 sps:$4 sm:$0xff]  }
  0x98   :  { %6292 = vmatpush2.bf16.msra.mxu0 %v9179_v52  ;;  %v9271_v52 = vld [vmem:[#allocation5 + $0x2c0] ss:$8 sps:$4 sm:$0xff]  }
  0x99   :  { %6335 = vmatpush2.bf16.msra.mxu1 %v9180_v53  ;;  %6293 = vmatprep.subr.bf16.mxu0 %v9181_v54  ;;  %v9274_v53 = vld [vmem:[#allocation5 + $0x3c0] ss:$8 sps:$4 sm:$0xff]   ;;  %v9279_v54 = vld [vmem:[#allocation5 + $0x2b4] ss:$8 sps:$4 sm:$0xff]  }
  0x9a   :  { %6336 = vmatprep.subr.bf16.mxu1 %v9183_v55  ;;  %v9282_v55 = vld [vmem:[#allocation5 + $0x3b4] ss:$8 sps:$4 sm:$0xff]  }
  0x9c   :  { %6294 = vmatpush2.bf16.msra.mxu0 %v9185_v56  ;;  %v9277_v56 = vld [vmem:[#allocation5 + $0x2b0] ss:$8 sps:$4 sm:$0xff]  }
  0x9d   :  { %6337 = vmatpush2.bf16.msra.mxu1 %v9186_v57  ;;  %6295 = vmatprep.subr.bf16.mxu0 %v9187_v58  ;;  %v9280_v57 = vld [vmem:[#allocation5 + $0x3b0] ss:$8 sps:$4 sm:$0xff]   ;;  %v9285_v58 = vld [vmem:[#allocation5 + $0x2a4] ss:$8 sps:$4 sm:$0xff]  }
  0x9e   :  { %6338 = vmatprep.subr.bf16.mxu1 %v9189_v59  ;;  %v9288_v59 = vld [vmem:[#allocation5 + $0x3a4] ss:$8 sps:$4 sm:$0xff]  }
  0xa0   :  { %6296 = vmatpush2.bf16.msra.mxu0 %v9191_v60  ;;  %v9283_v60 = vld [vmem:[#allocation5 + $0x2a0] ss:$8 sps:$4 sm:$0xff]  }
  0xa1   :  { %6339 = vmatpush2.bf16.msra.mxu1 %v9192_v61  ;;  %6297 = vmatprep.subr.bf16.mxu0 %v9193_v62  ;;  %v9286_v61 = vld [vmem:[#allocation5 + $0x3a0] ss:$8 sps:$4 sm:$0xff]   ;;  %v9291_v62 = vld [vmem:[#allocation5 + $0x294] ss:$8 sps:$4 sm:$0xff]  }
  0xa2   :  { %6340 = vmatprep.subr.bf16.mxu1 %v9195_v63  ;;  %v9294_v63 = vld [vmem:[#allocation5 + $0x394] ss:$8 sps:$4 sm:$0xff]  }
  0xa4   :  { %6298 = vmatpush2.bf16.msra.mxu0 %v9197_v0  ;;  %v9289_v0 = vld [vmem:[#allocation5 + $0x290] ss:$8 sps:$4 sm:$0xff]  }
  0xa5   :  { %6341 = vmatpush2.bf16.msra.mxu1 %v9198_v1  ;;  %6353 = vmatprep.subr.bf16.mxu0 %v9207_v2  ;;  %v9292_v1 = vld [vmem:[#allocation5 + $0x390] ss:$8 sps:$4 sm:$0xff]   ;;  %v9297_v2 = vld [vmem:[#allocation5 + $0x284] ss:$8 sps:$4 sm:$0xff]  }
  0xa6   :  { %6396 = vmatprep.subr.bf16.mxu1 %v9210_v3  ;;  %v9300_v3 = vld [vmem:[#allocation5 + $0x384] ss:$8 sps:$4 sm:$0xff]  }
  0xa7   :  { %6300 = vmatmul.mubr.bf16.vlgmr.msra.gmra.mxu0 %v9199_v4  ;;  %v9295_v4 = vld [vmem:[#allocation5 + $0x280] ss:$8 sps:$4 sm:$0xff]  }
  0xa8   :  { %6343 = vmatmul.mubr.bf16.vlgmr.msra.gmra.mxu1 %v9202_v5  ;;  %6354 = vmatpush1.bf16.msra.mxu0 %v9205_v6  ;;  %v9298_v5 = vld [vmem:[#allocation5 + $0x380] ss:$8 sps:$4 sm:$0xff]   ;;  %v9309_v6 = vld [vmem:[#allocation5 + $0x474] ss:$8 sps:$4 sm:$0xff]  }
  0xa9   :  { %6397 = vmatpush1.bf16.msra.mxu1 %v9208_v7  ;;  %6355 = vmatprep.subr.bf16.mxu0 %v9213_v8  ;;  %v9312_v7 = vld [vmem:[#allocation5 + $0x574] ss:$8 sps:$4 sm:$0xff]   ;;  %v9301_v8 = vld [vmem:[#allocation2 + $0x10] ss:$240 sps:$4 sm:$0xff]  }
  0xaa   :  { %6398 = vmatprep.subr.bf16.mxu1 %v9216_v9  ;;  %6385 = vmatprep.mubr.bf16.mxu0 %v9303_v34  ;;  %v9304_v9 = vld [vmem:[#allocation2 + $0x18] ss:$240 sps:$4 sm:$0xff]   ;;  %v9345_v34 = vld [vmem:[#allocation5 + $0x414] ss:$8 sps:$4 sm:$0xff]  }
  0xab   :  { %6428 = vmatprep.mubr.bf16.mxu1 %v9306_v35  ;;  %v9348_v35 = vld [vmem:[#allocation5 + $0x514] ss:$8 sps:$4 sm:$0xff]  }
  0xac   :  { %6356 = vmatpush1.bf16.msra.mxu0 %v9211_v10  ;;  %v9307_v10 = vld [vmem:[#allocation5 + $0x470] ss:$8 sps:$4 sm:$0xff]  }
  0xad   :  { %6399 = vmatpush1.bf16.msra.mxu1 %v9214_v11  ;;  %6357 = vmatprep.subr.bf16.mxu0 %v9219_v12  ;;  %v9310_v11 = vld [vmem:[#allocation5 + $0x570] ss:$8 sps:$4 sm:$0xff]   ;;  %v9315_v12 = vld [vmem:[#allocation5 + $0x464] ss:$8 sps:$4 sm:$0xff]  }
  0xae   :  { %6400 = vmatprep.subr.bf16.mxu1 %v9222_v13  ;;  %v9318_v13 = vld [vmem:[#allocation5 + $0x564] ss:$8 sps:$4 sm:$0xff]  }
  0xb0   :  { %6358 = vmatpush1.bf16.msra.mxu0 %v9217_v14  ;;  %v9313_v14 = vld [vmem:[#allocation5 + $0x460] ss:$8 sps:$4 sm:$0xff]  }
  0xb1   :  { %6401 = vmatpush1.bf16.msra.mxu1 %v9220_v15  ;;  %6359 = vmatprep.subr.bf16.mxu0 %v9225_v16  ;;  %v9316_v15 = vld [vmem:[#allocation5 + $0x560] ss:$8 sps:$4 sm:$0xff]   ;;  %v9321_v16 = vld [vmem:[#allocation5 + $0x454] ss:$8 sps:$4 sm:$0xff]  }
  0xb2   :  { %6402 = vmatprep.subr.bf16.mxu1 %v9228_v17  ;;  %v9324_v17 = vld [vmem:[#allocation5 + $0x554] ss:$8 sps:$4 sm:$0xff]  }
  0xb4   :  { %6360 = vmatpush1.bf16.msra.mxu0 %v9223_v18  ;;  %v9319_v18 = vld [vmem:[#allocation5 + $0x450] ss:$8 sps:$4 sm:$0xff]  }
  0xb5   :  { %6403 = vmatpush1.bf16.msra.mxu1 %v9226_v19  ;;  %6361 = vmatprep.subr.bf16.mxu0 %v9231_v20  ;;  %v9405_v19 = vld [vmem:[#allocation2 + $0x24] ss:$240 sps:$4 sm:$0xff]   ;;  %v9322_v20 = vld [vmem:[#allocation5 + $0x550] ss:$8 sps:$4 sm:$0xff]  }
  0xb6   :  { %6404 = vmatprep.subr.bf16.mxu1 %v9234_v21  ;;  %v9408_v21 = vld [vmem:[#allocation2 + $0x2c] ss:$240 sps:$4 sm:$0xff]  }
  0xb8   :  { %6362 = vmatpush1.bf16.msra.mxu0 %v9229_v22  ;;  %v9327_v22 = vld [vmem:[#allocation5 + $0x444] ss:$8 sps:$4 sm:$0xff]  }
  0xb9   :  { %6405 = vmatpush1.bf16.msra.mxu1 %v9232_v23  ;;  %6363 = vmatprep.subr.bf16.mxu0 %v9237_v24  ;;  %v9330_v23 = vld [vmem:[#allocation5 + $0x544] ss:$8 sps:$4 sm:$0xff]   ;;  %v9325_v24 = vld [vmem:[#allocation5 + $0x440] ss:$8 sps:$4 sm:$0xff]  }
  0xba   :  { %6406 = vmatprep.subr.bf16.mxu1 %v9240_v25  ;;  %v9328_v25 = vld [vmem:[#allocation5 + $0x540] ss:$8 sps:$4 sm:$0xff]  }
  0xbc   :  { %6364 = vmatpush1.bf16.msra.mxu0 %v9235_v26  ;;  %v9333_v26 = vld [vmem:[#allocation5 + $0x434] ss:$8 sps:$4 sm:$0xff]  }
  0xbd   :  { %6407 = vmatpush1.bf16.msra.mxu1 %v9238_v27  ;;  %6365 = vmatprep.subr.bf16.mxu0 %v9243_v28  ;;  %v9336_v27 = vld [vmem:[#allocation5 + $0x534] ss:$8 sps:$4 sm:$0xff]   ;;  %v9331_v28 = vld [vmem:[#allocation5 + $0x430] ss:$8 sps:$4 sm:$0xff]  }
  0xbe   :  { %6408 = vmatprep.subr.bf16.mxu1 %v9246_v29  ;;  %v9334_v29 = vld [vmem:[#allocation5 + $0x530] ss:$8 sps:$4 sm:$0xff]  }
  0xc0   :  { %6366 = vmatpush1.bf16.msra.mxu0 %v9241_v30  ;;  %v9339_v30 = vld [vmem:[#allocation5 + $0x424] ss:$8 sps:$4 sm:$0xff]  }
  0xc1   :  { %6409 = vmatpush1.bf16.msra.mxu1 %v9244_v31  ;;  %6367 = vmatprep.subr.bf16.mxu0 %v9249_v32  ;;  %v9342_v31 = vld [vmem:[#allocation5 + $0x524] ss:$8 sps:$4 sm:$0xff]   ;;  %v9337_v32 = vld [vmem:[#allocation5 + $0x420] ss:$8 sps:$4 sm:$0xff]  }
  0xc2   :  { %6410 = vmatprep.subr.bf16.mxu1 %v9252_v33  ;;  %v9340_v33 = vld [vmem:[#allocation5 + $0x520] ss:$8 sps:$4 sm:$0xff]  }
  0xc4   :  { %6368 = vmatpush1.bf16.msra.mxu0 %v9247_v36  ;;  %v9343_v36 = vld [vmem:[#allocation5 + $0x410] ss:$8 sps:$4 sm:$0xff]  }
  0xc5   :  { %6411 = vmatpush1.bf16.msra.mxu1 %v9250_v37  ;;  %6369 = vmatprep.subr.bf16.mxu0 %v9255_v38  ;;  %v9346_v37 = vld [vmem:[#allocation5 + $0x510] ss:$8 sps:$4 sm:$0xff]   ;;  %v9351_v38 = vld [vmem:[#allocation5 + $0x404] ss:$8 sps:$4 sm:$0xff]  }
  0xc6   :  { %6412 = vmatprep.subr.bf16.mxu1 %v9258_v39  ;;  %v9354_v39 = vld [vmem:[#allocation5 + $0x504] ss:$8 sps:$4 sm:$0xff]  }
  0xc8   :  { %6370 = vmatpush2.bf16.msra.mxu0 %v9253_v40  ;;  %v9349_v40 = vld [vmem:[#allocation5 + $0x400] ss:$8 sps:$4 sm:$0xff]  }
  0xc9   :  { %6413 = vmatpush2.bf16.msra.mxu1 %v9256_v41  ;;  %6371 = vmatprep.subr.bf16.mxu0 %v9261_v42  ;;  %v9352_v41 = vld [vmem:[#allocation5 + $0x500] ss:$8 sps:$4 sm:$0xff]   ;;  %v9357_v42 = vld [vmem:[#allocation5 + $0x4f4] ss:$8 sps:$4 sm:$0xff]  }
  0xca   :  { %6414 = vmatprep.subr.bf16.mxu1 %v9264_v43  ;;  %v9360_v43 = vld [vmem:[#allocation5 + $0x5f4] ss:$8 sps:$4 sm:$0xff]  }
  0xcc   :  { %6372 = vmatpush2.bf16.msra.mxu0 %v9259_v44  ;;  %v9355_v44 = vld [vmem:[#allocation5 + $0x4f0] ss:$8 sps:$4 sm:$0xff]  }
  0xcd   :  { %6415 = vmatpush2.bf16.msra.mxu1 %v9262_v45  ;;  %6373 = vmatprep.subr.bf16.mxu0 %v9267_v46  ;;  %v9358_v45 = vld [vmem:[#allocation5 + $0x5f0] ss:$8 sps:$4 sm:$0xff]   ;;  %v9363_v46 = vld [vmem:[#allocation5 + $0x4e4] ss:$8 sps:$4 sm:$0xff]  }
  0xce   :  { %6416 = vmatprep.subr.bf16.mxu1 %v9270_v47  ;;  %v9366_v47 = vld [vmem:[#allocation5 + $0x5e4] ss:$8 sps:$4 sm:$0xff]  }
  0xd0   :  { %6374 = vmatpush2.bf16.msra.mxu0 %v9265_v48  ;;  %v9361_v48 = vld [vmem:[#allocation5 + $0x4e0] ss:$8 sps:$4 sm:$0xff]  }
  0xd1   :  { %6417 = vmatpush2.bf16.msra.mxu1 %v9268_v49  ;;  %6375 = vmatprep.subr.bf16.mxu0 %v9273_v50  ;;  %v9364_v49 = vld [vmem:[#allocation5 + $0x5e0] ss:$8 sps:$4 sm:$0xff]   ;;  %v9369_v50 = vld [vmem:[#allocation5 + $0x4d4] ss:$8 sps:$4 sm:$0xff]  }
  0xd2   :  { %6418 = vmatprep.subr.bf16.mxu1 %v9276_v51  ;;  %v9372_v51 = vld [vmem:[#allocation5 + $0x5d4] ss:$8 sps:$4 sm:$0xff]  }
  0xd4   :  { %6376 = vmatpush2.bf16.msra.mxu0 %v9271_v52  ;;  %v9367_v52 = vld [vmem:[#allocation5 + $0x4d0] ss:$8 sps:$4 sm:$0xff]  }
  0xd5   :  { %6419 = vmatpush2.bf16.msra.mxu1 %v9274_v53  ;;  %6377 = vmatprep.subr.bf16.mxu0 %v9279_v54  ;;  %v9370_v53 = vld [vmem:[#allocation5 + $0x5d0] ss:$8 sps:$4 sm:$0xff]   ;;  %v9375_v54 = vld [vmem:[#allocation5 + $0x4c4] ss:$8 sps:$4 sm:$0xff]  }
  0xd6   :  { %6420 = vmatprep.subr.bf16.mxu1 %v9282_v55  ;;  %v9378_v55 = vld [vmem:[#allocation5 + $0x5c4] ss:$8 sps:$4 sm:$0xff]  }
  0xd8   :  { %6378 = vmatpush2.bf16.msra.mxu0 %v9277_v56  ;;  %v9373_v56 = vld [vmem:[#allocation5 + $0x4c0] ss:$8 sps:$4 sm:$0xff]  }
  0xd9   :  { %6421 = vmatpush2.bf16.msra.mxu1 %v9280_v57  ;;  %6379 = vmatprep.subr.bf16.mxu0 %v9285_v58  ;;  %v9376_v57 = vld [vmem:[#allocation5 + $0x5c0] ss:$8 sps:$4 sm:$0xff]   ;;  %v9381_v58 = vld [vmem:[#allocation5 + $0x4b4] ss:$8 sps:$4 sm:$0xff]  }
  0xda   :  { %6422 = vmatprep.subr.bf16.mxu1 %v9288_v59  ;;  %v9384_v59 = vld [vmem:[#allocation5 + $0x5b4] ss:$8 sps:$4 sm:$0xff]  }
  0xdc   :  { %6380 = vmatpush2.bf16.msra.mxu0 %v9283_v60  ;;  %v9379_v60 = vld [vmem:[#allocation5 + $0x4b0] ss:$8 sps:$4 sm:$0xff]  }
  0xdd   :  { %6423 = vmatpush2.bf16.msra.mxu1 %v9286_v61  ;;  %6381 = vmatprep.subr.bf16.mxu0 %v9291_v62  ;;  %v9382_v61 = vld [vmem:[#allocation5 + $0x5b0] ss:$8 sps:$4 sm:$0xff]   ;;  %v9387_v62 = vld [vmem:[#allocation5 + $0x4a4] ss:$8 sps:$4 sm:$0xff]  }
  0xde   :  { %6424 = vmatprep.subr.bf16.mxu1 %v9294_v63  ;;  %v9390_v63 = vld [vmem:[#allocation5 + $0x5a4] ss:$8 sps:$4 sm:$0xff]  }
  0xe0   :  { %6382 = vmatpush2.bf16.msra.mxu0 %v9289_v0  ;;  %v9385_v0 = vld [vmem:[#allocation5 + $0x4a0] ss:$8 sps:$4 sm:$0xff]  }
  0xe1   :  { %6425 = vmatpush2.bf16.msra.mxu1 %v9292_v1  ;;  %6383 = vmatprep.subr.bf16.mxu0 %v9297_v2  ;;  %v9388_v1 = vld [vmem:[#allocation5 + $0x5a0] ss:$8 sps:$4 sm:$0xff]   ;;  %v9393_v2 = vld [vmem:[#allocation5 + $0x494] ss:$8 sps:$4 sm:$0xff]  }
  0xe2   :  { %6426 = vmatprep.subr.bf16.mxu1 %v9300_v3  ;;  %v9396_v3 = vld [vmem:[#allocation5 + $0x594] ss:$8 sps:$4 sm:$0xff]  }
  0xe4   :  { %6384 = vmatpush2.bf16.msra.mxu0 %v9295_v4  ;;  %v9391_v4 = vld [vmem:[#allocation5 + $0x490] ss:$8 sps:$4 sm:$0xff]  }
  0xe5   :  { %6427 = vmatpush2.bf16.msra.mxu1 %v9298_v5  ;;  %6439 = vmatprep.subr.bf16.mxu0 %v9309_v6  ;;  %v9394_v5 = vld [vmem:[#allocation5 + $0x590] ss:$8 sps:$4 sm:$0xff]   ;;  %v9399_v6 = vld [vmem:[#allocation5 + $0x484] ss:$8 sps:$4 sm:$0xff]  }
  0xe6   :  { %6482 = vmatprep.subr.bf16.mxu1 %v9312_v7  ;;  %v9402_v7 = vld [vmem:[#allocation5 + $0x584] ss:$8 sps:$4 sm:$0xff]  }
  0xe7   :  { %6386 = vmatmul.mubr.bf16.vlgmr.msra.gmra.mxu0 %v9301_v8  ;;  %v9397_v8 = vld [vmem:[#allocation5 + $0x480] ss:$8 sps:$4 sm:$0xff]  }
  0xe8   :  { %6429 = vmatmul.mubr.bf16.vlgmr.msra.gmra.mxu1 %v9304_v9  ;;  %6440 = vmatpush1.bf16.msra.mxu0 %v9307_v10  ;;  %v9400_v9 = vld [vmem:[#allocation5 + $0x580] ss:$8 sps:$4 sm:$0xff]   ;;  %v9411_v10 = vld [vmem:[#allocation5 + $0x674] ss:$8 sps:$4 sm:$0xff]  }
  0xe9   :  { %6483 = vmatpush1.bf16.msra.mxu1 %v9310_v11  ;;  %6441 = vmatprep.subr.bf16.mxu0 %v9315_v12  ;;  %v9414_v11 = vld [vmem:[#allocation5 + $0x774] ss:$8 sps:$4 sm:$0xff]   ;;  %v9403_v12 = vld [vmem:[#allocation2 + $0x20] ss:$240 sps:$4 sm:$0xff]  }
  0xea   :  { %6484 = vmatprep.subr.bf16.mxu1 %v9318_v13  ;;  %6471 = vmatprep.mubr.bf16.mxu0 %v9405_v19  ;;  %v9406_v13 = vld [vmem:[#allocation2 + $0x28] ss:$240 sps:$4 sm:$0xff]   ;;  %v9510_v19 = vld [vmem:[#allocation2 + $0x3c] ss:$240 sps:$4 sm:$0xff]  }
  0xeb   :  { %6514 = vmatprep.mubr.bf16.mxu1 %v9408_v21  ;;  %v9418_v21 = vld [vmem:[#allocation5 + $0x760] ss:$8 sps:$4 sm:$0xff]  }
  0xec   :  { %6442 = vmatpush1.bf16.msra.mxu0 %v9313_v14  ;;  %v9409_v14 = vld [vmem:[#allocation5 + $0x670] ss:$8 sps:$4 sm:$0xff]  }
  0xed   :  { %6485 = vmatpush1.bf16.msra.mxu1 %v9316_v15  ;;  %6443 = vmatprep.subr.bf16.mxu0 %v9321_v16  ;;  %v9412_v15 = vld [vmem:[#allocation5 + $0x770] ss:$8 sps:$4 sm:$0xff]   ;;  %v9417_v16 = vld [vmem:[#allocation5 + $0x664] ss:$8 sps:$4 sm:$0xff]  }
  0xee   :  { %6486 = vmatprep.subr.bf16.mxu1 %v9324_v17  ;;  %v9420_v17 = vld [vmem:[#allocation5 + $0x764] ss:$8 sps:$4 sm:$0xff]  }
  0xf0   :  { %6444 = vmatpush1.bf16.msra.mxu0 %v9319_v18  ;;  %v9507_v18 = vld [vmem:[#allocation2 + $0x34] ss:$240 sps:$4 sm:$0xff]  }
  0xf1   :  { %6487 = vmatpush1.bf16.msra.mxu1 %v9322_v20  ;;  %6445 = vmatprep.subr.bf16.mxu0 %v9327_v22  ;;  %v9415_v20 = vld [vmem:[#allocation5 + $0x660] ss:$8 sps:$4 sm:$0xff]   ;;  %v9423_v22 = vld [vmem:[#allocation5 + $0x654] ss:$8 sps:$4 sm:$0xff]  }
  0xf2   :  { %6488 = vmatprep.subr.bf16.mxu1 %v9330_v23  ;;  %v9426_v23 = vld [vmem:[#allocation5 + $0x754] ss:$8 sps:$4 sm:$0xff]  }
  0xf4   :  { %6446 = vmatpush1.bf16.msra.mxu0 %v9325_v24  ;;  %v9421_v24 = vld [vmem:[#allocation5 + $0x650] ss:$8 sps:$4 sm:$0xff]  }
  0xf5   :  { %6489 = vmatpush1.bf16.msra.mxu1 %v9328_v25  ;;  %6447 = vmatprep.subr.bf16.mxu0 %v9333_v26  ;;  %v9424_v25 = vld [vmem:[#allocation5 + $0x750] ss:$8 sps:$4 sm:$0xff]   ;;  %v9429_v26 = vld [vmem:[#allocation5 + $0x644] ss:$8 sps:$4 sm:$0xff]  }
  0xf6   :  { %6490 = vmatprep.subr.bf16.mxu1 %v9336_v27  ;;  %v9432_v27 = vld [vmem:[#allocation5 + $0x744] ss:$8 sps:$4 sm:$0xff]  }
  0xf8   :  { %6448 = vmatpush1.bf16.msra.mxu0 %v9331_v28  ;;  %v9427_v28 = vld [vmem:[#allocation5 + $0x640] ss:$8 sps:$4 sm:$0xff]  }
  0xf9   :  { %6491 = vmatpush1.bf16.msra.mxu1 %v9334_v29  ;;  %6449 = vmatprep.subr.bf16.mxu0 %v9339_v30  ;;  %v9430_v29 = vld [vmem:[#allocation5 + $0x740] ss:$8 sps:$4 sm:$0xff]   ;;  %v9435_v30 = vld [vmem:[#allocation5 + $0x634] ss:$8 sps:$4 sm:$0xff]  }
  0xfa   :  { %6492 = vmatprep.subr.bf16.mxu1 %v9342_v31  ;;  %v9438_v31 = vld [vmem:[#allocation5 + $0x734] ss:$8 sps:$4 sm:$0xff]  }
  0xfc   :  { %6450 = vmatpush1.bf16.msra.mxu0 %v9337_v32  ;;  %v9433_v32 = vld [vmem:[#allocation5 + $0x630] ss:$8 sps:$4 sm:$0xff]  }
  0xfd   :  { %6493 = vmatpush1.bf16.msra.mxu1 %v9340_v33  ;;  %6451 = vmatprep.subr.bf16.mxu0 %v9345_v34  ;;  %v9436_v33 = vld [vmem:[#allocation5 + $0x730] ss:$8 sps:$4 sm:$0xff]   ;;  %v9441_v34 = vld [vmem:[#allocation5 + $0x624] ss:$8 sps:$4 sm:$0xff]  }
  0xfe   :  { %6494 = vmatprep.subr.bf16.mxu1 %v9348_v35  ;;  %v9444_v35 = vld [vmem:[#allocation5 + $0x724] ss:$8 sps:$4 sm:$0xff]  }
 0x100   :  { %6452 = vmatpush1.bf16.msra.mxu0 %v9343_v36  ;;  %v9439_v36 = vld [vmem:[#allocation5 + $0x620] ss:$8 sps:$4 sm:$0xff]  }
 0x101   :  { %6495 = vmatpush1.bf16.msra.mxu1 %v9346_v37  ;;  %6453 = vmatprep.subr.bf16.mxu0 %v9351_v38  ;;  %v9442_v37 = vld [vmem:[#allocation5 + $0x720] ss:$8 sps:$4 sm:$0xff]   ;;  %v9447_v38 = vld [vmem:[#allocation5 + $0x614] ss:$8 sps:$4 sm:$0xff]  }
 0x102   :  { %6496 = vmatprep.subr.bf16.mxu1 %v9354_v39  ;;  %v9450_v39 = vld [vmem:[#allocation5 + $0x714] ss:$8 sps:$4 sm:$0xff]  }
 0x104   :  { %6454 = vmatpush1.bf16.msra.mxu0 %v9349_v40  ;;  %v9445_v40 = vld [vmem:[#allocation5 + $0x610] ss:$8 sps:$4 sm:$0xff]  }
 0x105   :  { %6497 = vmatpush1.bf16.msra.mxu1 %v9352_v41  ;;  %6455 = vmatprep.subr.bf16.mxu0 %v9357_v42  ;;  %v9448_v41 = vld [vmem:[#allocation5 + $0x710] ss:$8 sps:$4 sm:$0xff]   ;;  %v9453_v42 = vld [vmem:[#allocation5 + $0x604] ss:$8 sps:$4 sm:$0xff]  }
 0x106   :  { %6498 = vmatprep.subr.bf16.mxu1 %v9360_v43  ;;  %v9456_v43 = vld [vmem:[#allocation5 + $0x704] ss:$8 sps:$4 sm:$0xff]  }
 0x108   :  { %6456 = vmatpush2.bf16.msra.mxu0 %v9355_v44  ;;  %v9451_v44 = vld [vmem:[#allocation5 + $0x600] ss:$8 sps:$4 sm:$0xff]  }
 0x109   :  { %6499 = vmatpush2.bf16.msra.mxu1 %v9358_v45  ;;  %6457 = vmatprep.subr.bf16.mxu0 %v9363_v46  ;;  %v9454_v45 = vld [vmem:[#allocation5 + $0x700] ss:$8 sps:$4 sm:$0xff]   ;;  %v9459_v46 = vld [vmem:[#allocation5 + $0x6f4] ss:$8 sps:$4 sm:$0xff]  }
 0x10a   :  { %6500 = vmatprep.subr.bf16.mxu1 %v9366_v47  ;;  %v9462_v47 = vld [vmem:[#allocation5 + $0x7f4] ss:$8 sps:$4 sm:$0xff]  }
 0x10c   :  { %6458 = vmatpush2.bf16.msra.mxu0 %v9361_v48  ;;  %v9457_v48 = vld [vmem:[#allocation5 + $0x6f0] ss:$8 sps:$4 sm:$0xff]  }
 0x10d   :  { %6501 = vmatpush2.bf16.msra.mxu1 %v9364_v49  ;;  %6459 = vmatprep.subr.bf16.mxu0 %v9369_v50  ;;  %v9460_v49 = vld [vmem:[#allocation5 + $0x7f0] ss:$8 sps:$4 sm:$0xff]   ;;  %v9465_v50 = vld [vmem:[#allocation5 + $0x6e4] ss:$8 sps:$4 sm:$0xff]  }
 0x10e   :  { %6502 = vmatprep.subr.bf16.mxu1 %v9372_v51  ;;  %v9468_v51 = vld [vmem:[#allocation5 + $0x7e4] ss:$8 sps:$4 sm:$0xff]  }
 0x110   :  { %6460 = vmatpush2.bf16.msra.mxu0 %v9367_v52  ;;  %v9463_v52 = vld [vmem:[#allocation5 + $0x6e0] ss:$8 sps:$4 sm:$0xff]  }
 0x111   :  { %6503 = vmatpush2.bf16.msra.mxu1 %v9370_v53  ;;  %6461 = vmatprep.subr.bf16.mxu0 %v9375_v54  ;;  %v9466_v53 = vld [vmem:[#allocation5 + $0x7e0] ss:$8 sps:$4 sm:$0xff]   ;;  %v9471_v54 = vld [vmem:[#allocation5 + $0x6d4] ss:$8 sps:$4 sm:$0xff]  }
 0x112   :  { %6504 = vmatprep.subr.bf16.mxu1 %v9378_v55  ;;  %v9474_v55 = vld [vmem:[#allocation5 + $0x7d4] ss:$8 sps:$4 sm:$0xff]  }
 0x114   :  { %6462 = vmatpush2.bf16.msra.mxu0 %v9373_v56  ;;  %v9469_v56 = vld [vmem:[#allocation5 + $0x6d0] ss:$8 sps:$4 sm:$0xff]  }
 0x115   :  { %6505 = vmatpush2.bf16.msra.mxu1 %v9376_v57  ;;  %6463 = vmatprep.subr.bf16.mxu0 %v9381_v58  ;;  %v9472_v57 = vld [vmem:[#allocation5 + $0x7d0] ss:$8 sps:$4 sm:$0xff]   ;;  %v9477_v58 = vld [vmem:[#allocation5 + $0x6c4] ss:$8 sps:$4 sm:$0xff]  }
 0x116   :  { %6506 = vmatprep.subr.bf16.mxu1 %v9384_v59  ;;  %v9480_v59 = vld [vmem:[#allocation5 + $0x7c4] ss:$8 sps:$4 sm:$0xff]  }
 0x118   :  { %6464 = vmatpush2.bf16.msra.mxu0 %v9379_v60  ;;  %v9475_v60 = vld [vmem:[#allocation5 + $0x6c0] ss:$8 sps:$4 sm:$0xff]  }
 0x119   :  { %6507 = vmatpush2.bf16.msra.mxu1 %v9382_v61  ;;  %6465 = vmatprep.subr.bf16.mxu0 %v9387_v62  ;;  %v9478_v61 = vld [vmem:[#allocation5 + $0x7c0] ss:$8 sps:$4 sm:$0xff]   ;;  %v9483_v62 = vld [vmem:[#allocation5 + $0x6b4] ss:$8 sps:$4 sm:$0xff]  }
 0x11a   :  { %6508 = vmatprep.subr.bf16.mxu1 %v9390_v63  ;;  %v9486_v63 = vld [vmem:[#allocation5 + $0x7b4] ss:$8 sps:$4 sm:$0xff]  }
 0x11c   :  { %6466 = vmatpush2.bf16.msra.mxu0 %v9385_v0  ;;  %v9481_v0 = vld [vmem:[#allocation5 + $0x6b0] ss:$8 sps:$4 sm:$0xff]  }
 0x11d   :  { %6509 = vmatpush2.bf16.msra.mxu1 %v9388_v1  ;;  %6467 = vmatprep.subr.bf16.mxu0 %v9393_v2  ;;  %v9484_v1 = vld [vmem:[#allocation5 + $0x7b0] ss:$8 sps:$4 sm:$0xff]   ;;  %v9489_v2 = vld [vmem:[#allocation5 + $0x6a4] ss:$8 sps:$4 sm:$0xff]  }
 0x11e   :  { %6510 = vmatprep.subr.bf16.mxu1 %v9396_v3  ;;  %v9492_v3 = vld [vmem:[#allocation5 + $0x7a4] ss:$8 sps:$4 sm:$0xff]  }
 0x120   :  { %6468 = vmatpush2.bf16.msra.mxu0 %v9391_v4  ;;  %v9487_v4 = vld [vmem:[#allocation5 + $0x6a0] ss:$8 sps:$4 sm:$0xff]  }
 0x121   :  { %6511 = vmatpush2.bf16.msra.mxu1 %v9394_v5  ;;  %6469 = vmatprep.subr.bf16.mxu0 %v9399_v6  ;;  %v9490_v5 = vld [vmem:[#allocation5 + $0x7a0] ss:$8 sps:$4 sm:$0xff]   ;;  %v9495_v6 = vld [vmem:[#allocation5 + $0x694] ss:$8 sps:$4 sm:$0xff]  }
 0x122   :  { %6512 = vmatprep.subr.bf16.mxu1 %v9402_v7  ;;  %v9498_v7 = vld [vmem:[#allocation5 + $0x794] ss:$8 sps:$4 sm:$0xff]  }
 0x124   :  { %6470 = vmatpush2.bf16.msra.mxu0 %v9397_v8  ;;  %v9493_v8 = vld [vmem:[#allocation5 + $0x690] ss:$8 sps:$4 sm:$0xff]  }
 0x125   :  { %6513 = vmatpush2.bf16.msra.mxu1 %v9400_v9  ;;  %6525 = vmatprep.subr.bf16.mxu0 %v9411_v10  ;;  %v9496_v9 = vld [vmem:[#allocation5 + $0x790] ss:$8 sps:$4 sm:$0xff]   ;;  %v9501_v10 = vld [vmem:[#allocation5 + $0x684] ss:$8 sps:$4 sm:$0xff]  }
 0x126   :  { %6568 = vmatprep.subr.bf16.mxu1 %v9414_v11  ;;  %v9504_v11 = vld [vmem:[#allocation5 + $0x784] ss:$8 sps:$4 sm:$0xff]  }
 0x127   :  { %6472 = vmatmul.mubr.bf16.vlgmr.msra.gmra.mxu0 %v9403_v12  ;;  %v9499_v12 = vld [vmem:[#allocation5 + $0x680] ss:$8 sps:$4 sm:$0xff]  }
 0x128   :  { %6515 = vmatmul.mubr.bf16.vlgmr.msra.gmra.mxu1 %v9406_v13  ;;  %6526 = vmatpush1.bf16.msra.mxu0 %v9409_v14  ;;  %v9502_v13 = vld [vmem:[#allocation5 + $0x780] ss:$8 sps:$4 sm:$0xff]   ;;  %v9513_v14 = vld [vmem:[#allocation5 + $0x874] ss:$8 sps:$4 sm:$0xff]  }
 0x129   :  { %6569 = vmatpush1.bf16.msra.mxu1 %v9412_v15  ;;  %6527 = vmatprep.subr.bf16.mxu0 %v9417_v16  ;;  %v9516_v15 = vld [vmem:[#allocation5 + $0x974] ss:$8 sps:$4 sm:$0xff]   ;;  %v9505_v16 = vld [vmem:[#allocation2 + $0x30] ss:$240 sps:$4 sm:$0xff]  }
 0x12a   :  { %6570 = vmatprep.subr.bf16.mxu1 %v9420_v17  ;;  %6557 = vmatprep.mubr.bf16.mxu0 %v9507_v18  ;;  %v9508_v17 = vld [vmem:[#allocation2 + $0x38] ss:$240 sps:$4 sm:$0xff]  }
 0x12b   :  { %6600 = vmatprep.mubr.bf16.mxu1 %v9510_v19  ;;  %v9511_v18 = vld [vmem:[#allocation5 + $0x870] ss:$8 sps:$4 sm:$0xff]  }
 0x12c   :  { %6528 = vmatpush1.bf16.msra.mxu0 %v9415_v20  ;;  %v9514_v19 = vld [vmem:[#allocation5 + $0x970] ss:$8 sps:$4 sm:$0xff]   ;;  %v9519_v20 = vld [vmem:[#allocation5 + $0x864] ss:$8 sps:$4 sm:$0xff]  }
 0x12d   :  { %6571 = vmatpush1.bf16.msra.mxu1 %v9418_v21  ;;  %6529 = vmatprep.subr.bf16.mxu0 %v9423_v22  ;;  %v9522_v21 = vld [vmem:[#allocation5 + $0x964] ss:$8 sps:$4 sm:$0xff]  }
 0x12e   :  { %6572 = vmatprep.subr.bf16.mxu1 %v9426_v23  ;;  %v9609_v22 = vld [vmem:[#allocation2 + $0x44] ss:$240 sps:$4 sm:$0xff]   ;;  %v9612_v23 = vld [vmem:[#allocation2 + $0x4c] ss:$240 sps:$4 sm:$0xff]  }
 0x130   :  { %6530 = vmatpush1.bf16.msra.mxu0 %v9421_v24  ;;  %v9517_v24 = vld [vmem:[#allocation5 + $0x860] ss:$8 sps:$4 sm:$0xff]  }
 0x131   :  { %6573 = vmatpush1.bf16.msra.mxu1 %v9424_v25  ;;  %6531 = vmatprep.subr.bf16.mxu0 %v9429_v26  ;;  %v9520_v25 = vld [vmem:[#allocation5 + $0x960] ss:$8 sps:$4 sm:$0xff]   ;;  %v9525_v26 = vld [vmem:[#allocation5 + $0x854] ss:$8 sps:$4 sm:$0xff]  }
 0x132   :  { %6574 = vmatprep.subr.bf16.mxu1 %v9432_v27  ;;  %v9528_v27 = vld [vmem:[#allocation5 + $0x954] ss:$8 sps:$4 sm:$0xff]  }
 0x134   :  { %6532 = vmatpush1.bf16.msra.mxu0 %v9427_v28  ;;  %v9523_v28 = vld [vmem:[#allocation5 + $0x850] ss:$8 sps:$4 sm:$0xff]  }
 0x135   :  { %6575 = vmatpush1.bf16.msra.mxu1 %v9430_v29  ;;  %6533 = vmatprep.subr.bf16.mxu0 %v9435_v30  ;;  %v9526_v29 = vld [vmem:[#allocation5 + $0x950] ss:$8 sps:$4 sm:$0xff]   ;;  %v9531_v30 = vld [vmem:[#allocation5 + $0x844] ss:$8 sps:$4 sm:$0xff]  }
 0x136   :  { %6576 = vmatprep.subr.bf16.mxu1 %v9438_v31  ;;  %v9534_v31 = vld [vmem:[#allocation5 + $0x944] ss:$8 sps:$4 sm:$0xff]  }
 0x138   :  { %6534 = vmatpush1.bf16.msra.mxu0 %v9433_v32  ;;  %v9529_v32 = vld [vmem:[#allocation5 + $0x840] ss:$8 sps:$4 sm:$0xff]  }
 0x139   :  { %6577 = vmatpush1.bf16.msra.mxu1 %v9436_v33  ;;  %6535 = vmatprep.subr.bf16.mxu0 %v9441_v34  ;;  %v9532_v33 = vld [vmem:[#allocation5 + $0x940] ss:$8 sps:$4 sm:$0xff]   ;;  %v9537_v34 = vld [vmem:[#allocation5 + $0x834] ss:$8 sps:$4 sm:$0xff]  }
 0x13a   :  { %6578 = vmatprep.subr.bf16.mxu1 %v9444_v35  ;;  %v9540_v35 = vld [vmem:[#allocation5 + $0x934] ss:$8 sps:$4 sm:$0xff]  }
 0x13c   :  { %6536 = vmatpush1.bf16.msra.mxu0 %v9439_v36  ;;  %v9535_v36 = vld [vmem:[#allocation5 + $0x830] ss:$8 sps:$4 sm:$0xff]  }
 0x13d   :  { %6579 = vmatpush1.bf16.msra.mxu1 %v9442_v37  ;;  %6537 = vmatprep.subr.bf16.mxu0 %v9447_v38  ;;  %v9538_v37 = vld [vmem:[#allocation5 + $0x930] ss:$8 sps:$4 sm:$0xff]   ;;  %v9543_v38 = vld [vmem:[#allocation5 + $0x824] ss:$8 sps:$4 sm:$0xff]  }
 0x13e   :  { %6580 = vmatprep.subr.bf16.mxu1 %v9450_v39  ;;  %v9546_v39 = vld [vmem:[#allocation5 + $0x924] ss:$8 sps:$4 sm:$0xff]  }
 0x140   :  { %6538 = vmatpush1.bf16.msra.mxu0 %v9445_v40  ;;  %v9541_v40 = vld [vmem:[#allocation5 + $0x820] ss:$8 sps:$4 sm:$0xff]  }
 0x141   :  { %6581 = vmatpush1.bf16.msra.mxu1 %v9448_v41  ;;  %6539 = vmatprep.subr.bf16.mxu0 %v9453_v42  ;;  %v9544_v41 = vld [vmem:[#allocation5 + $0x920] ss:$8 sps:$4 sm:$0xff]   ;;  %v9549_v42 = vld [vmem:[#allocation5 + $0x814] ss:$8 sps:$4 sm:$0xff]  }
 0x142   :  { %6582 = vmatprep.subr.bf16.mxu1 %v9456_v43  ;;  %v9552_v43 = vld [vmem:[#allocation5 + $0x914] ss:$8 sps:$4 sm:$0xff]  }
 0x144   :  { %6540 = vmatpush1.bf16.msra.mxu0 %v9451_v44  ;;  %v9547_v44 = vld [vmem:[#allocation5 + $0x810] ss:$8 sps:$4 sm:$0xff]  }
 0x145   :  { %6583 = vmatpush1.bf16.msra.mxu1 %v9454_v45  ;;  %6541 = vmatprep.subr.bf16.mxu0 %v9459_v46  ;;  %v9550_v45 = vld [vmem:[#allocation5 + $0x910] ss:$8 sps:$4 sm:$0xff]   ;;  %v9555_v46 = vld [vmem:[#allocation5 + $0x804] ss:$8 sps:$4 sm:$0xff]  }
 0x146   :  { %6584 = vmatprep.subr.bf16.mxu1 %v9462_v47  ;;  %v9558_v47 = vld [vmem:[#allocation5 + $0x904] ss:$8 sps:$4 sm:$0xff]  }
 0x148   :  { %6542 = vmatpush2.bf16.msra.mxu0 %v9457_v48  ;;  %v9553_v48 = vld [vmem:[#allocation5 + $0x800] ss:$8 sps:$4 sm:$0xff]  }
 0x149   :  { %6585 = vmatpush2.bf16.msra.mxu1 %v9460_v49  ;;  %6543 = vmatprep.subr.bf16.mxu0 %v9465_v50  ;;  %v9556_v49 = vld [vmem:[#allocation5 + $0x900] ss:$8 sps:$4 sm:$0xff]   ;;  %v9561_v50 = vld [vmem:[#allocation5 + $0x8f4] ss:$8 sps:$4 sm:$0xff]  }
 0x14a   :  { %6586 = vmatprep.subr.bf16.mxu1 %v9468_v51  ;;  %v9564_v51 = vld [vmem:[#allocation5 + $0x9f4] ss:$8 sps:$4 sm:$0xff]  }
 0x14c   :  { %6544 = vmatpush2.bf16.msra.mxu0 %v9463_v52  ;;  %v9559_v52 = vld [vmem:[#allocation5 + $0x8f0] ss:$8 sps:$4 sm:$0xff]  }
 0x14d   :  { %6587 = vmatpush2.bf16.msra.mxu1 %v9466_v53  ;;  %6545 = vmatprep.subr.bf16.mxu0 %v9471_v54  ;;  %v9562_v53 = vld [vmem:[#allocation5 + $0x9f0] ss:$8 sps:$4 sm:$0xff]   ;;  %v9567_v54 = vld [vmem:[#allocation5 + $0x8e4] ss:$8 sps:$4 sm:$0xff]  }
 0x14e   :  { %6588 = vmatprep.subr.bf16.mxu1 %v9474_v55  ;;  %v9570_v55 = vld [vmem:[#allocation5 + $0x9e4] ss:$8 sps:$4 sm:$0xff]  }
 0x150   :  { %6546 = vmatpush2.bf16.msra.mxu0 %v9469_v56  ;;  %v9565_v56 = vld [vmem:[#allocation5 + $0x8e0] ss:$8 sps:$4 sm:$0xff]  }
 0x151   :  { %6589 = vmatpush2.bf16.msra.mxu1 %v9472_v57  ;;  %6547 = vmatprep.subr.bf16.mxu0 %v9477_v58  ;;  %v9568_v57 = vld [vmem:[#allocation5 + $0x9e0] ss:$8 sps:$4 sm:$0xff]   ;;  %v9573_v58 = vld [vmem:[#allocation5 + $0x8d4] ss:$8 sps:$4 sm:$0xff]  }
 0x152   :  { %6590 = vmatprep.subr.bf16.mxu1 %v9480_v59  ;;  %v9576_v59 = vld [vmem:[#allocation5 + $0x9d4] ss:$8 sps:$4 sm:$0xff]  }
 0x154   :  { %6548 = vmatpush2.bf16.msra.mxu0 %v9475_v60  ;;  %v9571_v60 = vld [vmem:[#allocation5 + $0x8d0] ss:$8 sps:$4 sm:$0xff]  }
 0x155   :  { %6591 = vmatpush2.bf16.msra.mxu1 %v9478_v61  ;;  %6549 = vmatprep.subr.bf16.mxu0 %v9483_v62  ;;  %v9574_v61 = vld [vmem:[#allocation5 + $0x9d0] ss:$8 sps:$4 sm:$0xff]   ;;  %v9579_v62 = vld [vmem:[#allocation5 + $0x8c4] ss:$8 sps:$4 sm:$0xff]  }
 0x156   :  { %6592 = vmatprep.subr.bf16.mxu1 %v9486_v63  ;;  %v9582_v63 = vld [vmem:[#allocation5 + $0x9c4] ss:$8 sps:$4 sm:$0xff]  }
 0x158   :  { %6550 = vmatpush2.bf16.msra.mxu0 %v9481_v0  ;;  %v9577_v0 = vld [vmem:[#allocation5 + $0x8c0] ss:$8 sps:$4 sm:$0xff]  }
 0x159   :  { %6593 = vmatpush2.bf16.msra.mxu1 %v9484_v1  ;;  %6551 = vmatprep.subr.bf16.mxu0 %v9489_v2  ;;  %v9580_v1 = vld [vmem:[#allocation5 + $0x9c0] ss:$8 sps:$4 sm:$0xff]   ;;  %v9585_v2 = vld [vmem:[#allocation5 + $0x8b4] ss:$8 sps:$4 sm:$0xff]  }
 0x15a   :  { %6594 = vmatprep.subr.bf16.mxu1 %v9492_v3  ;;  %v9588_v3 = vld [vmem:[#allocation5 + $0x9b4] ss:$8 sps:$4 sm:$0xff]  }
 0x15c   :  { %6552 = vmatpush2.bf16.msra.mxu0 %v9487_v4  ;;  %v9583_v4 = vld [vmem:[#allocation5 + $0x8b0] ss:$8 sps:$4 sm:$0xff]  }
 0x15d   :  { %6595 = vmatpush2.bf16.msra.mxu1 %v9490_v5  ;;  %6553 = vmatprep.subr.bf16.mxu0 %v9495_v6  ;;  %v9586_v5 = vld [vmem:[#allocation5 + $0x9b0] ss:$8 sps:$4 sm:$0xff]   ;;  %v9591_v6 = vld [vmem:[#allocation5 + $0x8a4] ss:$8 sps:$4 sm:$0xff]  }
 0x15e   :  { %6596 = vmatprep.subr.bf16.mxu1 %v9498_v7  ;;  %v9594_v7 = vld [vmem:[#allocation5 + $0x9a4] ss:$8 sps:$4 sm:$0xff]  }
 0x160   :  { %6554 = vmatpush2.bf16.msra.mxu0 %v9493_v8  ;;  %v9589_v8 = vld [vmem:[#allocation5 + $0x8a0] ss:$8 sps:$4 sm:$0xff]  }
 0x161   :  { %6597 = vmatpush2.bf16.msra.mxu1 %v9496_v9  ;;  %6555 = vmatprep.subr.bf16.mxu0 %v9501_v10  ;;  %v9592_v9 = vld [vmem:[#allocation5 + $0x9a0] ss:$8 sps:$4 sm:$0xff]   ;;  %v9597_v10 = vld [vmem:[#allocation5 + $0x894] ss:$8 sps:$4 sm:$0xff]  }
 0x162   :  { %6598 = vmatprep.subr.bf16.mxu1 %v9504_v11  ;;  %v9600_v11 = vld [vmem:[#allocation5 + $0x994] ss:$8 sps:$4 sm:$0xff]  }
 0x164   :  { %6556 = vmatpush2.bf16.msra.mxu0 %v9499_v12  ;;  %v9595_v12 = vld [vmem:[#allocation5 + $0x890] ss:$8 sps:$4 sm:$0xff]  }
 0x165   :  { %6599 = vmatpush2.bf16.msra.mxu1 %v9502_v13  ;;  %6611 = vmatprep.subr.bf16.mxu0 %v9513_v14  ;;  %v9598_v13 = vld [vmem:[#allocation5 + $0x990] ss:$8 sps:$4 sm:$0xff]   ;;  %v9603_v14 = vld [vmem:[#allocation5 + $0x884] ss:$8 sps:$4 sm:$0xff]  }
 0x166   :  { %6654 = vmatprep.subr.bf16.mxu1 %v9516_v15  ;;  %v9606_v15 = vld [vmem:[#allocation5 + $0x984] ss:$8 sps:$4 sm:$0xff]  }
 0x167   :  { %6558 = vmatmul.mubr.bf16.vlgmr.msra.gmra.mxu0 %v9505_v16  ;;  %v9601_v16 = vld [vmem:[#allocation5 + $0x880] ss:$8 sps:$4 sm:$0xff]  }
 0x168   :  { %6601 = vmatmul.mubr.bf16.vlgmr.msra.gmra.mxu1 %v9508_v17  ;;  %6612 = vmatpush1.bf16.msra.mxu0 %v9511_v18  ;;  %v9604_v17 = vld [vmem:[#allocation5 + $0x980] ss:$8 sps:$4 sm:$0xff]  }
 0x169   :  { %6655 = vmatpush1.bf16.msra.mxu1 %v9514_v19  ;;  %6613 = vmatprep.subr.bf16.mxu0 %v9519_v20  ;;  %v9607_v18 = vld [vmem:[#allocation2 + $0x40] ss:$240 sps:$4 sm:$0xff]   ;;  %v9610_v19 = vld [vmem:[#allocation2 + $0x48] ss:$240 sps:$4 sm:$0xff]   ;;  %v9615_v20 = vld [vmem:[#allocation5 + $0xa74] ss:$8 sps:$4 sm:$0xff]  }
 0x16a   :  { %6656 = vmatprep.subr.bf16.mxu1 %v9522_v21  ;;  %6643 = vmatprep.mubr.bf16.mxu0 %v9609_v22  ;;  %v9618_v21 = vld [vmem:[#allocation5 + $0xb74] ss:$8 sps:$4 sm:$0xff]   ;;  %v9613_v22 = vld [vmem:[#allocation5 + $0xa70] ss:$8 sps:$4 sm:$0xff]  }
 0x16b   :  { %6686 = vmatprep.mubr.bf16.mxu1 %v9612_v23  ;;  %v9616_v23 = vld [vmem:[#allocation5 + $0xb70] ss:$8 sps:$4 sm:$0xff]  }
 0x16c   :  { %6614 = vmatpush1.bf16.msra.mxu0 %v9517_v24  ;;  %v9621_v24 = vld [vmem:[#allocation5 + $0xa64] ss:$8 sps:$4 sm:$0xff]  }
 0x16d   :  { %6657 = vmatpush1.bf16.msra.mxu1 %v9520_v25  ;;  %6615 = vmatprep.subr.bf16.mxu0 %v9525_v26  ;;  %v9624_v25 = vld [vmem:[#allocation5 + $0xb64] ss:$8 sps:$4 sm:$0xff]   ;;  %v9619_v26 = vld [vmem:[#allocation5 + $0xa60] ss:$8 sps:$4 sm:$0xff]  }
 0x16e   :  { %6658 = vmatprep.subr.bf16.mxu1 %v9528_v27  ;;  %v9622_v27 = vld [vmem:[#allocation5 + $0xb60] ss:$8 sps:$4 sm:$0xff]  }
 0x170   :  { %6616 = vmatpush1.bf16.msra.mxu0 %v9523_v28  ;;  %v9711_v28 = vld [vmem:[#allocation2 + $0x54] ss:$240 sps:$4 sm:$0xff]  }
 0x171   :  { %6659 = vmatpush1.bf16.msra.mxu1 %v9526_v29  ;;  %6617 = vmatprep.subr.bf16.mxu0 %v9531_v30  ;;  %v9714_v29 = vld [vmem:[#allocation2 + $0x5c] ss:$240 sps:$4 sm:$0xff]  }
 0x172   :  { %6660 = vmatprep.subr.bf16.mxu1 %v9534_v31  ;;  %v9627_v30 = vld [vmem:[#allocation5 + $0xa54] ss:$8 sps:$4 sm:$0xff]  }
 0x173   :  { %v9630_v31 = vld [vmem:[#allocation5 + $0xb54] ss:$8 sps:$4 sm:$0xff]  }
 0x174   :  { %6618 = vmatpush1.bf16.msra.mxu0 %v9529_v32  ;;  %v9625_v32 = vld [vmem:[#allocation5 + $0xa50] ss:$8 sps:$4 sm:$0xff]  }
 0x175   :  { %6661 = vmatpush1.bf16.msra.mxu1 %v9532_v33  ;;  %6619 = vmatprep.subr.bf16.mxu0 %v9537_v34  ;;  %v9628_v33 = vld [vmem:[#allocation5 + $0xb50] ss:$8 sps:$4 sm:$0xff]   ;;  %v9633_v34 = vld [vmem:[#allocation5 + $0xa44] ss:$8 sps:$4 sm:$0xff]  }
 0x176   :  { %6662 = vmatprep.subr.bf16.mxu1 %v9540_v35  ;;  %v9636_v35 = vld [vmem:[#allocation5 + $0xb44] ss:$8 sps:$4 sm:$0xff]  }
 0x178   :  { %6620 = vmatpush1.bf16.msra.mxu0 %v9535_v36  ;;  %v9631_v36 = vld [vmem:[#allocation5 + $0xa40] ss:$8 sps:$4 sm:$0xff]  }
 0x179   :  { %6663 = vmatpush1.bf16.msra.mxu1 %v9538_v37  ;;  %6621 = vmatprep.subr.bf16.mxu0 %v9543_v38  ;;  %v9634_v37 = vld [vmem:[#allocation5 + $0xb40] ss:$8 sps:$4 sm:$0xff]   ;;  %v9639_v38 = vld [vmem:[#allocation5 + $0xa34] ss:$8 sps:$4 sm:$0xff]  }
 0x17a   :  { %6664 = vmatprep.subr.bf16.mxu1 %v9546_v39  ;;  %v9642_v39 = vld [vmem:[#allocation5 + $0xb34] ss:$8 sps:$4 sm:$0xff]  }
 0x17c   :  { %6622 = vmatpush1.bf16.msra.mxu0 %v9541_v40  ;;  %v9637_v40 = vld [vmem:[#allocation5 + $0xa30] ss:$8 sps:$4 sm:$0xff]  }
 0x17d   :  { %6665 = vmatpush1.bf16.msra.mxu1 %v9544_v41  ;;  %6623 = vmatprep.subr.bf16.mxu0 %v9549_v42  ;;  %v9640_v41 = vld [vmem:[#allocation5 + $0xb30] ss:$8 sps:$4 sm:$0xff]   ;;  %v9645_v42 = vld [vmem:[#allocation5 + $0xa24] ss:$8 sps:$4 sm:$0xff]  }
 0x17e   :  { %6666 = vmatprep.subr.bf16.mxu1 %v9552_v43  ;;  %v9648_v43 = vld [vmem:[#allocation5 + $0xb24] ss:$8 sps:$4 sm:$0xff]  }
 0x180   :  { %6624 = vmatpush1.bf16.msra.mxu0 %v9547_v44  ;;  %v9643_v44 = vld [vmem:[#allocation5 + $0xa20] ss:$8 sps:$4 sm:$0xff]  }
 0x181   :  { %6667 = vmatpush1.bf16.msra.mxu1 %v9550_v45  ;;  %6625 = vmatprep.subr.bf16.mxu0 %v9555_v46  ;;  %v9646_v45 = vld [vmem:[#allocation5 + $0xb20] ss:$8 sps:$4 sm:$0xff]   ;;  %v9651_v46 = vld [vmem:[#allocation5 + $0xa14] ss:$8 sps:$4 sm:$0xff]  }
 0x182   :  { %6668 = vmatprep.subr.bf16.mxu1 %v9558_v47  ;;  %v9654_v47 = vld [vmem:[#allocation5 + $0xb14] ss:$8 sps:$4 sm:$0xff]  }
 0x184   :  { %6626 = vmatpush1.bf16.msra.mxu0 %v9553_v48  ;;  %v9649_v48 = vld [vmem:[#allocation5 + $0xa10] ss:$8 sps:$4 sm:$0xff]  }
 0x185   :  { %6669 = vmatpush1.bf16.msra.mxu1 %v9556_v49  ;;  %6627 = vmatprep.subr.bf16.mxu0 %v9561_v50  ;;  %v9652_v49 = vld [vmem:[#allocation5 + $0xb10] ss:$8 sps:$4 sm:$0xff]   ;;  %v9657_v50 = vld [vmem:[#allocation5 + $0xa04] ss:$8 sps:$4 sm:$0xff]  }
 0x186   :  { %6670 = vmatprep.subr.bf16.mxu1 %v9564_v51  ;;  %v9660_v51 = vld [vmem:[#allocation5 + $0xb04] ss:$8 sps:$4 sm:$0xff]  }
 0x188   :  { %6628 = vmatpush2.bf16.msra.mxu0 %v9559_v52  ;;  %v9655_v52 = vld [vmem:[#allocation5 + $0xa00] ss:$8 sps:$4 sm:$0xff]  }
 0x189   :  { %6671 = vmatpush2.bf16.msra.mxu1 %v9562_v53  ;;  %6629 = vmatprep.subr.bf16.mxu0 %v9567_v54  ;;  %v9658_v53 = vld [vmem:[#allocation5 + $0xb00] ss:$8 sps:$4 sm:$0xff]   ;;  %v9663_v54 = vld [vmem:[#allocation5 + $0xaf4] ss:$8 sps:$4 sm:$0xff]  }
 0x18a   :  { %6672 = vmatprep.subr.bf16.mxu1 %v9570_v55  ;;  %v9666_v55 = vld [vmem:[#allocation5 + $0xbf4] ss:$8 sps:$4 sm:$0xff]  }
 0x18c   :  { %6630 = vmatpush2.bf16.msra.mxu0 %v9565_v56  ;;  %v9661_v56 = vld [vmem:[#allocation5 + $0xaf0] ss:$8 sps:$4 sm:$0xff]  }
 0x18d   :  { %6673 = vmatpush2.bf16.msra.mxu1 %v9568_v57  ;;  %6631 = vmatprep.subr.bf16.mxu0 %v9573_v58  ;;  %v9664_v57 = vld [vmem:[#allocation5 + $0xbf0] ss:$8 sps:$4 sm:$0xff]   ;;  %v9669_v58 = vld [vmem:[#allocation5 + $0xae4] ss:$8 sps:$4 sm:$0xff]  }
 0x18e   :  { %6674 = vmatprep.subr.bf16.mxu1 %v9576_v59  ;;  %v9672_v59 = vld [vmem:[#allocation5 + $0xbe4] ss:$8 sps:$4 sm:$0xff]  }
 0x190   :  { %6632 = vmatpush2.bf16.msra.mxu0 %v9571_v60  ;;  %v9667_v60 = vld [vmem:[#allocation5 + $0xae0] ss:$8 sps:$4 sm:$0xff]  }
 0x191   :  { %6675 = vmatpush2.bf16.msra.mxu1 %v9574_v61  ;;  %6633 = vmatprep.subr.bf16.mxu0 %v9579_v62  ;;  %v9670_v61 = vld [vmem:[#allocation5 + $0xbe0] ss:$8 sps:$4 sm:$0xff]   ;;  %v9675_v62 = vld [vmem:[#allocation5 + $0xad4] ss:$8 sps:$4 sm:$0xff]  }
 0x192   :  { %6676 = vmatprep.subr.bf16.mxu1 %v9582_v63  ;;  %v9678_v63 = vld [vmem:[#allocation5 + $0xbd4] ss:$8 sps:$4 sm:$0xff]  }
 0x194   :  { %6634 = vmatpush2.bf16.msra.mxu0 %v9577_v0  ;;  %v9673_v0 = vld [vmem:[#allocation5 + $0xad0] ss:$8 sps:$4 sm:$0xff]  }
 0x195   :  { %6677 = vmatpush2.bf16.msra.mxu1 %v9580_v1  ;;  %6635 = vmatprep.subr.bf16.mxu0 %v9585_v2  ;;  %v9676_v1 = vld [vmem:[#allocation5 + $0xbd0] ss:$8 sps:$4 sm:$0xff]   ;;  %v9681_v2 = vld [vmem:[#allocation5 + $0xac4] ss:$8 sps:$4 sm:$0xff]  }
 0x196   :  { %6678 = vmatprep.subr.bf16.mxu1 %v9588_v3  ;;  %v9684_v3 = vld [vmem:[#allocation5 + $0xbc4] ss:$8 sps:$4 sm:$0xff]  }
 0x198   :  { %6636 = vmatpush2.bf16.msra.mxu0 %v9583_v4  ;;  %v9679_v4 = vld [vmem:[#allocation5 + $0xac0] ss:$8 sps:$4 sm:$0xff]  }
 0x199   :  { %6679 = vmatpush2.bf16.msra.mxu1 %v9586_v5  ;;  %6637 = vmatprep.subr.bf16.mxu0 %v9591_v6  ;;  %v9682_v5 = vld [vmem:[#allocation5 + $0xbc0] ss:$8 sps:$4 sm:$0xff]   ;;  %v9687_v6 = vld [vmem:[#allocation5 + $0xab4] ss:$8 sps:$4 sm:$0xff]  }
 0x19a   :  { %6680 = vmatprep.subr.bf16.mxu1 %v9594_v7  ;;  %v9690_v7 = vld [vmem:[#allocation5 + $0xbb4] ss:$8 sps:$4 sm:$0xff]  }
 0x19c   :  { %6638 = vmatpush2.bf16.msra.mxu0 %v9589_v8  ;;  %v9685_v8 = vld [vmem:[#allocation5 + $0xab0] ss:$8 sps:$4 sm:$0xff]  }
 0x19d   :  { %6681 = vmatpush2.bf16.msra.mxu1 %v9592_v9  ;;  %6639 = vmatprep.subr.bf16.mxu0 %v9597_v10  ;;  %v9688_v9 = vld [vmem:[#allocation5 + $0xbb0] ss:$8 sps:$4 sm:$0xff]   ;;  %v9693_v10 = vld [vmem:[#allocation5 + $0xaa4] ss:$8 sps:$4 sm:$0xff]  }
 0x19e   :  { %6682 = vmatprep.subr.bf16.mxu1 %v9600_v11  ;;  %v9696_v11 = vld [vmem:[#allocation5 + $0xba4] ss:$8 sps:$4 sm:$0xff]  }
 0x1a0   :  { %6640 = vmatpush2.bf16.msra.mxu0 %v9595_v12  ;;  %v9691_v12 = vld [vmem:[#allocation5 + $0xaa0] ss:$8 sps:$4 sm:$0xff]  }
 0x1a1   :  { %6683 = vmatpush2.bf16.msra.mxu1 %v9598_v13  ;;  %6641 = vmatprep.subr.bf16.mxu0 %v9603_v14  ;;  %v9694_v13 = vld [vmem:[#allocation5 + $0xba0] ss:$8 sps:$4 sm:$0xff]   ;;  %v9699_v14 = vld [vmem:[#allocation5 + $0xa94] ss:$8 sps:$4 sm:$0xff]  }
 0x1a2   :  { %6684 = vmatprep.subr.bf16.mxu1 %v9606_v15  ;;  %v9702_v15 = vld [vmem:[#allocation5 + $0xb94] ss:$8 sps:$4 sm:$0xff]  }
 0x1a4   :  { %6642 = vmatpush2.bf16.msra.mxu0 %v9601_v16  ;;  %v9697_v16 = vld [vmem:[#allocation5 + $0xa90] ss:$8 sps:$4 sm:$0xff]  }
 0x1a5   :  { %6685 = vmatpush2.bf16.msra.mxu1 %v9604_v17  ;;  %6697 = vmatprep.subr.bf16.mxu0 %v9615_v20  ;;  %v9700_v17 = vld [vmem:[#allocation5 + $0xb90] ss:$8 sps:$4 sm:$0xff]   ;;  %v9703_v20 = vld [vmem:[#allocation5 + $0xa80] ss:$8 sps:$4 sm:$0xff]  }
 0x1a6   :  { %6740 = vmatprep.subr.bf16.mxu1 %v9618_v21  ;;  %v9706_v21 = vld [vmem:[#allocation5 + $0xb80] ss:$8 sps:$4 sm:$0xff]  }
 0x1a7   :  { %6644 = vmatmul.mubr.bf16.vlgmr.msra.gmra.mxu0 %v9607_v18  ;;  %v9705_v18 = vld [vmem:[#allocation5 + $0xa84] ss:$8 sps:$4 sm:$0xff]  }
 0x1a8   :  { %6687 = vmatmul.mubr.bf16.vlgmr.msra.gmra.mxu1 %v9610_v19  ;;  %6698 = vmatpush1.bf16.msra.mxu0 %v9613_v22  ;;  %v9708_v19 = vld [vmem:[#allocation5 + $0xb84] ss:$8 sps:$4 sm:$0xff]   ;;  %v9709_v22 = vld [vmem:[#allocation2 + $0x50] ss:$240 sps:$4 sm:$0xff]  }
 0x1a9   :  { %6741 = vmatpush1.bf16.msra.mxu1 %v9616_v23  ;;  %6699 = vmatprep.subr.bf16.mxu0 %v9621_v24  ;;  %v9712_v23 = vld [vmem:[#allocation2 + $0x58] ss:$240 sps:$4 sm:$0xff]   ;;  %v9717_v24 = vld [vmem:[#allocation5 + $0xc74] ss:$8 sps:$4 sm:$0xff]  }
 0x1aa   :  { %6742 = vmatprep.subr.bf16.mxu1 %v9624_v25  ;;  %6729 = vmatprep.mubr.bf16.mxu0 %v9711_v28  ;;  %v9720_v25 = vld [vmem:[#allocation5 + $0xd74] ss:$8 sps:$4 sm:$0xff]   ;;  %v9723_v28 = vld [vmem:[#allocation5 + $0xc64] ss:$8 sps:$4 sm:$0xff]  }
 0x1ab   :  { %6772 = vmatprep.mubr.bf16.mxu1 %v9714_v29  ;;  %v9726_v29 = vld [vmem:[#allocation5 + $0xd64] ss:$8 sps:$4 sm:$0xff]  }
 0x1ac   :  { %6700 = vmatpush1.bf16.msra.mxu0 %v9619_v26  ;;  %v9715_v26 = vld [vmem:[#allocation5 + $0xc70] ss:$8 sps:$4 sm:$0xff]  }
 0x1ad   :  { %6743 = vmatpush1.bf16.msra.mxu1 %v9622_v27  ;;  %6701 = vmatprep.subr.bf16.mxu0 %v9627_v30  ;;  %v9718_v27 = vld [vmem:[#allocation5 + $0xd70] ss:$8 sps:$4 sm:$0xff]   ;;  %v9721_v30 = vld [vmem:[#allocation5 + $0xc60] ss:$8 sps:$4 sm:$0xff]  }
 0x1ae   :  { %6744 = vmatprep.subr.bf16.mxu1 %v9630_v31  ;;  %v9724_v31 = vld [vmem:[#allocation5 + $0xd60] ss:$8 sps:$4 sm:$0xff]  }
 0x1b0   :  { %6702 = vmatpush1.bf16.msra.mxu0 %v9625_v32  ;;  %v9813_v32 = vld [vmem:[#allocation2 + $0x64] ss:$240 sps:$4 sm:$0xff]  }
 0x1b1   :  { %6745 = vmatpush1.bf16.msra.mxu1 %v9628_v33  ;;  %6703 = vmatprep.subr.bf16.mxu0 %v9633_v34  ;;  %v9816_v33 = vld [vmem:[#allocation2 + $0x6c] ss:$240 sps:$4 sm:$0xff]  }
 0x1b2   :  { %6746 = vmatprep.subr.bf16.mxu1 %v9636_v35  ;;  %v9729_v34 = vld [vmem:[#allocation5 + $0xc54] ss:$8 sps:$4 sm:$0xff]  }
 0x1b3   :  { %v9732_v35 = vld [vmem:[#allocation5 + $0xd54] ss:$8 sps:$4 sm:$0xff]  }
 0x1b4   :  { %6704 = vmatpush1.bf16.msra.mxu0 %v9631_v36  ;;  %v9727_v36 = vld [vmem:[#allocation5 + $0xc50] ss:$8 sps:$4 sm:$0xff]  }
 0x1b5   :  { %6747 = vmatpush1.bf16.msra.mxu1 %v9634_v37  ;;  %6705 = vmatprep.subr.bf16.mxu0 %v9639_v38  ;;  %v9730_v37 = vld [vmem:[#allocation5 + $0xd50] ss:$8 sps:$4 sm:$0xff]   ;;  %v9735_v38 = vld [vmem:[#allocation5 + $0xc44] ss:$8 sps:$4 sm:$0xff]  }
 0x1b6   :  { %6748 = vmatprep.subr.bf16.mxu1 %v9642_v39  ;;  %v9738_v39 = vld [vmem:[#allocation5 + $0xd44] ss:$8 sps:$4 sm:$0xff]  }
 0x1b8   :  { %6706 = vmatpush1.bf16.msra.mxu0 %v9637_v40  ;;  %v9733_v40 = vld [vmem:[#allocation5 + $0xc40] ss:$8 sps:$4 sm:$0xff]  }
 0x1b9   :  { %6749 = vmatpush1.bf16.msra.mxu1 %v9640_v41  ;;  %6707 = vmatprep.subr.bf16.mxu0 %v9645_v42  ;;  %v9736_v41 = vld [vmem:[#allocation5 + $0xd40] ss:$8 sps:$4 sm:$0xff]   ;;  %v9741_v42 = vld [vmem:[#allocation5 + $0xc34] ss:$8 sps:$4 sm:$0xff]  }
 0x1ba   :  { %6750 = vmatprep.subr.bf16.mxu1 %v9648_v43  ;;  %v9744_v43 = vld [vmem:[#allocation5 + $0xd34] ss:$8 sps:$4 sm:$0xff]  }
 0x1bc   :  { %6708 = vmatpush1.bf16.msra.mxu0 %v9643_v44  ;;  %v9739_v44 = vld [vmem:[#allocation5 + $0xc30] ss:$8 sps:$4 sm:$0xff]  }
 0x1bd   :  { %6751 = vmatpush1.bf16.msra.mxu1 %v9646_v45  ;;  %6709 = vmatprep.subr.bf16.mxu0 %v9651_v46  ;;  %v9742_v45 = vld [vmem:[#allocation5 + $0xd30] ss:$8 sps:$4 sm:$0xff]   ;;  %v9747_v46 = vld [vmem:[#allocation5 + $0xc24] ss:$8 sps:$4 sm:$0xff]  }
 0x1be   :  { %6752 = vmatprep.subr.bf16.mxu1 %v9654_v47  ;;  %v9750_v47 = vld [vmem:[#allocation5 + $0xd24] ss:$8 sps:$4 sm:$0xff]  }
 0x1c0   :  { %6710 = vmatpush1.bf16.msra.mxu0 %v9649_v48  ;;  %v9745_v48 = vld [vmem:[#allocation5 + $0xc20] ss:$8 sps:$4 sm:$0xff]  }
 0x1c1   :  { %6753 = vmatpush1.bf16.msra.mxu1 %v9652_v49  ;;  %6711 = vmatprep.subr.bf16.mxu0 %v9657_v50  ;;  %v9748_v49 = vld [vmem:[#allocation5 + $0xd20] ss:$8 sps:$4 sm:$0xff]   ;;  %v9753_v50 = vld [vmem:[#allocation5 + $0xc14] ss:$8 sps:$4 sm:$0xff]  }
 0x1c2   :  { %6754 = vmatprep.subr.bf16.mxu1 %v9660_v51  ;;  %v9756_v51 = vld [vmem:[#allocation5 + $0xd14] ss:$8 sps:$4 sm:$0xff]  }
 0x1c4   :  { %6712 = vmatpush1.bf16.msra.mxu0 %v9655_v52  ;;  %v9751_v52 = vld [vmem:[#allocation5 + $0xc10] ss:$8 sps:$4 sm:$0xff]  }
 0x1c5   :  { %6755 = vmatpush1.bf16.msra.mxu1 %v9658_v53  ;;  %6713 = vmatprep.subr.bf16.mxu0 %v9663_v54  ;;  %v9754_v53 = vld [vmem:[#allocation5 + $0xd10] ss:$8 sps:$4 sm:$0xff]   ;;  %v9759_v54 = vld [vmem:[#allocation5 + $0xc04] ss:$8 sps:$4 sm:$0xff]  }
 0x1c6   :  { %6756 = vmatprep.subr.bf16.mxu1 %v9666_v55  ;;  %v9762_v55 = vld [vmem:[#allocation5 + $0xd04] ss:$8 sps:$4 sm:$0xff]  }
 0x1c8   :  { %6714 = vmatpush2.bf16.msra.mxu0 %v9661_v56  ;;  %v9757_v56 = vld [vmem:[#allocation5 + $0xc00] ss:$8 sps:$4 sm:$0xff]  }
 0x1c9   :  { %6757 = vmatpush2.bf16.msra.mxu1 %v9664_v57  ;;  %6715 = vmatprep.subr.bf16.mxu0 %v9669_v58  ;;  %v9760_v57 = vld [vmem:[#allocation5 + $0xd00] ss:$8 sps:$4 sm:$0xff]   ;;  %v9765_v58 = vld [vmem:[#allocation5 + $0xcf4] ss:$8 sps:$4 sm:$0xff]  }
 0x1ca   :  { %6758 = vmatprep.subr.bf16.mxu1 %v9672_v59  ;;  %v9768_v59 = vld [vmem:[#allocation5 + $0xdf4] ss:$8 sps:$4 sm:$0xff]  }
 0x1cc   :  { %6716 = vmatpush2.bf16.msra.mxu0 %v9667_v60  ;;  %v9763_v60 = vld [vmem:[#allocation5 + $0xcf0] ss:$8 sps:$4 sm:$0xff]  }
 0x1cd   :  { %6759 = vmatpush2.bf16.msra.mxu1 %v9670_v61  ;;  %6717 = vmatprep.subr.bf16.mxu0 %v9675_v62  ;;  %v9766_v61 = vld [vmem:[#allocation5 + $0xdf0] ss:$8 sps:$4 sm:$0xff]   ;;  %v9771_v62 = vld [vmem:[#allocation5 + $0xce4] ss:$8 sps:$4 sm:$0xff]  }
 0x1ce   :  { %6760 = vmatprep.subr.bf16.mxu1 %v9678_v63  ;;  %v9774_v63 = vld [vmem:[#allocation5 + $0xde4] ss:$8 sps:$4 sm:$0xff]  }
 0x1d0   :  { %6718 = vmatpush2.bf16.msra.mxu0 %v9673_v0  ;;  %v9769_v0 = vld [vmem:[#allocation5 + $0xce0] ss:$8 sps:$4 sm:$0xff]  }
 0x1d1   :  { %6761 = vmatpush2.bf16.msra.mxu1 %v9676_v1  ;;  %6719 = vmatprep.subr.bf16.mxu0 %v9681_v2  ;;  %v9772_v1 = vld [vmem:[#allocation5 + $0xde0] ss:$8 sps:$4 sm:$0xff]   ;;  %v9777_v2 = vld [vmem:[#allocation5 + $0xcd4] ss:$8 sps:$4 sm:$0xff]  }
 0x1d2   :  { %6762 = vmatprep.subr.bf16.mxu1 %v9684_v3  ;;  %v9780_v3 = vld [vmem:[#allocation5 + $0xdd4] ss:$8 sps:$4 sm:$0xff]  }
 0x1d4   :  { %6720 = vmatpush2.bf16.msra.mxu0 %v9679_v4  ;;  %v9775_v4 = vld [vmem:[#allocation5 + $0xcd0] ss:$8 sps:$4 sm:$0xff]  }
 0x1d5   :  { %6763 = vmatpush2.bf16.msra.mxu1 %v9682_v5  ;;  %6721 = vmatprep.subr.bf16.mxu0 %v9687_v6  ;;  %v9778_v5 = vld [vmem:[#allocation5 + $0xdd0] ss:$8 sps:$4 sm:$0xff]   ;;  %v9783_v6 = vld [vmem:[#allocation5 + $0xcc4] ss:$8 sps:$4 sm:$0xff]  }
 0x1d6   :  { %6764 = vmatprep.subr.bf16.mxu1 %v9690_v7  ;;  %v9786_v7 = vld [vmem:[#allocation5 + $0xdc4] ss:$8 sps:$4 sm:$0xff]  }
 0x1d8   :  { %6722 = vmatpush2.bf16.msra.mxu0 %v9685_v8  ;;  %v9781_v8 = vld [vmem:[#allocation5 + $0xcc0] ss:$8 sps:$4 sm:$0xff]  }
 0x1d9   :  { %6765 = vmatpush2.bf16.msra.mxu1 %v9688_v9  ;;  %6723 = vmatprep.subr.bf16.mxu0 %v9693_v10  ;;  %v9784_v9 = vld [vmem:[#allocation5 + $0xdc0] ss:$8 sps:$4 sm:$0xff]   ;;  %v9789_v10 = vld [vmem:[#allocation5 + $0xcb4] ss:$8 sps:$4 sm:$0xff]  }
 0x1da   :  { %6766 = vmatprep.subr.bf16.mxu1 %v9696_v11  ;;  %v9792_v11 = vld [vmem:[#allocation5 + $0xdb4] ss:$8 sps:$4 sm:$0xff]  }
 0x1dc   :  { %6724 = vmatpush2.bf16.msra.mxu0 %v9691_v12  ;;  %v9787_v12 = vld [vmem:[#allocation5 + $0xcb0] ss:$8 sps:$4 sm:$0xff]  }
 0x1dd   :  { %6767 = vmatpush2.bf16.msra.mxu1 %v9694_v13  ;;  %6725 = vmatprep.subr.bf16.mxu0 %v9699_v14  ;;  %v9790_v13 = vld [vmem:[#allocation5 + $0xdb0] ss:$8 sps:$4 sm:$0xff]   ;;  %v9795_v14 = vld [vmem:[#allocation5 + $0xca4] ss:$8 sps:$4 sm:$0xff]  }
 0x1de   :  { %6768 = vmatprep.subr.bf16.mxu1 %v9702_v15  ;;  %v9798_v15 = vld [vmem:[#allocation5 + $0xda4] ss:$8 sps:$4 sm:$0xff]  }
 0x1e0   :  { %6726 = vmatpush2.bf16.msra.mxu0 %v9697_v16  ;;  %v9793_v16 = vld [vmem:[#allocation5 + $0xca0] ss:$8 sps:$4 sm:$0xff]  }
 0x1e1   :  { %6769 = vmatpush2.bf16.msra.mxu1 %v9700_v17  ;;  %6727 = vmatprep.subr.bf16.mxu0 %v9705_v18  ;;  %v9796_v17 = vld [vmem:[#allocation5 + $0xda0] ss:$8 sps:$4 sm:$0xff]   ;;  %v9801_v18 = vld [vmem:[#allocation5 + $0xc94] ss:$8 sps:$4 sm:$0xff]  }
 0x1e2   :  { %6770 = vmatprep.subr.bf16.mxu1 %v9708_v19  ;;  %v9804_v19 = vld [vmem:[#allocation5 + $0xd94] ss:$8 sps:$4 sm:$0xff]  }
 0x1e4   :  { %6728 = vmatpush2.bf16.msra.mxu0 %v9703_v20  ;;  %v9799_v20 = vld [vmem:[#allocation5 + $0xc90] ss:$8 sps:$4 sm:$0xff]  }
 0x1e5   :  { %6771 = vmatpush2.bf16.msra.mxu1 %v9706_v21  ;;  %6783 = vmatprep.subr.bf16.mxu0 %v9717_v24  ;;  %v9802_v21 = vld [vmem:[#allocation5 + $0xd90] ss:$8 sps:$4 sm:$0xff]   ;;  %v9805_v24 = vld [vmem:[#allocation5 + $0xc80] ss:$8 sps:$4 sm:$0xff]  }
 0x1e6   :  { %6826 = vmatprep.subr.bf16.mxu1 %v9720_v25  ;;  %v9808_v25 = vld [vmem:[#allocation5 + $0xd80] ss:$8 sps:$4 sm:$0xff]  }
 0x1e7   :  { %6730 = vmatmul.mubr.bf16.vlgmr.msra.gmra.mxu0 %v9709_v22  ;;  %v9807_v22 = vld [vmem:[#allocation5 + $0xc84] ss:$8 sps:$4 sm:$0xff]  }
 0x1e8   :  { %6773 = vmatmul.mubr.bf16.vlgmr.msra.gmra.mxu1 %v9712_v23  ;;  %6784 = vmatpush1.bf16.msra.mxu0 %v9715_v26  ;;  %v9810_v23 = vld [vmem:[#allocation5 + $0xd84] ss:$8 sps:$4 sm:$0xff]   ;;  %v9811_v26 = vld [vmem:[#allocation2 + $0x60] ss:$240 sps:$4 sm:$0xff]  }
 0x1e9   :  { %6827 = vmatpush1.bf16.msra.mxu1 %v9718_v27  ;;  %6785 = vmatprep.subr.bf16.mxu0 %v9723_v28  ;;  %v9814_v27 = vld [vmem:[#allocation2 + $0x68] ss:$240 sps:$4 sm:$0xff]   ;;  %v9819_v28 = vld [vmem:[#allocation5 + $0xe74] ss:$8 sps:$4 sm:$0xff]  }
 0x1ea   :  { %6828 = vmatprep.subr.bf16.mxu1 %v9726_v29  ;;  %6815 = vmatprep.mubr.bf16.mxu0 %v9813_v32  ;;  %v9822_v29 = vld [vmem:[#allocation5 + $0xf74] ss:$8 sps:$4 sm:$0xff]   ;;  %v9825_v32 = vld [vmem:[#allocation5 + $0xe64] ss:$8 sps:$4 sm:$0xff]  }
 0x1eb   :  { %6858 = vmatprep.mubr.bf16.mxu1 %v9816_v33  ;;  %v9828_v33 = vld [vmem:[#allocation5 + $0xf64] ss:$8 sps:$4 sm:$0xff]  }
 0x1ec   :  { %6786 = vmatpush1.bf16.msra.mxu0 %v9721_v30  ;;  %v9817_v30 = vld [vmem:[#allocation5 + $0xe70] ss:$8 sps:$4 sm:$0xff]  }
 0x1ed   :  { %6829 = vmatpush1.bf16.msra.mxu1 %v9724_v31  ;;  %6787 = vmatprep.subr.bf16.mxu0 %v9729_v34  ;;  %v9820_v31 = vld [vmem:[#allocation5 + $0xf70] ss:$8 sps:$4 sm:$0xff]   ;;  %v9823_v34 = vld [vmem:[#allocation5 + $0xe60] ss:$8 sps:$4 sm:$0xff]  }
 0x1ee   :  { %6830 = vmatprep.subr.bf16.mxu1 %v9732_v35  ;;  %v9826_v35 = vld [vmem:[#allocation5 + $0xf60] ss:$8 sps:$4 sm:$0xff]  }
 0x1f0   :  { %6788 = vmatpush1.bf16.msra.mxu0 %v9727_v36  ;;  %v9915_v36 = vld [vmem:[#allocation2 + $0x74] ss:$240 sps:$4 sm:$0xff]  }
 0x1f1   :  { %6831 = vmatpush1.bf16.msra.mxu1 %v9730_v37  ;;  %6789 = vmatprep.subr.bf16.mxu0 %v9735_v38  ;;  %v9918_v37 = vld [vmem:[#allocation2 + $0x7c] ss:$240 sps:$4 sm:$0xff]  }
 0x1f2   :  { %6832 = vmatprep.subr.bf16.mxu1 %v9738_v39  ;;  %v9831_v38 = vld [vmem:[#allocation5 + $0xe54] ss:$8 sps:$4 sm:$0xff]  }
 0x1f3   :  { %v9834_v39 = vld [vmem:[#allocation5 + $0xf54] ss:$8 sps:$4 sm:$0xff]  }
 0x1f4   :  { %6790 = vmatpush1.bf16.msra.mxu0 %v9733_v40  ;;  %v9829_v40 = vld [vmem:[#allocation5 + $0xe50] ss:$8 sps:$4 sm:$0xff]  }
 0x1f5   :  { %6833 = vmatpush1.bf16.msra.mxu1 %v9736_v41  ;;  %6791 = vmatprep.subr.bf16.mxu0 %v9741_v42  ;;  %v9832_v41 = vld [vmem:[#allocation5 + $0xf50] ss:$8 sps:$4 sm:$0xff]   ;;  %v9837_v42 = vld [vmem:[#allocation5 + $0xe44] ss:$8 sps:$4 sm:$0xff]  }
 0x1f6   :  { %6834 = vmatprep.subr.bf16.mxu1 %v9744_v43  ;;  %v9840_v43 = vld [vmem:[#allocation5 + $0xf44] ss:$8 sps:$4 sm:$0xff]  }
 0x1f8   :  { %6792 = vmatpush1.bf16.msra.mxu0 %v9739_v44  ;;  %v9835_v44 = vld [vmem:[#allocation5 + $0xe40] ss:$8 sps:$4 sm:$0xff]  }
 0x1f9   :  { %6835 = vmatpush1.bf16.msra.mxu1 %v9742_v45  ;;  %6793 = vmatprep.subr.bf16.mxu0 %v9747_v46  ;;  %v9838_v45 = vld [vmem:[#allocation5 + $0xf40] ss:$8 sps:$4 sm:$0xff]   ;;  %v9843_v46 = vld [vmem:[#allocation5 + $0xe34] ss:$8 sps:$4 sm:$0xff]  }
 0x1fa   :  { %6836 = vmatprep.subr.bf16.mxu1 %v9750_v47  ;;  %v9846_v47 = vld [vmem:[#allocation5 + $0xf34] ss:$8 sps:$4 sm:$0xff]  }
 0x1fc   :  { %6794 = vmatpush1.bf16.msra.mxu0 %v9745_v48  ;;  %v9841_v48 = vld [vmem:[#allocation5 + $0xe30] ss:$8 sps:$4 sm:$0xff]  }
 0x1fd   :  { %6837 = vmatpush1.bf16.msra.mxu1 %v9748_v49  ;;  %6795 = vmatprep.subr.bf16.mxu0 %v9753_v50  ;;  %v9844_v49 = vld [vmem:[#allocation5 + $0xf30] ss:$8 sps:$4 sm:$0xff]   ;;  %v9849_v50 = vld [vmem:[#allocation5 + $0xe24] ss:$8 sps:$4 sm:$0xff]  }
 0x1fe   :  { %6838 = vmatprep.subr.bf16.mxu1 %v9756_v51  ;;  %v9852_v51 = vld [vmem:[#allocation5 + $0xf24] ss:$8 sps:$4 sm:$0xff]  }
 0x200   :  { %6796 = vmatpush1.bf16.msra.mxu0 %v9751_v52  ;;  %v9847_v52 = vld [vmem:[#allocation5 + $0xe20] ss:$8 sps:$4 sm:$0xff]  }
 0x201   :  { %6839 = vmatpush1.bf16.msra.mxu1 %v9754_v53  ;;  %6797 = vmatprep.subr.bf16.mxu0 %v9759_v54  ;;  %v9850_v53 = vld [vmem:[#allocation5 + $0xf20] ss:$8 sps:$4 sm:$0xff]   ;;  %v9855_v54 = vld [vmem:[#allocation5 + $0xe14] ss:$8 sps:$4 sm:$0xff]  }
 0x202   :  { %6840 = vmatprep.subr.bf16.mxu1 %v9762_v55  ;;  %v9858_v55 = vld [vmem:[#allocation5 + $0xf14] ss:$8 sps:$4 sm:$0xff]  }
 0x204   :  { %6798 = vmatpush1.bf16.msra.mxu0 %v9757_v56  ;;  %v9853_v56 = vld [vmem:[#allocation5 + $0xe10] ss:$8 sps:$4 sm:$0xff]  }
 0x205   :  { %6841 = vmatpush1.bf16.msra.mxu1 %v9760_v57  ;;  %6799 = vmatprep.subr.bf16.mxu0 %v9765_v58  ;;  %v9856_v57 = vld [vmem:[#allocation5 + $0xf10] ss:$8 sps:$4 sm:$0xff]   ;;  %v9861_v58 = vld [vmem:[#allocation5 + $0xe04] ss:$8 sps:$4 sm:$0xff]  }
 0x206   :  { %6842 = vmatprep.subr.bf16.mxu1 %v9768_v59  ;;  %v9864_v59 = vld [vmem:[#allocation5 + $0xf04] ss:$8 sps:$4 sm:$0xff]  }
 0x208   :  { %6800 = vmatpush2.bf16.msra.mxu0 %v9763_v60  ;;  %v9859_v60 = vld [vmem:[#allocation5 + $0xe00] ss:$8 sps:$4 sm:$0xff]  }
 0x209   :  { %6843 = vmatpush2.bf16.msra.mxu1 %v9766_v61  ;;  %6801 = vmatprep.subr.bf16.mxu0 %v9771_v62  ;;  %v9862_v61 = vld [vmem:[#allocation5 + $0xf00] ss:$8 sps:$4 sm:$0xff]   ;;  %v9867_v62 = vld [vmem:[#allocation5 + $0xef4] ss:$8 sps:$4 sm:$0xff]  }
 0x20a   :  { %6844 = vmatprep.subr.bf16.mxu1 %v9774_v63  ;;  %v9870_v63 = vld [vmem:[#allocation5 + $0xff4] ss:$8 sps:$4 sm:$0xff]  }
 0x20c   :  { %6802 = vmatpush2.bf16.msra.mxu0 %v9769_v0  ;;  %v9865_v0 = vld [vmem:[#allocation5 + $0xef0] ss:$8 sps:$4 sm:$0xff]  }
 0x20d   :  { %6845 = vmatpush2.bf16.msra.mxu1 %v9772_v1  ;;  %6803 = vmatprep.subr.bf16.mxu0 %v9777_v2  ;;  %v9868_v1 = vld [vmem:[#allocation5 + $0xff0] ss:$8 sps:$4 sm:$0xff]   ;;  %v9873_v2 = vld [vmem:[#allocation5 + $0xee4] ss:$8 sps:$4 sm:$0xff]  }
 0x20e   :  { %6846 = vmatprep.subr.bf16.mxu1 %v9780_v3  ;;  %v9876_v3 = vld [vmem:[#allocation5 + $0xfe4] ss:$8 sps:$4 sm:$0xff]  }
 0x210   :  { %6804 = vmatpush2.bf16.msra.mxu0 %v9775_v4  ;;  %v9871_v4 = vld [vmem:[#allocation5 + $0xee0] ss:$8 sps:$4 sm:$0xff]  }
 0x211   :  { %6847 = vmatpush2.bf16.msra.mxu1 %v9778_v5  ;;  %6805 = vmatprep.subr.bf16.mxu0 %v9783_v6  ;;  %v9874_v5 = vld [vmem:[#allocation5 + $0xfe0] ss:$8 sps:$4 sm:$0xff]   ;;  %v9879_v6 = vld [vmem:[#allocation5 + $0xed4] ss:$8 sps:$4 sm:$0xff]  }
 0x212   :  { %6848 = vmatprep.subr.bf16.mxu1 %v9786_v7  ;;  %v9882_v7 = vld [vmem:[#allocation5 + $0xfd4] ss:$8 sps:$4 sm:$0xff]  }
 0x214   :  { %6806 = vmatpush2.bf16.msra.mxu0 %v9781_v8  ;;  %v9877_v8 = vld [vmem:[#allocation5 + $0xed0] ss:$8 sps:$4 sm:$0xff]  }
 0x215   :  { %6849 = vmatpush2.bf16.msra.mxu1 %v9784_v9  ;;  %6807 = vmatprep.subr.bf16.mxu0 %v9789_v10  ;;  %v9880_v9 = vld [vmem:[#allocation5 + $0xfd0] ss:$8 sps:$4 sm:$0xff]   ;;  %v9885_v10 = vld [vmem:[#allocation5 + $0xec4] ss:$8 sps:$4 sm:$0xff]  }
 0x216   :  { %6850 = vmatprep.subr.bf16.mxu1 %v9792_v11  ;;  %v9888_v11 = vld [vmem:[#allocation5 + $0xfc4] ss:$8 sps:$4 sm:$0xff]  }
 0x218   :  { %6808 = vmatpush2.bf16.msra.mxu0 %v9787_v12  ;;  %v9883_v12 = vld [vmem:[#allocation5 + $0xec0] ss:$8 sps:$4 sm:$0xff]  }
 0x219   :  { %6851 = vmatpush2.bf16.msra.mxu1 %v9790_v13  ;;  %6809 = vmatprep.subr.bf16.mxu0 %v9795_v14  ;;  %v9886_v13 = vld [vmem:[#allocation5 + $0xfc0] ss:$8 sps:$4 sm:$0xff]   ;;  %v9891_v14 = vld [vmem:[#allocation5 + $0xeb4] ss:$8 sps:$4 sm:$0xff]  }
 0x21a   :  { %6852 = vmatprep.subr.bf16.mxu1 %v9798_v15  ;;  %v9894_v15 = vld [vmem:[#allocation5 + $0xfb4] ss:$8 sps:$4 sm:$0xff]  }
 0x21c   :  { %6810 = vmatpush2.bf16.msra.mxu0 %v9793_v16  ;;  %v9889_v16 = vld [vmem:[#allocation5 + $0xeb0] ss:$8 sps:$4 sm:$0xff]  }
 0x21d   :  { %6853 = vmatpush2.bf16.msra.mxu1 %v9796_v17  ;;  %6811 = vmatprep.subr.bf16.mxu0 %v9801_v18  ;;  %v9892_v17 = vld [vmem:[#allocation5 + $0xfb0] ss:$8 sps:$4 sm:$0xff]   ;;  %v9897_v18 = vld [vmem:[#allocation5 + $0xea4] ss:$8 sps:$4 sm:$0xff]  }
 0x21e   :  { %6854 = vmatprep.subr.bf16.mxu1 %v9804_v19  ;;  %v9900_v19 = vld [vmem:[#allocation5 + $0xfa4] ss:$8 sps:$4 sm:$0xff]  }
 0x220   :  { %6812 = vmatpush2.bf16.msra.mxu0 %v9799_v20  ;;  %v9895_v20 = vld [vmem:[#allocation5 + $0xea0] ss:$8 sps:$4 sm:$0xff]  }
 0x221   :  { %6855 = vmatpush2.bf16.msra.mxu1 %v9802_v21  ;;  %6813 = vmatprep.subr.bf16.mxu0 %v9807_v22  ;;  %v9898_v21 = vld [vmem:[#allocation5 + $0xfa0] ss:$8 sps:$4 sm:$0xff]   ;;  %v9903_v22 = vld [vmem:[#allocation5 + $0xe94] ss:$8 sps:$4 sm:$0xff]  }
 0x222   :  { %6856 = vmatprep.subr.bf16.mxu1 %v9810_v23  ;;  %v9906_v23 = vld [vmem:[#allocation5 + $0xf94] ss:$8 sps:$4 sm:$0xff]  }
 0x224   :  { %6814 = vmatpush2.bf16.msra.mxu0 %v9805_v24  ;;  %v9901_v24 = vld [vmem:[#allocation5 + $0xe90] ss:$8 sps:$4 sm:$0xff]  }
 0x225   :  { %6857 = vmatpush2.bf16.msra.mxu1 %v9808_v25  ;;  %6869 = vmatprep.subr.bf16.mxu0 %v9819_v28  ;;  %v9904_v25 = vld [vmem:[#allocation5 + $0xf90] ss:$8 sps:$4 sm:$0xff]   ;;  %v9907_v28 = vld [vmem:[#allocation5 + $0xe80] ss:$8 sps:$4 sm:$0xff]  }
 0x226   :  { %6912 = vmatprep.subr.bf16.mxu1 %v9822_v29  ;;  %v9910_v29 = vld [vmem:[#allocation5 + $0xf80] ss:$8 sps:$4 sm:$0xff]  }
 0x227   :  { %6816 = vmatmul.mubr.bf16.vlgmr.msra.gmra.mxu0 %v9811_v26  ;;  %v9909_v26 = vld [vmem:[#allocation5 + $0xe84] ss:$8 sps:$4 sm:$0xff]  }
 0x228   :  { %6859 = vmatmul.mubr.bf16.vlgmr.msra.gmra.mxu1 %v9814_v27  ;;  %6870 = vmatpush1.bf16.msra.mxu0 %v9817_v30  ;;  %v9912_v27 = vld [vmem:[#allocation5 + $0xf84] ss:$8 sps:$4 sm:$0xff]   ;;  %v9913_v30 = vld [vmem:[#allocation2 + $0x70] ss:$240 sps:$4 sm:$0xff]  }
 0x229   :  { %6913 = vmatpush1.bf16.msra.mxu1 %v9820_v31  ;;  %6871 = vmatprep.subr.bf16.mxu0 %v9825_v32  ;;  %v9916_v31 = vld [vmem:[#allocation2 + $0x78] ss:$240 sps:$4 sm:$0xff]   ;;  %v9921_v32 = vld [vmem:[#allocation5 + $0x1074] ss:$8 sps:$4 sm:$0xff]  }
 0x22a   :  { %6914 = vmatprep.subr.bf16.mxu1 %v9828_v33  ;;  %6901 = vmatprep.mubr.bf16.mxu0 %v9915_v36  ;;  %v9924_v33 = vld [vmem:[#allocation5 + $0x1174] ss:$8 sps:$4 sm:$0xff]   ;;  %v9927_v36 = vld [vmem:[#allocation5 + $0x1064] ss:$8 sps:$4 sm:$0xff]  }
 0x22b   :  { %6944 = vmatprep.mubr.bf16.mxu1 %v9918_v37  ;;  %v9930_v37 = vld [vmem:[#allocation5 + $0x1164] ss:$8 sps:$4 sm:$0xff]  }
 0x22c   :  { %6872 = vmatpush1.bf16.msra.mxu0 %v9823_v34  ;;  %v9919_v34 = vld [vmem:[#allocation5 + $0x1070] ss:$8 sps:$4 sm:$0xff]  }
 0x22d   :  { %6915 = vmatpush1.bf16.msra.mxu1 %v9826_v35  ;;  %6873 = vmatprep.subr.bf16.mxu0 %v9831_v38  ;;  %v9922_v35 = vld [vmem:[#allocation5 + $0x1170] ss:$8 sps:$4 sm:$0xff]   ;;  %v9925_v38 = vld [vmem:[#allocation5 + $0x1060] ss:$8 sps:$4 sm:$0xff]  }
 0x22e   :  { %6916 = vmatprep.subr.bf16.mxu1 %v9834_v39  ;;  %v9928_v39 = vld [vmem:[#allocation5 + $0x1160] ss:$8 sps:$4 sm:$0xff]  }
 0x230   :  { %6874 = vmatpush1.bf16.msra.mxu0 %v9829_v40  ;;  %v10017_v40 = vld [vmem:[#allocation2 + $0x84] ss:$240 sps:$4 sm:$0xff]  }
 0x231   :  { %6917 = vmatpush1.bf16.msra.mxu1 %v9832_v41  ;;  %6875 = vmatprep.subr.bf16.mxu0 %v9837_v42  ;;  %v10020_v41 = vld [vmem:[#allocation2 + $0x8c] ss:$240 sps:$4 sm:$0xff]  }
 0x232   :  { %6918 = vmatprep.subr.bf16.mxu1 %v9840_v43  ;;  %v9933_v42 = vld [vmem:[#allocation5 + $0x1054] ss:$8 sps:$4 sm:$0xff]  }
 0x233   :  { %v9936_v43 = vld [vmem:[#allocation5 + $0x1154] ss:$8 sps:$4 sm:$0xff]  }
 0x234   :  { %6876 = vmatpush1.bf16.msra.mxu0 %v9835_v44  ;;  %v9931_v44 = vld [vmem:[#allocation5 + $0x1050] ss:$8 sps:$4 sm:$0xff]  }
 0x235   :  { %6919 = vmatpush1.bf16.msra.mxu1 %v9838_v45  ;;  %6877 = vmatprep.subr.bf16.mxu0 %v9843_v46  ;;  %v9934_v45 = vld [vmem:[#allocation5 + $0x1150] ss:$8 sps:$4 sm:$0xff]   ;;  %v9939_v46 = vld [vmem:[#allocation5 + $0x1044] ss:$8 sps:$4 sm:$0xff]  }
 0x236   :  { %6920 = vmatprep.subr.bf16.mxu1 %v9846_v47  ;;  %v9942_v47 = vld [vmem:[#allocation5 + $0x1144] ss:$8 sps:$4 sm:$0xff]  }
 0x238   :  { %6878 = vmatpush1.bf16.msra.mxu0 %v9841_v48  ;;  %v9937_v48 = vld [vmem:[#allocation5 + $0x1040] ss:$8 sps:$4 sm:$0xff]  }
 0x239   :  { %6921 = vmatpush1.bf16.msra.mxu1 %v9844_v49  ;;  %6879 = vmatprep.subr.bf16.mxu0 %v9849_v50  ;;  %v9940_v49 = vld [vmem:[#allocation5 + $0x1140] ss:$8 sps:$4 sm:$0xff]   ;;  %v9945_v50 = vld [vmem:[#allocation5 + $0x1034] ss:$8 sps:$4 sm:$0xff]  }
 0x23a   :  { %6922 = vmatprep.subr.bf16.mxu1 %v9852_v51  ;;  %v9948_v51 = vld [vmem:[#allocation5 + $0x1134] ss:$8 sps:$4 sm:$0xff]  }
 0x23c   :  { %6880 = vmatpush1.bf16.msra.mxu0 %v9847_v52  ;;  %v9943_v52 = vld [vmem:[#allocation5 + $0x1030] ss:$8 sps:$4 sm:$0xff]  }
 0x23d   :  { %6923 = vmatpush1.bf16.msra.mxu1 %v9850_v53  ;;  %6881 = vmatprep.subr.bf16.mxu0 %v9855_v54  ;;  %v9946_v53 = vld [vmem:[#allocation5 + $0x1130] ss:$8 sps:$4 sm:$0xff]   ;;  %v9951_v54 = vld [vmem:[#allocation5 + $0x1024] ss:$8 sps:$4 sm:$0xff]  }
 0x23e   :  { %6924 = vmatprep.subr.bf16.mxu1 %v9858_v55  ;;  %v9954_v55 = vld [vmem:[#allocation5 + $0x1124] ss:$8 sps:$4 sm:$0xff]  }
 0x240   :  { %6882 = vmatpush1.bf16.msra.mxu0 %v9853_v56  ;;  %v9949_v56 = vld [vmem:[#allocation5 + $0x1020] ss:$8 sps:$4 sm:$0xff]  }
 0x241   :  { %6925 = vmatpush1.bf16.msra.mxu1 %v9856_v57  ;;  %6883 = vmatprep.subr.bf16.mxu0 %v9861_v58  ;;  %v9952_v57 = vld [vmem:[#allocation5 + $0x1120] ss:$8 sps:$4 sm:$0xff]   ;;  %v9957_v58 = vld [vmem:[#allocation5 + $0x1014] ss:$8 sps:$4 sm:$0xff]  }
 0x242   :  { %6926 = vmatprep.subr.bf16.mxu1 %v9864_v59  ;;  %v9960_v59 = vld [vmem:[#allocation5 + $0x1114] ss:$8 sps:$4 sm:$0xff]  }
 0x244   :  { %6884 = vmatpush1.bf16.msra.mxu0 %v9859_v60  ;;  %v9955_v60 = vld [vmem:[#allocation5 + $0x1010] ss:$8 sps:$4 sm:$0xff]  }
 0x245   :  { %6927 = vmatpush1.bf16.msra.mxu1 %v9862_v61  ;;  %6885 = vmatprep.subr.bf16.mxu0 %v9867_v62  ;;  %v9958_v61 = vld [vmem:[#allocation5 + $0x1110] ss:$8 sps:$4 sm:$0xff]   ;;  %v9963_v62 = vld [vmem:[#allocation5 + $0x1004] ss:$8 sps:$4 sm:$0xff]  }
 0x246   :  { %6928 = vmatprep.subr.bf16.mxu1 %v9870_v63  ;;  %v9966_v63 = vld [vmem:[#allocation5 + $0x1104] ss:$8 sps:$4 sm:$0xff]  }
 0x248   :  { %6886 = vmatpush2.bf16.msra.mxu0 %v9865_v0  ;;  %v9961_v0 = vld [vmem:[#allocation5 + $0x1000] ss:$8 sps:$4 sm:$0xff]  }
 0x249   :  { %6929 = vmatpush2.bf16.msra.mxu1 %v9868_v1  ;;  %6887 = vmatprep.subr.bf16.mxu0 %v9873_v2  ;;  %v9964_v1 = vld [vmem:[#allocation5 + $0x1100] ss:$8 sps:$4 sm:$0xff]   ;;  %v9969_v2 = vld [vmem:[#allocation5 + $0x10f4] ss:$8 sps:$4 sm:$0xff]  }
 0x24a   :  { %6930 = vmatprep.subr.bf16.mxu1 %v9876_v3  ;;  %v9972_v3 = vld [vmem:[#allocation5 + $0x11f4] ss:$8 sps:$4 sm:$0xff]  }
 0x24c   :  { %6888 = vmatpush2.bf16.msra.mxu0 %v9871_v4  ;;  %v9967_v4 = vld [vmem:[#allocation5 + $0x10f0] ss:$8 sps:$4 sm:$0xff]  }
 0x24d   :  { %6931 = vmatpush2.bf16.msra.mxu1 %v9874_v5  ;;  %6889 = vmatprep.subr.bf16.mxu0 %v9879_v6  ;;  %v9970_v5 = vld [vmem:[#allocation5 + $0x11f0] ss:$8 sps:$4 sm:$0xff]   ;;  %v9975_v6 = vld [vmem:[#allocation5 + $0x10e4] ss:$8 sps:$4 sm:$0xff]  }
 0x24e   :  { %6932 = vmatprep.subr.bf16.mxu1 %v9882_v7  ;;  %v9978_v7 = vld [vmem:[#allocation5 + $0x11e4] ss:$8 sps:$4 sm:$0xff]  }
 0x250   :  { %6890 = vmatpush2.bf16.msra.mxu0 %v9877_v8  ;;  %v9973_v8 = vld [vmem:[#allocation5 + $0x10e0] ss:$8 sps:$4 sm:$0xff]  }
 0x251   :  { %6933 = vmatpush2.bf16.msra.mxu1 %v9880_v9  ;;  %6891 = vmatprep.subr.bf16.mxu0 %v9885_v10  ;;  %v9976_v9 = vld [vmem:[#allocation5 + $0x11e0] ss:$8 sps:$4 sm:$0xff]   ;;  %v9981_v10 = vld [vmem:[#allocation5 + $0x10d4] ss:$8 sps:$4 sm:$0xff]  }
 0x252   :  { %6934 = vmatprep.subr.bf16.mxu1 %v9888_v11  ;;  %v9984_v11 = vld [vmem:[#allocation5 + $0x11d4] ss:$8 sps:$4 sm:$0xff]  }
 0x254   :  { %6892 = vmatpush2.bf16.msra.mxu0 %v9883_v12  ;;  %v9979_v12 = vld [vmem:[#allocation5 + $0x10d0] ss:$8 sps:$4 sm:$0xff]  }
 0x255   :  { %6935 = vmatpush2.bf16.msra.mxu1 %v9886_v13  ;;  %6893 = vmatprep.subr.bf16.mxu0 %v9891_v14  ;;  %v9982_v13 = vld [vmem:[#allocation5 + $0x11d0] ss:$8 sps:$4 sm:$0xff]   ;;  %v9987_v14 = vld [vmem:[#allocation5 + $0x10c4] ss:$8 sps:$4 sm:$0xff]  }
 0x256   :  { %6936 = vmatprep.subr.bf16.mxu1 %v9894_v15  ;;  %v9990_v15 = vld [vmem:[#allocation5 + $0x11c4] ss:$8 sps:$4 sm:$0xff]  }
 0x258   :  { %6894 = vmatpush2.bf16.msra.mxu0 %v9889_v16  ;;  %v9985_v16 = vld [vmem:[#allocation5 + $0x10c0] ss:$8 sps:$4 sm:$0xff]  }
 0x259   :  { %6937 = vmatpush2.bf16.msra.mxu1 %v9892_v17  ;;  %6895 = vmatprep.subr.bf16.mxu0 %v9897_v18  ;;  %v9988_v17 = vld [vmem:[#allocation5 + $0x11c0] ss:$8 sps:$4 sm:$0xff]   ;;  %v9993_v18 = vld [vmem:[#allocation5 + $0x10b4] ss:$8 sps:$4 sm:$0xff]  }
 0x25a   :  { %6938 = vmatprep.subr.bf16.mxu1 %v9900_v19  ;;  %v9996_v19 = vld [vmem:[#allocation5 + $0x11b4] ss:$8 sps:$4 sm:$0xff]  }
 0x25c   :  { %6896 = vmatpush2.bf16.msra.mxu0 %v9895_v20  ;;  %v9991_v20 = vld [vmem:[#allocation5 + $0x10b0] ss:$8 sps:$4 sm:$0xff]  }
 0x25d   :  { %6939 = vmatpush2.bf16.msra.mxu1 %v9898_v21  ;;  %6897 = vmatprep.subr.bf16.mxu0 %v9903_v22  ;;  %v9994_v21 = vld [vmem:[#allocation5 + $0x11b0] ss:$8 sps:$4 sm:$0xff]   ;;  %v9999_v22 = vld [vmem:[#allocation5 + $0x10a4] ss:$8 sps:$4 sm:$0xff]  }
 0x25e   :  { %6940 = vmatprep.subr.bf16.mxu1 %v9906_v23  ;;  %v10002_v23 = vld [vmem:[#allocation5 + $0x11a4] ss:$8 sps:$4 sm:$0xff]  }
 0x260   :  { %6898 = vmatpush2.bf16.msra.mxu0 %v9901_v24  ;;  %v9997_v24 = vld [vmem:[#allocation5 + $0x10a0] ss:$8 sps:$4 sm:$0xff]  }
 0x261   :  { %6941 = vmatpush2.bf16.msra.mxu1 %v9904_v25  ;;  %6899 = vmatprep.subr.bf16.mxu0 %v9909_v26  ;;  %v10000_v25 = vld [vmem:[#allocation5 + $0x11a0] ss:$8 sps:$4 sm:$0xff]   ;;  %v10005_v26 = vld [vmem:[#allocation5 + $0x1094] ss:$8 sps:$4 sm:$0xff]  }
 0x262   :  { %6942 = vmatprep.subr.bf16.mxu1 %v9912_v27  ;;  %v10008_v27 = vld [vmem:[#allocation5 + $0x1194] ss:$8 sps:$4 sm:$0xff]  }
 0x264   :  { %6900 = vmatpush2.bf16.msra.mxu0 %v9907_v28  ;;  %v10003_v28 = vld [vmem:[#allocation5 + $0x1090] ss:$8 sps:$4 sm:$0xff]  }
 0x265   :  { %6943 = vmatpush2.bf16.msra.mxu1 %v9910_v29  ;;  %6955 = vmatprep.subr.bf16.mxu0 %v9921_v32  ;;  %v10006_v29 = vld [vmem:[#allocation5 + $0x1190] ss:$8 sps:$4 sm:$0xff]   ;;  %v10009_v32 = vld [vmem:[#allocation5 + $0x1080] ss:$8 sps:$4 sm:$0xff]  }
 0x266   :  { %6998 = vmatprep.subr.bf16.mxu1 %v9924_v33  ;;  %v10012_v33 = vld [vmem:[#allocation5 + $0x1180] ss:$8 sps:$4 sm:$0xff]  }
 0x267   :  { %6902 = vmatmul.mubr.bf16.vlgmr.msra.gmra.mxu0 %v9913_v30  ;;  %v10011_v30 = vld [vmem:[#allocation5 + $0x1084] ss:$8 sps:$4 sm:$0xff]  }
 0x268   :  { %6945 = vmatmul.mubr.bf16.vlgmr.msra.gmra.mxu1 %v9916_v31  ;;  %6956 = vmatpush1.bf16.msra.mxu0 %v9919_v34  ;;  %v10014_v31 = vld [vmem:[#allocation5 + $0x1184] ss:$8 sps:$4 sm:$0xff]   ;;  %v10015_v34 = vld [vmem:[#allocation2 + $0x80] ss:$240 sps:$4 sm:$0xff]  }
 0x269   :  { %6999 = vmatpush1.bf16.msra.mxu1 %v9922_v35  ;;  %6957 = vmatprep.subr.bf16.mxu0 %v9927_v36  ;;  %v10018_v35 = vld [vmem:[#allocation2 + $0x88] ss:$240 sps:$4 sm:$0xff]   ;;  %v10023_v36 = vld [vmem:[#allocation5 + $0x1274] ss:$8 sps:$4 sm:$0xff]  }
 0x26a   :  { %7000 = vmatprep.subr.bf16.mxu1 %v9930_v37  ;;  %6987 = vmatprep.mubr.bf16.mxu0 %v10017_v40  ;;  %v10026_v37 = vld [vmem:[#allocation5 + $0x1374] ss:$8 sps:$4 sm:$0xff]   ;;  %v10029_v40 = vld [vmem:[#allocation5 + $0x1264] ss:$8 sps:$4 sm:$0xff]  }
 0x26b   :  { %7030 = vmatprep.mubr.bf16.mxu1 %v10020_v41  ;;  %v10032_v41 = vld [vmem:[#allocation5 + $0x1364] ss:$8 sps:$4 sm:$0xff]  }
 0x26c   :  { %6958 = vmatpush1.bf16.msra.mxu0 %v9925_v38  ;;  %v10021_v38 = vld [vmem:[#allocation5 + $0x1270] ss:$8 sps:$4 sm:$0xff]  }
 0x26d   :  { %7001 = vmatpush1.bf16.msra.mxu1 %v9928_v39  ;;  %6959 = vmatprep.subr.bf16.mxu0 %v9933_v42  ;;  %v10024_v39 = vld [vmem:[#allocation5 + $0x1370] ss:$8 sps:$4 sm:$0xff]   ;;  %v10027_v42 = vld [vmem:[#allocation5 + $0x1260] ss:$8 sps:$4 sm:$0xff]  }
 0x26e   :  { %7002 = vmatprep.subr.bf16.mxu1 %v9936_v43  ;;  %v10030_v43 = vld [vmem:[#allocation5 + $0x1360] ss:$8 sps:$4 sm:$0xff]  }
 0x270   :  { %6960 = vmatpush1.bf16.msra.mxu0 %v9931_v44  ;;  %v10119_v44 = vld [vmem:[#allocation2 + $0x94] ss:$240 sps:$4 sm:$0xff]  }
 0x271   :  { %7003 = vmatpush1.bf16.msra.mxu1 %v9934_v45  ;;  %6961 = vmatprep.subr.bf16.mxu0 %v9939_v46  ;;  %v10122_v45 = vld [vmem:[#allocation2 + $0x9c] ss:$240 sps:$4 sm:$0xff]  }
 0x272   :  { %7004 = vmatprep.subr.bf16.mxu1 %v9942_v47  ;;  %v10035_v46 = vld [vmem:[#allocation5 + $0x1254] ss:$8 sps:$4 sm:$0xff]  }
 0x273   :  { %v10038_v47 = vld [vmem:[#allocation5 + $0x1354] ss:$8 sps:$4 sm:$0xff]  }
 0x274   :  { %6962 = vmatpush1.bf16.msra.mxu0 %v9937_v48  ;;  %v10033_v48 = vld [vmem:[#allocation5 + $0x1250] ss:$8 sps:$4 sm:$0xff]  }
 0x275   :  { %7005 = vmatpush1.bf16.msra.mxu1 %v9940_v49  ;;  %6963 = vmatprep.subr.bf16.mxu0 %v9945_v50  ;;  %v10036_v49 = vld [vmem:[#allocation5 + $0x1350] ss:$8 sps:$4 sm:$0xff]   ;;  %v10041_v50 = vld [vmem:[#allocation5 + $0x1244] ss:$8 sps:$4 sm:$0xff]  }
 0x276   :  { %7006 = vmatprep.subr.bf16.mxu1 %v9948_v51  ;;  %v10044_v51 = vld [vmem:[#allocation5 + $0x1344] ss:$8 sps:$4 sm:$0xff]  }
 0x278   :  { %6964 = vmatpush1.bf16.msra.mxu0 %v9943_v52  ;;  %v10039_v52 = vld [vmem:[#allocation5 + $0x1240] ss:$8 sps:$4 sm:$0xff]  }
 0x279   :  { %7007 = vmatpush1.bf16.msra.mxu1 %v9946_v53  ;;  %6965 = vmatprep.subr.bf16.mxu0 %v9951_v54  ;;  %v10042_v53 = vld [vmem:[#allocation5 + $0x1340] ss:$8 sps:$4 sm:$0xff]   ;;  %v10047_v54 = vld [vmem:[#allocation5 + $0x1234] ss:$8 sps:$4 sm:$0xff]  }
 0x27a   :  { %7008 = vmatprep.subr.bf16.mxu1 %v9954_v55  ;;  %v10050_v55 = vld [vmem:[#allocation5 + $0x1334] ss:$8 sps:$4 sm:$0xff]  }
 0x27c   :  { %6966 = vmatpush1.bf16.msra.mxu0 %v9949_v56  ;;  %v10045_v56 = vld [vmem:[#allocation5 + $0x1230] ss:$8 sps:$4 sm:$0xff]  }
 0x27d   :  { %7009 = vmatpush1.bf16.msra.mxu1 %v9952_v57  ;;  %6967 = vmatprep.subr.bf16.mxu0 %v9957_v58  ;;  %v10048_v57 = vld [vmem:[#allocation5 + $0x1330] ss:$8 sps:$4 sm:$0xff]   ;;  %v10053_v58 = vld [vmem:[#allocation5 + $0x1224] ss:$8 sps:$4 sm:$0xff]  }
 0x27e   :  { %7010 = vmatprep.subr.bf16.mxu1 %v9960_v59  ;;  %v10056_v59 = vld [vmem:[#allocation5 + $0x1324] ss:$8 sps:$4 sm:$0xff]  }
 0x280   :  { %6968 = vmatpush1.bf16.msra.mxu0 %v9955_v60  ;;  %v10051_v60 = vld [vmem:[#allocation5 + $0x1220] ss:$8 sps:$4 sm:$0xff]  }
 0x281   :  { %7011 = vmatpush1.bf16.msra.mxu1 %v9958_v61  ;;  %6969 = vmatprep.subr.bf16.mxu0 %v9963_v62  ;;  %v10054_v61 = vld [vmem:[#allocation5 + $0x1320] ss:$8 sps:$4 sm:$0xff]   ;;  %v10059_v62 = vld [vmem:[#allocation5 + $0x1214] ss:$8 sps:$4 sm:$0xff]  }
 0x282   :  { %7012 = vmatprep.subr.bf16.mxu1 %v9966_v63  ;;  %v10062_v63 = vld [vmem:[#allocation5 + $0x1314] ss:$8 sps:$4 sm:$0xff]  }
 0x284   :  { %6970 = vmatpush1.bf16.msra.mxu0 %v9961_v0  ;;  %v10057_v0 = vld [vmem:[#allocation5 + $0x1210] ss:$8 sps:$4 sm:$0xff]  }
 0x285   :  { %7013 = vmatpush1.bf16.msra.mxu1 %v9964_v1  ;;  %6971 = vmatprep.subr.bf16.mxu0 %v9969_v2  ;;  %v10060_v1 = vld [vmem:[#allocation5 + $0x1310] ss:$8 sps:$4 sm:$0xff]   ;;  %v10065_v2 = vld [vmem:[#allocation5 + $0x1204] ss:$8 sps:$4 sm:$0xff]  }
 0x286   :  { %7014 = vmatprep.subr.bf16.mxu1 %v9972_v3  ;;  %v10068_v3 = vld [vmem:[#allocation5 + $0x1304] ss:$8 sps:$4 sm:$0xff]  }
 0x288   :  { %6972 = vmatpush2.bf16.msra.mxu0 %v9967_v4  ;;  %v10063_v4 = vld [vmem:[#allocation5 + $0x1200] ss:$8 sps:$4 sm:$0xff]  }
 0x289   :  { %7015 = vmatpush2.bf16.msra.mxu1 %v9970_v5  ;;  %6973 = vmatprep.subr.bf16.mxu0 %v9975_v6  ;;  %v10066_v5 = vld [vmem:[#allocation5 + $0x1300] ss:$8 sps:$4 sm:$0xff]   ;;  %v10071_v6 = vld [vmem:[#allocation5 + $0x12f4] ss:$8 sps:$4 sm:$0xff]  }
 0x28a   :  { %7016 = vmatprep.subr.bf16.mxu1 %v9978_v7  ;;  %v10074_v7 = vld [vmem:[#allocation5 + $0x13f4] ss:$8 sps:$4 sm:$0xff]  }
 0x28c   :  { %6974 = vmatpush2.bf16.msra.mxu0 %v9973_v8  ;;  %v10069_v8 = vld [vmem:[#allocation5 + $0x12f0] ss:$8 sps:$4 sm:$0xff]  }
 0x28d   :  { %7017 = vmatpush2.bf16.msra.mxu1 %v9976_v9  ;;  %6975 = vmatprep.subr.bf16.mxu0 %v9981_v10  ;;  %v10072_v9 = vld [vmem:[#allocation5 + $0x13f0] ss:$8 sps:$4 sm:$0xff]   ;;  %v10077_v10 = vld [vmem:[#allocation5 + $0x12e4] ss:$8 sps:$4 sm:$0xff]  }
 0x28e   :  { %7018 = vmatprep.subr.bf16.mxu1 %v9984_v11  ;;  %v10080_v11 = vld [vmem:[#allocation5 + $0x13e4] ss:$8 sps:$4 sm:$0xff]  }
 0x290   :  { %6976 = vmatpush2.bf16.msra.mxu0 %v9979_v12  ;;  %v10075_v12 = vld [vmem:[#allocation5 + $0x12e0] ss:$8 sps:$4 sm:$0xff]  }
 0x291   :  { %7019 = vmatpush2.bf16.msra.mxu1 %v9982_v13  ;;  %6977 = vmatprep.subr.bf16.mxu0 %v9987_v14  ;;  %v10078_v13 = vld [vmem:[#allocation5 + $0x13e0] ss:$8 sps:$4 sm:$0xff]   ;;  %v10083_v14 = vld [vmem:[#allocation5 + $0x12d4] ss:$8 sps:$4 sm:$0xff]  }
 0x292   :  { %7020 = vmatprep.subr.bf16.mxu1 %v9990_v15  ;;  %v10086_v15 = vld [vmem:[#allocation5 + $0x13d4] ss:$8 sps:$4 sm:$0xff]  }
 0x294   :  { %6978 = vmatpush2.bf16.msra.mxu0 %v9985_v16  ;;  %v10081_v16 = vld [vmem:[#allocation5 + $0x12d0] ss:$8 sps:$4 sm:$0xff]  }
 0x295   :  { %7021 = vmatpush2.bf16.msra.mxu1 %v9988_v17  ;;  %6979 = vmatprep.subr.bf16.mxu0 %v9993_v18  ;;  %v10084_v17 = vld [vmem:[#allocation5 + $0x13d0] ss:$8 sps:$4 sm:$0xff]   ;;  %v10089_v18 = vld [vmem:[#allocation5 + $0x12c4] ss:$8 sps:$4 sm:$0xff]  }
 0x296   :  { %7022 = vmatprep.subr.bf16.mxu1 %v9996_v19  ;;  %v10092_v19 = vld [vmem:[#allocation5 + $0x13c4] ss:$8 sps:$4 sm:$0xff]  }
 0x298   :  { %6980 = vmatpush2.bf16.msra.mxu0 %v9991_v20  ;;  %v10087_v20 = vld [vmem:[#allocation5 + $0x12c0] ss:$8 sps:$4 sm:$0xff]  }
 0x299   :  { %7023 = vmatpush2.bf16.msra.mxu1 %v9994_v21  ;;  %6981 = vmatprep.subr.bf16.mxu0 %v9999_v22  ;;  %v10090_v21 = vld [vmem:[#allocation5 + $0x13c0] ss:$8 sps:$4 sm:$0xff]   ;;  %v10095_v22 = vld [vmem:[#allocation5 + $0x12b4] ss:$8 sps:$4 sm:$0xff]  }
 0x29a   :  { %7024 = vmatprep.subr.bf16.mxu1 %v10002_v23  ;;  %v10098_v23 = vld [vmem:[#allocation5 + $0x13b4] ss:$8 sps:$4 sm:$0xff]  }
 0x29c   :  { %6982 = vmatpush2.bf16.msra.mxu0 %v9997_v24  ;;  %v10093_v24 = vld [vmem:[#allocation5 + $0x12b0] ss:$8 sps:$4 sm:$0xff]  }
 0x29d   :  { %7025 = vmatpush2.bf16.msra.mxu1 %v10000_v25  ;;  %6983 = vmatprep.subr.bf16.mxu0 %v10005_v26  ;;  %v10096_v25 = vld [vmem:[#allocation5 + $0x13b0] ss:$8 sps:$4 sm:$0xff]   ;;  %v10101_v26 = vld [vmem:[#allocation5 + $0x12a4] ss:$8 sps:$4 sm:$0xff]  }
 0x29e   :  { %7026 = vmatprep.subr.bf16.mxu1 %v10008_v27  ;;  %v10104_v27 = vld [vmem:[#allocation5 + $0x13a4] ss:$8 sps:$4 sm:$0xff]  }
 0x2a0   :  { %6984 = vmatpush2.bf16.msra.mxu0 %v10003_v28  ;;  %v10099_v28 = vld [vmem:[#allocation5 + $0x12a0] ss:$8 sps:$4 sm:$0xff]  }
 0x2a1   :  { %7027 = vmatpush2.bf16.msra.mxu1 %v10006_v29  ;;  %6985 = vmatprep.subr.bf16.mxu0 %v10011_v30  ;;  %v10102_v29 = vld [vmem:[#allocation5 + $0x13a0] ss:$8 sps:$4 sm:$0xff]   ;;  %v10107_v30 = vld [vmem:[#allocation5 + $0x1294] ss:$8 sps:$4 sm:$0xff]  }
 0x2a2   :  { %7028 = vmatprep.subr.bf16.mxu1 %v10014_v31  ;;  %v10110_v31 = vld [vmem:[#allocation5 + $0x1394] ss:$8 sps:$4 sm:$0xff]  }
 0x2a4   :  { %6986 = vmatpush2.bf16.msra.mxu0 %v10009_v32  ;;  %v10105_v32 = vld [vmem:[#allocation5 + $0x1290] ss:$8 sps:$4 sm:$0xff]  }
 0x2a5   :  { %7029 = vmatpush2.bf16.msra.mxu1 %v10012_v33  ;;  %7041 = vmatprep.subr.bf16.mxu0 %v10023_v36  ;;  %v10108_v33 = vld [vmem:[#allocation5 + $0x1390] ss:$8 sps:$4 sm:$0xff]   ;;  %v10111_v36 = vld [vmem:[#allocation5 + $0x1280] ss:$8 sps:$4 sm:$0xff]  }
 0x2a6   :  { %7084 = vmatprep.subr.bf16.mxu1 %v10026_v37  ;;  %v10114_v37 = vld [vmem:[#allocation5 + $0x1380] ss:$8 sps:$4 sm:$0xff]  }
 0x2a7   :  { %6988 = vmatmul.mubr.bf16.vlgmr.msra.gmra.mxu0 %v10015_v34  ;;  %v10113_v34 = vld [vmem:[#allocation5 + $0x1284] ss:$8 sps:$4 sm:$0xff]  }
 0x2a8   :  { %7031 = vmatmul.mubr.bf16.vlgmr.msra.gmra.mxu1 %v10018_v35  ;;  %7042 = vmatpush1.bf16.msra.mxu0 %v10021_v38  ;;  %v10116_v35 = vld [vmem:[#allocation5 + $0x1384] ss:$8 sps:$4 sm:$0xff]   ;;  %v10125_v38 = vld [vmem:[#allocation5 + $0x1474] ss:$8 sps:$4 sm:$0xff]  }
 0x2a9   :  { %7085 = vmatpush1.bf16.msra.mxu1 %v10024_v39  ;;  %7043 = vmatprep.subr.bf16.mxu0 %v10029_v40  ;;  %v10128_v39 = vld [vmem:[#allocation5 + $0x1574] ss:$8 sps:$4 sm:$0xff]   ;;  %v10117_v40 = vld [vmem:[#allocation2 + $0x90] ss:$240 sps:$4 sm:$0xff]  }
 0x2aa   :  { %7086 = vmatprep.subr.bf16.mxu1 %v10032_v41  ;;  %7073 = vmatprep.mubr.bf16.mxu0 %v10119_v44  ;;  %v10120_v41 = vld [vmem:[#allocation2 + $0x98] ss:$240 sps:$4 sm:$0xff]   ;;  %v10131_v44 = vld [vmem:[#allocation5 + $0x1464] ss:$8 sps:$4 sm:$0xff]  }
 0x2ab   :  { %7116 = vmatprep.mubr.bf16.mxu1 %v10122_v45  ;;  %v10134_v45 = vld [vmem:[#allocation5 + $0x1564] ss:$8 sps:$4 sm:$0xff]  }
 0x2ac   :  { %7044 = vmatpush1.bf16.msra.mxu0 %v10027_v42  ;;  %v10123_v42 = vld [vmem:[#allocation5 + $0x1470] ss:$8 sps:$4 sm:$0xff]  }
 0x2ad   :  { %7087 = vmatpush1.bf16.msra.mxu1 %v10030_v43  ;;  %7045 = vmatprep.subr.bf16.mxu0 %v10035_v46  ;;  %v10126_v43 = vld [vmem:[#allocation5 + $0x1570] ss:$8 sps:$4 sm:$0xff]   ;;  %v10221_v46 = vld [vmem:[#allocation2 + $0xa4] ss:$240 sps:$4 sm:$0xff]  }
 0x2ae   :  { %7088 = vmatprep.subr.bf16.mxu1 %v10038_v47  ;;  %v10224_v47 = vld [vmem:[#allocation2 + $0xac] ss:$240 sps:$4 sm:$0xff]  }
 0x2b0   :  { %7046 = vmatpush1.bf16.msra.mxu0 %v10033_v48  ;;  %v10129_v48 = vld [vmem:[#allocation5 + $0x1460] ss:$8 sps:$4 sm:$0xff]  }
 0x2b1   :  { %7089 = vmatpush1.bf16.msra.mxu1 %v10036_v49  ;;  %7047 = vmatprep.subr.bf16.mxu0 %v10041_v50  ;;  %v10132_v49 = vld [vmem:[#allocation5 + $0x1560] ss:$8 sps:$4 sm:$0xff]   ;;  %v10137_v50 = vld [vmem:[#allocation5 + $0x1454] ss:$8 sps:$4 sm:$0xff]  }
 0x2b2   :  { %7090 = vmatprep.subr.bf16.mxu1 %v10044_v51  ;;  %v10140_v51 = vld [vmem:[#allocation5 + $0x1554] ss:$8 sps:$4 sm:$0xff]  }
 0x2b4   :  { %7048 = vmatpush1.bf16.msra.mxu0 %v10039_v52  ;;  %v10135_v52 = vld [vmem:[#allocation5 + $0x1450] ss:$8 sps:$4 sm:$0xff]  }
 0x2b5   :  { %7091 = vmatpush1.bf16.msra.mxu1 %v10042_v53  ;;  %7049 = vmatprep.subr.bf16.mxu0 %v10047_v54  ;;  %v10138_v53 = vld [vmem:[#allocation5 + $0x1550] ss:$8 sps:$4 sm:$0xff]   ;;  %v10143_v54 = vld [vmem:[#allocation5 + $0x1444] ss:$8 sps:$4 sm:$0xff]  }
 0x2b6   :  { %7092 = vmatprep.subr.bf16.mxu1 %v10050_v55  ;;  %v10146_v55 = vld [vmem:[#allocation5 + $0x1544] ss:$8 sps:$4 sm:$0xff]  }
 0x2b8   :  { %7050 = vmatpush1.bf16.msra.mxu0 %v10045_v56  ;;  %v10141_v56 = vld [vmem:[#allocation5 + $0x1440] ss:$8 sps:$4 sm:$0xff]  }
 0x2b9   :  { %7093 = vmatpush1.bf16.msra.mxu1 %v10048_v57  ;;  %7051 = vmatprep.subr.bf16.mxu0 %v10053_v58  ;;  %v10144_v57 = vld [vmem:[#allocation5 + $0x1540] ss:$8 sps:$4 sm:$0xff]   ;;  %v10149_v58 = vld [vmem:[#allocation5 + $0x1434] ss:$8 sps:$4 sm:$0xff]  }
 0x2ba   :  { %7094 = vmatprep.subr.bf16.mxu1 %v10056_v59  ;;  %v10152_v59 = vld [vmem:[#allocation5 + $0x1534] ss:$8 sps:$4 sm:$0xff]  }
 0x2bc   :  { %7052 = vmatpush1.bf16.msra.mxu0 %v10051_v60  ;;  %v10147_v60 = vld [vmem:[#allocation5 + $0x1430] ss:$8 sps:$4 sm:$0xff]  }
 0x2bd   :  { %7095 = vmatpush1.bf16.msra.mxu1 %v10054_v61  ;;  %7053 = vmatprep.subr.bf16.mxu0 %v10059_v62  ;;  %v10150_v61 = vld [vmem:[#allocation5 + $0x1530] ss:$8 sps:$4 sm:$0xff]   ;;  %v10155_v62 = vld [vmem:[#allocation5 + $0x1424] ss:$8 sps:$4 sm:$0xff]  }
 0x2be   :  { %7096 = vmatprep.subr.bf16.mxu1 %v10062_v63  ;;  %v10158_v63 = vld [vmem:[#allocation5 + $0x1524] ss:$8 sps:$4 sm:$0xff]  }
 0x2c0   :  { %7054 = vmatpush1.bf16.msra.mxu0 %v10057_v0  ;;  %v10153_v0 = vld [vmem:[#allocation5 + $0x1420] ss:$8 sps:$4 sm:$0xff]  }
 0x2c1   :  { %7097 = vmatpush1.bf16.msra.mxu1 %v10060_v1  ;;  %7055 = vmatprep.subr.bf16.mxu0 %v10065_v2  ;;  %v10156_v1 = vld [vmem:[#allocation5 + $0x1520] ss:$8 sps:$4 sm:$0xff]   ;;  %v10161_v2 = vld [vmem:[#allocation5 + $0x1414] ss:$8 sps:$4 sm:$0xff]  }
 0x2c2   :  { %7098 = vmatprep.subr.bf16.mxu1 %v10068_v3  ;;  %v10164_v3 = vld [vmem:[#allocation5 + $0x1514] ss:$8 sps:$4 sm:$0xff]  }
 0x2c4   :  { %7056 = vmatpush1.bf16.msra.mxu0 %v10063_v4  ;;  %v10159_v4 = vld [vmem:[#allocation5 + $0x1410] ss:$8 sps:$4 sm:$0xff]  }
 0x2c5   :  { %7099 = vmatpush1.bf16.msra.mxu1 %v10066_v5  ;;  %7057 = vmatprep.subr.bf16.mxu0 %v10071_v6  ;;  %v10162_v5 = vld [vmem:[#allocation5 + $0x1510] ss:$8 sps:$4 sm:$0xff]   ;;  %v10167_v6 = vld [vmem:[#allocation5 + $0x1404] ss:$8 sps:$4 sm:$0xff]  }
 0x2c6   :  { %7100 = vmatprep.subr.bf16.mxu1 %v10074_v7  ;;  %v10170_v7 = vld [vmem:[#allocation5 + $0x1504] ss:$8 sps:$4 sm:$0xff]  }
 0x2c8   :  { %7058 = vmatpush2.bf16.msra.mxu0 %v10069_v8  ;;  %v10165_v8 = vld [vmem:[#allocation5 + $0x1400] ss:$8 sps:$4 sm:$0xff]  }
 0x2c9   :  { %7101 = vmatpush2.bf16.msra.mxu1 %v10072_v9  ;;  %7059 = vmatprep.subr.bf16.mxu0 %v10077_v10  ;;  %v10168_v9 = vld [vmem:[#allocation5 + $0x1500] ss:$8 sps:$4 sm:$0xff]   ;;  %v10173_v10 = vld [vmem:[#allocation5 + $0x14f4] ss:$8 sps:$4 sm:$0xff]  }
 0x2ca   :  { %7102 = vmatprep.subr.bf16.mxu1 %v10080_v11  ;;  %v10176_v11 = vld [vmem:[#allocation5 + $0x15f4] ss:$8 sps:$4 sm:$0xff]  }
 0x2cc   :  { %7060 = vmatpush2.bf16.msra.mxu0 %v10075_v12  ;;  %v10171_v12 = vld [vmem:[#allocation5 + $0x14f0] ss:$8 sps:$4 sm:$0xff]  }
 0x2cd   :  { %7103 = vmatpush2.bf16.msra.mxu1 %v10078_v13  ;;  %7061 = vmatprep.subr.bf16.mxu0 %v10083_v14  ;;  %v10174_v13 = vld [vmem:[#allocation5 + $0x15f0] ss:$8 sps:$4 sm:$0xff]   ;;  %v10179_v14 = vld [vmem:[#allocation5 + $0x14e4] ss:$8 sps:$4 sm:$0xff]  }
 0x2ce   :  { %7104 = vmatprep.subr.bf16.mxu1 %v10086_v15  ;;  %v10182_v15 = vld [vmem:[#allocation5 + $0x15e4] ss:$8 sps:$4 sm:$0xff]  }
 0x2d0   :  { %7062 = vmatpush2.bf16.msra.mxu0 %v10081_v16  ;;  %v10177_v16 = vld [vmem:[#allocation5 + $0x14e0] ss:$8 sps:$4 sm:$0xff]  }
 0x2d1   :  { %7105 = vmatpush2.bf16.msra.mxu1 %v10084_v17  ;;  %7063 = vmatprep.subr.bf16.mxu0 %v10089_v18  ;;  %v10180_v17 = vld [vmem:[#allocation5 + $0x15e0] ss:$8 sps:$4 sm:$0xff]   ;;  %v10185_v18 = vld [vmem:[#allocation5 + $0x14d4] ss:$8 sps:$4 sm:$0xff]  }
 0x2d2   :  { %7106 = vmatprep.subr.bf16.mxu1 %v10092_v19  ;;  %v10188_v19 = vld [vmem:[#allocation5 + $0x15d4] ss:$8 sps:$4 sm:$0xff]  }
 0x2d4   :  { %7064 = vmatpush2.bf16.msra.mxu0 %v10087_v20  ;;  %v10183_v20 = vld [vmem:[#allocation5 + $0x14d0] ss:$8 sps:$4 sm:$0xff]  }
 0x2d5   :  { %7107 = vmatpush2.bf16.msra.mxu1 %v10090_v21  ;;  %7065 = vmatprep.subr.bf16.mxu0 %v10095_v22  ;;  %v10186_v21 = vld [vmem:[#allocation5 + $0x15d0] ss:$8 sps:$4 sm:$0xff]   ;;  %v10191_v22 = vld [vmem:[#allocation5 + $0x14c4] ss:$8 sps:$4 sm:$0xff]  }
 0x2d6   :  { %7108 = vmatprep.subr.bf16.mxu1 %v10098_v23  ;;  %v10194_v23 = vld [vmem:[#allocation5 + $0x15c4] ss:$8 sps:$4 sm:$0xff]  }
 0x2d8   :  { %7066 = vmatpush2.bf16.msra.mxu0 %v10093_v24  ;;  %v10189_v24 = vld [vmem:[#allocation5 + $0x14c0] ss:$8 sps:$4 sm:$0xff]  }
 0x2d9   :  { %7109 = vmatpush2.bf16.msra.mxu1 %v10096_v25  ;;  %7067 = vmatprep.subr.bf16.mxu0 %v10101_v26  ;;  %v10192_v25 = vld [vmem:[#allocation5 + $0x15c0] ss:$8 sps:$4 sm:$0xff]   ;;  %v10197_v26 = vld [vmem:[#allocation5 + $0x14b4] ss:$8 sps:$4 sm:$0xff]  }
 0x2da   :  { %7110 = vmatprep.subr.bf16.mxu1 %v10104_v27  ;;  %v10200_v27 = vld [vmem:[#allocation5 + $0x15b4] ss:$8 sps:$4 sm:$0xff]  }
 0x2dc   :  { %7068 = vmatpush2.bf16.msra.mxu0 %v10099_v28  ;;  %v10195_v28 = vld [vmem:[#allocation5 + $0x14b0] ss:$8 sps:$4 sm:$0xff]  }
 0x2dd   :  { %7111 = vmatpush2.bf16.msra.mxu1 %v10102_v29  ;;  %7069 = vmatprep.subr.bf16.mxu0 %v10107_v30  ;;  %v10198_v29 = vld [vmem:[#allocation5 + $0x15b0] ss:$8 sps:$4 sm:$0xff]   ;;  %v10203_v30 = vld [vmem:[#allocation5 + $0x14a4] ss:$8 sps:$4 sm:$0xff]  }
 0x2de   :  { %7112 = vmatprep.subr.bf16.mxu1 %v10110_v31  ;;  %v10206_v31 = vld [vmem:[#allocation5 + $0x15a4] ss:$8 sps:$4 sm:$0xff]  }
 0x2e0   :  { %7070 = vmatpush2.bf16.msra.mxu0 %v10105_v32  ;;  %v10201_v32 = vld [vmem:[#allocation5 + $0x14a0] ss:$8 sps:$4 sm:$0xff]  }
 0x2e1   :  { %7113 = vmatpush2.bf16.msra.mxu1 %v10108_v33  ;;  %7071 = vmatprep.subr.bf16.mxu0 %v10113_v34  ;;  %v10204_v33 = vld [vmem:[#allocation5 + $0x15a0] ss:$8 sps:$4 sm:$0xff]   ;;  %v10209_v34 = vld [vmem:[#allocation5 + $0x1494] ss:$8 sps:$4 sm:$0xff]  }
 0x2e2   :  { %7114 = vmatprep.subr.bf16.mxu1 %v10116_v35  ;;  %v10212_v35 = vld [vmem:[#allocation5 + $0x1594] ss:$8 sps:$4 sm:$0xff]  }
 0x2e4   :  { %7072 = vmatpush2.bf16.msra.mxu0 %v10111_v36  ;;  %v10207_v36 = vld [vmem:[#allocation5 + $0x1490] ss:$8 sps:$4 sm:$0xff]  }
 0x2e5   :  { %7115 = vmatpush2.bf16.msra.mxu1 %v10114_v37  ;;  %7127 = vmatprep.subr.bf16.mxu0 %v10125_v38  ;;  %v10210_v37 = vld [vmem:[#allocation5 + $0x1590] ss:$8 sps:$4 sm:$0xff]   ;;  %v10215_v38 = vld [vmem:[#allocation5 + $0x1484] ss:$8 sps:$4 sm:$0xff]  }
 0x2e6   :  { %7170 = vmatprep.subr.bf16.mxu1 %v10128_v39  ;;  %v10218_v39 = vld [vmem:[#allocation5 + $0x1584] ss:$8 sps:$4 sm:$0xff]  }
 0x2e7   :  { %7074 = vmatmul.mubr.bf16.vlgmr.msra.gmra.mxu0 %v10117_v40  ;;  %v10213_v40 = vld [vmem:[#allocation5 + $0x1480] ss:$8 sps:$4 sm:$0xff]  }
 0x2e8   :  { %7117 = vmatmul.mubr.bf16.vlgmr.msra.gmra.mxu1 %v10120_v41  ;;  %7128 = vmatpush1.bf16.msra.mxu0 %v10123_v42  ;;  %v10216_v41 = vld [vmem:[#allocation5 + $0x1580] ss:$8 sps:$4 sm:$0xff]   ;;  %v10227_v42 = vld [vmem:[#allocation5 + $0x1674] ss:$8 sps:$4 sm:$0xff]  }
 0x2e9   :  { %7171 = vmatpush1.bf16.msra.mxu1 %v10126_v43  ;;  %7129 = vmatprep.subr.bf16.mxu0 %v10131_v44  ;;  %v10230_v43 = vld [vmem:[#allocation5 + $0x1774] ss:$8 sps:$4 sm:$0xff]   ;;  %v10219_v44 = vld [vmem:[#allocation2 + $0xa0] ss:$240 sps:$4 sm:$0xff]  }
 0x2ea   :  { %7172 = vmatprep.subr.bf16.mxu1 %v10134_v45  ;;  %7159 = vmatprep.mubr.bf16.mxu0 %v10221_v46  ;;  %v10222_v45 = vld [vmem:[#allocation2 + $0xa8] ss:$240 sps:$4 sm:$0xff]  }
 0x2eb   :  { %7202 = vmatprep.mubr.bf16.mxu1 %v10224_v47  ;;  %v10225_v46 = vld [vmem:[#allocation5 + $0x1670] ss:$8 sps:$4 sm:$0xff]  }
 0x2ec   :  { %7130 = vmatpush1.bf16.msra.mxu0 %v10129_v48  ;;  %v10228_v47 = vld [vmem:[#allocation5 + $0x1770] ss:$8 sps:$4 sm:$0xff]   ;;  %v10233_v48 = vld [vmem:[#allocation5 + $0x1664] ss:$8 sps:$4 sm:$0xff]  }
 0x2ed   :  { %7173 = vmatpush1.bf16.msra.mxu1 %v10132_v49  ;;  %7131 = vmatprep.subr.bf16.mxu0 %v10137_v50  ;;  %v10236_v49 = vld [vmem:[#allocation5 + $0x1764] ss:$8 sps:$4 sm:$0xff]  }
 0x2ee   :  { %7174 = vmatprep.subr.bf16.mxu1 %v10140_v51  ;;  %v10323_v50 = vld [vmem:[#allocation2 + $0xb4] ss:$240 sps:$4 sm:$0xff]   ;;  %v10326_v51 = vld [vmem:[#allocation2 + $0xbc] ss:$240 sps:$4 sm:$0xff]  }
 0x2f0   :  { %7132 = vmatpush1.bf16.msra.mxu0 %v10135_v52  ;;  %v10231_v52 = vld [vmem:[#allocation5 + $0x1660] ss:$8 sps:$4 sm:$0xff]  }
 0x2f1   :  { %7175 = vmatpush1.bf16.msra.mxu1 %v10138_v53  ;;  %7133 = vmatprep.subr.bf16.mxu0 %v10143_v54  ;;  %v10234_v53 = vld [vmem:[#allocation5 + $0x1760] ss:$8 sps:$4 sm:$0xff]   ;;  %v10239_v54 = vld [vmem:[#allocation5 + $0x1654] ss:$8 sps:$4 sm:$0xff]  }
 0x2f2   :  { %7176 = vmatprep.subr.bf16.mxu1 %v10146_v55  ;;  %v10242_v55 = vld [vmem:[#allocation5 + $0x1754] ss:$8 sps:$4 sm:$0xff]  }
 0x2f4   :  { %7134 = vmatpush1.bf16.msra.mxu0 %v10141_v56  ;;  %v10237_v56 = vld [vmem:[#allocation5 + $0x1650] ss:$8 sps:$4 sm:$0xff]  }
 0x2f5   :  { %7177 = vmatpush1.bf16.msra.mxu1 %v10144_v57  ;;  %7135 = vmatprep.subr.bf16.mxu0 %v10149_v58  ;;  %v10240_v57 = vld [vmem:[#allocation5 + $0x1750] ss:$8 sps:$4 sm:$0xff]   ;;  %v10245_v58 = vld [vmem:[#allocation5 + $0x1644] ss:$8 sps:$4 sm:$0xff]  }
 0x2f6   :  { %7178 = vmatprep.subr.bf16.mxu1 %v10152_v59  ;;  %v10248_v59 = vld [vmem:[#allocation5 + $0x1744] ss:$8 sps:$4 sm:$0xff]  }
 0x2f8   :  { %7136 = vmatpush1.bf16.msra.mxu0 %v10147_v60  ;;  %v10243_v60 = vld [vmem:[#allocation5 + $0x1640] ss:$8 sps:$4 sm:$0xff]  }
 0x2f9   :  { %7179 = vmatpush1.bf16.msra.mxu1 %v10150_v61  ;;  %7137 = vmatprep.subr.bf16.mxu0 %v10155_v62  ;;  %v10246_v61 = vld [vmem:[#allocation5 + $0x1740] ss:$8 sps:$4 sm:$0xff]   ;;  %v10251_v62 = vld [vmem:[#allocation5 + $0x1634] ss:$8 sps:$4 sm:$0xff]  }
 0x2fa   :  { %7180 = vmatprep.subr.bf16.mxu1 %v10158_v63  ;;  %v10254_v63 = vld [vmem:[#allocation5 + $0x1734] ss:$8 sps:$4 sm:$0xff]  }
 0x2fc   :  { %7138 = vmatpush1.bf16.msra.mxu0 %v10153_v0  ;;  %v10249_v0 = vld [vmem:[#allocation5 + $0x1630] ss:$8 sps:$4 sm:$0xff]  }
 0x2fd   :  { %7181 = vmatpush1.bf16.msra.mxu1 %v10156_v1  ;;  %7139 = vmatprep.subr.bf16.mxu0 %v10161_v2  ;;  %v10252_v1 = vld [vmem:[#allocation5 + $0x1730] ss:$8 sps:$4 sm:$0xff]   ;;  %v10257_v2 = vld [vmem:[#allocation5 + $0x1624] ss:$8 sps:$4 sm:$0xff]  }
 0x2fe   :  { %7182 = vmatprep.subr.bf16.mxu1 %v10164_v3  ;;  %v10260_v3 = vld [vmem:[#allocation5 + $0x1724] ss:$8 sps:$4 sm:$0xff]  }
 0x300   :  { %7140 = vmatpush1.bf16.msra.mxu0 %v10159_v4  ;;  %v10255_v4 = vld [vmem:[#allocation5 + $0x1620] ss:$8 sps:$4 sm:$0xff]  }
 0x301   :  { %7183 = vmatpush1.bf16.msra.mxu1 %v10162_v5  ;;  %7141 = vmatprep.subr.bf16.mxu0 %v10167_v6  ;;  %v10258_v5 = vld [vmem:[#allocation5 + $0x1720] ss:$8 sps:$4 sm:$0xff]   ;;  %v10263_v6 = vld [vmem:[#allocation5 + $0x1614] ss:$8 sps:$4 sm:$0xff]  }
 0x302   :  { %7184 = vmatprep.subr.bf16.mxu1 %v10170_v7  ;;  %v10266_v7 = vld [vmem:[#allocation5 + $0x1714] ss:$8 sps:$4 sm:$0xff]  }
 0x304   :  { %7142 = vmatpush1.bf16.msra.mxu0 %v10165_v8  ;;  %v10261_v8 = vld [vmem:[#allocation5 + $0x1610] ss:$8 sps:$4 sm:$0xff]  }
 0x305   :  { %7185 = vmatpush1.bf16.msra.mxu1 %v10168_v9  ;;  %7143 = vmatprep.subr.bf16.mxu0 %v10173_v10  ;;  %v10264_v9 = vld [vmem:[#allocation5 + $0x1710] ss:$8 sps:$4 sm:$0xff]   ;;  %v10269_v10 = vld [vmem:[#allocation5 + $0x1604] ss:$8 sps:$4 sm:$0xff]  }
 0x306   :  { %7186 = vmatprep.subr.bf16.mxu1 %v10176_v11  ;;  %v10272_v11 = vld [vmem:[#allocation5 + $0x1704] ss:$8 sps:$4 sm:$0xff]  }
 0x308   :  { %7144 = vmatpush2.bf16.msra.mxu0 %v10171_v12  ;;  %v10267_v12 = vld [vmem:[#allocation5 + $0x1600] ss:$8 sps:$4 sm:$0xff]  }
 0x309   :  { %7187 = vmatpush2.bf16.msra.mxu1 %v10174_v13  ;;  %7145 = vmatprep.subr.bf16.mxu0 %v10179_v14  ;;  %v10270_v13 = vld [vmem:[#allocation5 + $0x1700] ss:$8 sps:$4 sm:$0xff]   ;;  %v10275_v14 = vld [vmem:[#allocation5 + $0x16f4] ss:$8 sps:$4 sm:$0xff]  }
 0x30a   :  { %7188 = vmatprep.subr.bf16.mxu1 %v10182_v15  ;;  %v10278_v15 = vld [vmem:[#allocation5 + $0x17f4] ss:$8 sps:$4 sm:$0xff]  }
 0x30c   :  { %7146 = vmatpush2.bf16.msra.mxu0 %v10177_v16  ;;  %v10273_v16 = vld [vmem:[#allocation5 + $0x16f0] ss:$8 sps:$4 sm:$0xff]  }
 0x30d   :  { %7189 = vmatpush2.bf16.msra.mxu1 %v10180_v17  ;;  %7147 = vmatprep.subr.bf16.mxu0 %v10185_v18  ;;  %v10276_v17 = vld [vmem:[#allocation5 + $0x17f0] ss:$8 sps:$4 sm:$0xff]   ;;  %v10281_v18 = vld [vmem:[#allocation5 + $0x16e4] ss:$8 sps:$4 sm:$0xff]  }
 0x30e   :  { %7190 = vmatprep.subr.bf16.mxu1 %v10188_v19  ;;  %v10284_v19 = vld [vmem:[#allocation5 + $0x17e4] ss:$8 sps:$4 sm:$0xff]  }
 0x310   :  { %7148 = vmatpush2.bf16.msra.mxu0 %v10183_v20  ;;  %v10279_v20 = vld [vmem:[#allocation5 + $0x16e0] ss:$8 sps:$4 sm:$0xff]  }
 0x311   :  { %7191 = vmatpush2.bf16.msra.mxu1 %v10186_v21  ;;  %7149 = vmatprep.subr.bf16.mxu0 %v10191_v22  ;;  %v10282_v21 = vld [vmem:[#allocation5 + $0x17e0] ss:$8 sps:$4 sm:$0xff]   ;;  %v10287_v22 = vld [vmem:[#allocation5 + $0x16d4] ss:$8 sps:$4 sm:$0xff]  }
 0x312   :  { %7192 = vmatprep.subr.bf16.mxu1 %v10194_v23  ;;  %v10290_v23 = vld [vmem:[#allocation5 + $0x17d4] ss:$8 sps:$4 sm:$0xff]  }
 0x314   :  { %7150 = vmatpush2.bf16.msra.mxu0 %v10189_v24  ;;  %v10285_v24 = vld [vmem:[#allocation5 + $0x16d0] ss:$8 sps:$4 sm:$0xff]  }
 0x315   :  { %7193 = vmatpush2.bf16.msra.mxu1 %v10192_v25  ;;  %7151 = vmatprep.subr.bf16.mxu0 %v10197_v26  ;;  %v10288_v25 = vld [vmem:[#allocation5 + $0x17d0] ss:$8 sps:$4 sm:$0xff]   ;;  %v10293_v26 = vld [vmem:[#allocation5 + $0x16c4] ss:$8 sps:$4 sm:$0xff]  }
 0x316   :  { %7194 = vmatprep.subr.bf16.mxu1 %v10200_v27  ;;  %v10296_v27 = vld [vmem:[#allocation5 + $0x17c4] ss:$8 sps:$4 sm:$0xff]  }
 0x318   :  { %7152 = vmatpush2.bf16.msra.mxu0 %v10195_v28  ;;  %v10291_v28 = vld [vmem:[#allocation5 + $0x16c0] ss:$8 sps:$4 sm:$0xff]  }
 0x319   :  { %7195 = vmatpush2.bf16.msra.mxu1 %v10198_v29  ;;  %7153 = vmatprep.subr.bf16.mxu0 %v10203_v30  ;;  %v10294_v29 = vld [vmem:[#allocation5 + $0x17c0] ss:$8 sps:$4 sm:$0xff]   ;;  %v10299_v30 = vld [vmem:[#allocation5 + $0x16b4] ss:$8 sps:$4 sm:$0xff]  }
 0x31a   :  { %7196 = vmatprep.subr.bf16.mxu1 %v10206_v31  ;;  %v10302_v31 = vld [vmem:[#allocation5 + $0x17b4] ss:$8 sps:$4 sm:$0xff]  }
 0x31c   :  { %7154 = vmatpush2.bf16.msra.mxu0 %v10201_v32  ;;  %v10297_v32 = vld [vmem:[#allocation5 + $0x16b0] ss:$8 sps:$4 sm:$0xff]  }
 0x31d   :  { %7197 = vmatpush2.bf16.msra.mxu1 %v10204_v33  ;;  %7155 = vmatprep.subr.bf16.mxu0 %v10209_v34  ;;  %v10300_v33 = vld [vmem:[#allocation5 + $0x17b0] ss:$8 sps:$4 sm:$0xff]   ;;  %v10305_v34 = vld [vmem:[#allocation5 + $0x16a4] ss:$8 sps:$4 sm:$0xff]  }
 0x31e   :  { %7198 = vmatprep.subr.bf16.mxu1 %v10212_v35  ;;  %v10308_v35 = vld [vmem:[#allocation5 + $0x17a4] ss:$8 sps:$4 sm:$0xff]  }
 0x320   :  { %7156 = vmatpush2.bf16.msra.mxu0 %v10207_v36  ;;  %v10303_v36 = vld [vmem:[#allocation5 + $0x16a0] ss:$8 sps:$4 sm:$0xff]  }
 0x321   :  { %7199 = vmatpush2.bf16.msra.mxu1 %v10210_v37  ;;  %7157 = vmatprep.subr.bf16.mxu0 %v10215_v38  ;;  %v10306_v37 = vld [vmem:[#allocation5 + $0x17a0] ss:$8 sps:$4 sm:$0xff]   ;;  %v10311_v38 = vld [vmem:[#allocation5 + $0x1694] ss:$8 sps:$4 sm:$0xff]  }
 0x322   :  { %7200 = vmatprep.subr.bf16.mxu1 %v10218_v39  ;;  %v10314_v39 = vld [vmem:[#allocation5 + $0x1794] ss:$8 sps:$4 sm:$0xff]  }
 0x324   :  { %7158 = vmatpush2.bf16.msra.mxu0 %v10213_v40  ;;  %v10309_v40 = vld [vmem:[#allocation5 + $0x1690] ss:$8 sps:$4 sm:$0xff]  }
 0x325   :  { %7201 = vmatpush2.bf16.msra.mxu1 %v10216_v41  ;;  %7213 = vmatprep.subr.bf16.mxu0 %v10227_v42  ;;  %v10312_v41 = vld [vmem:[#allocation5 + $0x1790] ss:$8 sps:$4 sm:$0xff]   ;;  %v10317_v42 = vld [vmem:[#allocation5 + $0x1684] ss:$8 sps:$4 sm:$0xff]  }
 0x326   :  { %7256 = vmatprep.subr.bf16.mxu1 %v10230_v43  ;;  %v10320_v43 = vld [vmem:[#allocation5 + $0x1784] ss:$8 sps:$4 sm:$0xff]  }
 0x327   :  { %7160 = vmatmul.mubr.bf16.vlgmr.msra.gmra.mxu0 %v10219_v44  ;;  %v10315_v44 = vld [vmem:[#allocation5 + $0x1680] ss:$8 sps:$4 sm:$0xff]  }
 0x328   :  { %7203 = vmatmul.mubr.bf16.vlgmr.msra.gmra.mxu1 %v10222_v45  ;;  %7214 = vmatpush1.bf16.msra.mxu0 %v10225_v46  ;;  %v10318_v45 = vld [vmem:[#allocation5 + $0x1780] ss:$8 sps:$4 sm:$0xff]   ;;  %v10329_v46 = vld [vmem:[#allocation5 + $0x1874] ss:$8 sps:$4 sm:$0xff]  }
 0x329   :  { %7257 = vmatpush1.bf16.msra.mxu1 %v10228_v47  ;;  %7215 = vmatprep.subr.bf16.mxu0 %v10233_v48  ;;  %v10332_v47 = vld [vmem:[#allocation5 + $0x1974] ss:$8 sps:$4 sm:$0xff]   ;;  %v10321_v48 = vld [vmem:[#allocation2 + $0xb0] ss:$240 sps:$4 sm:$0xff]  }
 0x32a   :  { %7258 = vmatprep.subr.bf16.mxu1 %v10236_v49  ;;  %7245 = vmatprep.mubr.bf16.mxu0 %v10323_v50  ;;  %v10324_v49 = vld [vmem:[#allocation2 + $0xb8] ss:$240 sps:$4 sm:$0xff]  }
 0x32b   :  { %7288 = vmatprep.mubr.bf16.mxu1 %v10326_v51  ;;  %v10327_v50 = vld [vmem:[#allocation5 + $0x1870] ss:$8 sps:$4 sm:$0xff]  }
 0x32c   :  { %7216 = vmatpush1.bf16.msra.mxu0 %v10231_v52  ;;  %v10330_v51 = vld [vmem:[#allocation5 + $0x1970] ss:$8 sps:$4 sm:$0xff]   ;;  %v10335_v52 = vld [vmem:[#allocation5 + $0x1864] ss:$8 sps:$4 sm:$0xff]  }
 0x32d   :  { %7259 = vmatpush1.bf16.msra.mxu1 %v10234_v53  ;;  %7217 = vmatprep.subr.bf16.mxu0 %v10239_v54  ;;  %v10338_v53 = vld [vmem:[#allocation5 + $0x1964] ss:$8 sps:$4 sm:$0xff]  }
 0x32e   :  { %7260 = vmatprep.subr.bf16.mxu1 %v10242_v55  ;;  %v10425_v54 = vld [vmem:[#allocation2 + $0xc4] ss:$240 sps:$4 sm:$0xff]   ;;  %v10428_v55 = vld [vmem:[#allocation2 + $0xcc] ss:$240 sps:$4 sm:$0xff]  }
 0x330   :  { %7218 = vmatpush1.bf16.msra.mxu0 %v10237_v56  ;;  %v10333_v56 = vld [vmem:[#allocation5 + $0x1860] ss:$8 sps:$4 sm:$0xff]  }
 0x331   :  { %7261 = vmatpush1.bf16.msra.mxu1 %v10240_v57  ;;  %7219 = vmatprep.subr.bf16.mxu0 %v10245_v58  ;;  %v10336_v57 = vld [vmem:[#allocation5 + $0x1960] ss:$8 sps:$4 sm:$0xff]   ;;  %v10341_v58 = vld [vmem:[#allocation5 + $0x1854] ss:$8 sps:$4 sm:$0xff]  }
 0x332   :  { %7262 = vmatprep.subr.bf16.mxu1 %v10248_v59  ;;  %v10344_v59 = vld [vmem:[#allocation5 + $0x1954] ss:$8 sps:$4 sm:$0xff]  }
 0x334   :  { %7220 = vmatpush1.bf16.msra.mxu0 %v10243_v60  ;;  %v10339_v60 = vld [vmem:[#allocation5 + $0x1850] ss:$8 sps:$4 sm:$0xff]  }
 0x335   :  { %7263 = vmatpush1.bf16.msra.mxu1 %v10246_v61  ;;  %7221 = vmatprep.subr.bf16.mxu0 %v10251_v62  ;;  %v10342_v61 = vld [vmem:[#allocation5 + $0x1950] ss:$8 sps:$4 sm:$0xff]   ;;  %v10347_v62 = vld [vmem:[#allocation5 + $0x1844] ss:$8 sps:$4 sm:$0xff]  }
 0x336   :  { %7264 = vmatprep.subr.bf16.mxu1 %v10254_v63  ;;  %v10350_v63 = vld [vmem:[#allocation5 + $0x1944] ss:$8 sps:$4 sm:$0xff]  }
 0x338   :  { %7222 = vmatpush1.bf16.msra.mxu0 %v10249_v0  ;;  %v10345_v0 = vld [vmem:[#allocation5 + $0x1840] ss:$8 sps:$4 sm:$0xff]  }
 0x339   :  { %7265 = vmatpush1.bf16.msra.mxu1 %v10252_v1  ;;  %7223 = vmatprep.subr.bf16.mxu0 %v10257_v2  ;;  %v10348_v1 = vld [vmem:[#allocation5 + $0x1940] ss:$8 sps:$4 sm:$0xff]   ;;  %v10353_v2 = vld [vmem:[#allocation5 + $0x1834] ss:$8 sps:$4 sm:$0xff]  }
 0x33a   :  { %7266 = vmatprep.subr.bf16.mxu1 %v10260_v3  ;;  %v10356_v3 = vld [vmem:[#allocation5 + $0x1934] ss:$8 sps:$4 sm:$0xff]  }
 0x33c   :  { %7224 = vmatpush1.bf16.msra.mxu0 %v10255_v4  ;;  %v10351_v4 = vld [vmem:[#allocation5 + $0x1830] ss:$8 sps:$4 sm:$0xff]  }
 0x33d   :  { %7267 = vmatpush1.bf16.msra.mxu1 %v10258_v5  ;;  %7225 = vmatprep.subr.bf16.mxu0 %v10263_v6  ;;  %v10354_v5 = vld [vmem:[#allocation5 + $0x1930] ss:$8 sps:$4 sm:$0xff]   ;;  %v10359_v6 = vld [vmem:[#allocation5 + $0x1824] ss:$8 sps:$4 sm:$0xff]  }
 0x33e   :  { %7268 = vmatprep.subr.bf16.mxu1 %v10266_v7  ;;  %v10362_v7 = vld [vmem:[#allocation5 + $0x1924] ss:$8 sps:$4 sm:$0xff]  }
 0x340   :  { %7226 = vmatpush1.bf16.msra.mxu0 %v10261_v8  ;;  %v10357_v8 = vld [vmem:[#allocation5 + $0x1820] ss:$8 sps:$4 sm:$0xff]  }
 0x341   :  { %7269 = vmatpush1.bf16.msra.mxu1 %v10264_v9  ;;  %7227 = vmatprep.subr.bf16.mxu0 %v10269_v10  ;;  %v10360_v9 = vld [vmem:[#allocation5 + $0x1920] ss:$8 sps:$4 sm:$0xff]   ;;  %v10365_v10 = vld [vmem:[#allocation5 + $0x1814] ss:$8 sps:$4 sm:$0xff]  }
 0x342   :  { %7270 = vmatprep.subr.bf16.mxu1 %v10272_v11  ;;  %v10368_v11 = vld [vmem:[#allocation5 + $0x1914] ss:$8 sps:$4 sm:$0xff]  }
 0x344   :  { %7228 = vmatpush1.bf16.msra.mxu0 %v10267_v12  ;;  %v10363_v12 = vld [vmem:[#allocation5 + $0x1810] ss:$8 sps:$4 sm:$0xff]  }
 0x345   :  { %7271 = vmatpush1.bf16.msra.mxu1 %v10270_v13  ;;  %7229 = vmatprep.subr.bf16.mxu0 %v10275_v14  ;;  %v10366_v13 = vld [vmem:[#allocation5 + $0x1910] ss:$8 sps:$4 sm:$0xff]   ;;  %v10371_v14 = vld [vmem:[#allocation5 + $0x1804] ss:$8 sps:$4 sm:$0xff]  }
 0x346   :  { %7272 = vmatprep.subr.bf16.mxu1 %v10278_v15  ;;  %v10374_v15 = vld [vmem:[#allocation5 + $0x1904] ss:$8 sps:$4 sm:$0xff]  }
 0x348   :  { %7230 = vmatpush2.bf16.msra.mxu0 %v10273_v16  ;;  %v10369_v16 = vld [vmem:[#allocation5 + $0x1800] ss:$8 sps:$4 sm:$0xff]  }
 0x349   :  { %7273 = vmatpush2.bf16.msra.mxu1 %v10276_v17  ;;  %7231 = vmatprep.subr.bf16.mxu0 %v10281_v18  ;;  %v10372_v17 = vld [vmem:[#allocation5 + $0x1900] ss:$8 sps:$4 sm:$0xff]   ;;  %v10377_v18 = vld [vmem:[#allocation5 + $0x18f4] ss:$8 sps:$4 sm:$0xff]  }
 0x34a   :  { %7274 = vmatprep.subr.bf16.mxu1 %v10284_v19  ;;  %v10380_v19 = vld [vmem:[#allocation5 + $0x19f4] ss:$8 sps:$4 sm:$0xff]  }
 0x34c   :  { %7232 = vmatpush2.bf16.msra.mxu0 %v10279_v20  ;;  %v10375_v20 = vld [vmem:[#allocation5 + $0x18f0] ss:$8 sps:$4 sm:$0xff]  }
 0x34d   :  { %7275 = vmatpush2.bf16.msra.mxu1 %v10282_v21  ;;  %7233 = vmatprep.subr.bf16.mxu0 %v10287_v22  ;;  %v10378_v21 = vld [vmem:[#allocation5 + $0x19f0] ss:$8 sps:$4 sm:$0xff]   ;;  %v10383_v22 = vld [vmem:[#allocation5 + $0x18e4] ss:$8 sps:$4 sm:$0xff]  }
 0x34e   :  { %7276 = vmatprep.subr.bf16.mxu1 %v10290_v23  ;;  %v10386_v23 = vld [vmem:[#allocation5 + $0x19e4] ss:$8 sps:$4 sm:$0xff]  }
 0x350   :  { %7234 = vmatpush2.bf16.msra.mxu0 %v10285_v24  ;;  %v10381_v24 = vld [vmem:[#allocation5 + $0x18e0] ss:$8 sps:$4 sm:$0xff]  }
 0x351   :  { %7277 = vmatpush2.bf16.msra.mxu1 %v10288_v25  ;;  %7235 = vmatprep.subr.bf16.mxu0 %v10293_v26  ;;  %v10384_v25 = vld [vmem:[#allocation5 + $0x19e0] ss:$8 sps:$4 sm:$0xff]   ;;  %v10389_v26 = vld [vmem:[#allocation5 + $0x18d4] ss:$8 sps:$4 sm:$0xff]  }
 0x352   :  { %7278 = vmatprep.subr.bf16.mxu1 %v10296_v27  ;;  %v10392_v27 = vld [vmem:[#allocation5 + $0x19d4] ss:$8 sps:$4 sm:$0xff]  }
 0x354   :  { %7236 = vmatpush2.bf16.msra.mxu0 %v10291_v28  ;;  %v10387_v28 = vld [vmem:[#allocation5 + $0x18d0] ss:$8 sps:$4 sm:$0xff]  }
 0x355   :  { %7279 = vmatpush2.bf16.msra.mxu1 %v10294_v29  ;;  %7237 = vmatprep.subr.bf16.mxu0 %v10299_v30  ;;  %v10390_v29 = vld [vmem:[#allocation5 + $0x19d0] ss:$8 sps:$4 sm:$0xff]   ;;  %v10395_v30 = vld [vmem:[#allocation5 + $0x18c4] ss:$8 sps:$4 sm:$0xff]  }
 0x356   :  { %7280 = vmatprep.subr.bf16.mxu1 %v10302_v31  ;;  %v10398_v31 = vld [vmem:[#allocation5 + $0x19c4] ss:$8 sps:$4 sm:$0xff]  }
 0x358   :  { %7238 = vmatpush2.bf16.msra.mxu0 %v10297_v32  ;;  %v10393_v32 = vld [vmem:[#allocation5 + $0x18c0] ss:$8 sps:$4 sm:$0xff]  }
 0x359   :  { %7281 = vmatpush2.bf16.msra.mxu1 %v10300_v33  ;;  %7239 = vmatprep.subr.bf16.mxu0 %v10305_v34  ;;  %v10396_v33 = vld [vmem:[#allocation5 + $0x19c0] ss:$8 sps:$4 sm:$0xff]   ;;  %v10401_v34 = vld [vmem:[#allocation5 + $0x18b4] ss:$8 sps:$4 sm:$0xff]  }
 0x35a   :  { %7282 = vmatprep.subr.bf16.mxu1 %v10308_v35  ;;  %v10404_v35 = vld [vmem:[#allocation5 + $0x19b4] ss:$8 sps:$4 sm:$0xff]  }
 0x35c   :  { %7240 = vmatpush2.bf16.msra.mxu0 %v10303_v36  ;;  %v10399_v36 = vld [vmem:[#allocation5 + $0x18b0] ss:$8 sps:$4 sm:$0xff]  }
 0x35d   :  { %7283 = vmatpush2.bf16.msra.mxu1 %v10306_v37  ;;  %7241 = vmatprep.subr.bf16.mxu0 %v10311_v38  ;;  %v10402_v37 = vld [vmem:[#allocation5 + $0x19b0] ss:$8 sps:$4 sm:$0xff]   ;;  %v10407_v38 = vld [vmem:[#allocation5 + $0x18a4] ss:$8 sps:$4 sm:$0xff]  }
 0x35e   :  { %7284 = vmatprep.subr.bf16.mxu1 %v10314_v39  ;;  %v10410_v39 = vld [vmem:[#allocation5 + $0x19a4] ss:$8 sps:$4 sm:$0xff]  }
 0x360   :  { %7242 = vmatpush2.bf16.msra.mxu0 %v10309_v40  ;;  %v10405_v40 = vld [vmem:[#allocation5 + $0x18a0] ss:$8 sps:$4 sm:$0xff]  }
 0x361   :  { %7285 = vmatpush2.bf16.msra.mxu1 %v10312_v41  ;;  %7243 = vmatprep.subr.bf16.mxu0 %v10317_v42  ;;  %v10408_v41 = vld [vmem:[#allocation5 + $0x19a0] ss:$8 sps:$4 sm:$0xff]   ;;  %v10413_v42 = vld [vmem:[#allocation5 + $0x1894] ss:$8 sps:$4 sm:$0xff]  }
 0x362   :  { %7286 = vmatprep.subr.bf16.mxu1 %v10320_v43  ;;  %v10416_v43 = vld [vmem:[#allocation5 + $0x1994] ss:$8 sps:$4 sm:$0xff]  }
 0x364   :  { %7244 = vmatpush2.bf16.msra.mxu0 %v10315_v44  ;;  %v10411_v44 = vld [vmem:[#allocation5 + $0x1890] ss:$8 sps:$4 sm:$0xff]  }
 0x365   :  { %7287 = vmatpush2.bf16.msra.mxu1 %v10318_v45  ;;  %7299 = vmatprep.subr.bf16.mxu0 %v10329_v46  ;;  %v10414_v45 = vld [vmem:[#allocation5 + $0x1990] ss:$8 sps:$4 sm:$0xff]   ;;  %v10419_v46 = vld [vmem:[#allocation5 + $0x1884] ss:$8 sps:$4 sm:$0xff]  }
 0x366   :  { %7342 = vmatprep.subr.bf16.mxu1 %v10332_v47  ;;  %v10422_v47 = vld [vmem:[#allocation5 + $0x1984] ss:$8 sps:$4 sm:$0xff]  }
 0x367   :  { %7246 = vmatmul.mubr.bf16.vlgmr.msra.gmra.mxu0 %v10321_v48  ;;  %v10417_v48 = vld [vmem:[#allocation5 + $0x1880] ss:$8 sps:$4 sm:$0xff]  }
 0x368   :  { %7289 = vmatmul.mubr.bf16.vlgmr.msra.gmra.mxu1 %v10324_v49  ;;  %7300 = vmatpush1.bf16.msra.mxu0 %v10327_v50  ;;  %v10420_v49 = vld [vmem:[#allocation5 + $0x1980] ss:$8 sps:$4 sm:$0xff]   ;;  %v10431_v50 = vld [vmem:[#allocation5 + $0x1a74] ss:$8 sps:$4 sm:$0xff]  }
 0x369   :  { %7343 = vmatpush1.bf16.msra.mxu1 %v10330_v51  ;;  %7301 = vmatprep.subr.bf16.mxu0 %v10335_v52  ;;  %v10434_v51 = vld [vmem:[#allocation5 + $0x1b74] ss:$8 sps:$4 sm:$0xff]   ;;  %v10423_v52 = vld [vmem:[#allocation2 + $0xc0] ss:$240 sps:$4 sm:$0xff]  }
 0x36a   :  { %7344 = vmatprep.subr.bf16.mxu1 %v10338_v53  ;;  %7331 = vmatprep.mubr.bf16.mxu0 %v10425_v54  ;;  %v10426_v53 = vld [vmem:[#allocation2 + $0xc8] ss:$240 sps:$4 sm:$0xff]  }
 0x36b   :  { %7374 = vmatprep.mubr.bf16.mxu1 %v10428_v55  ;;  %v10429_v54 = vld [vmem:[#allocation5 + $0x1a70] ss:$8 sps:$4 sm:$0xff]  }
 0x36c   :  { %7302 = vmatpush1.bf16.msra.mxu0 %v10333_v56  ;;  %v10432_v55 = vld [vmem:[#allocation5 + $0x1b70] ss:$8 sps:$4 sm:$0xff]   ;;  %v10437_v56 = vld [vmem:[#allocation5 + $0x1a64] ss:$8 sps:$4 sm:$0xff]  }
 0x36d   :  { %7345 = vmatpush1.bf16.msra.mxu1 %v10336_v57  ;;  %7303 = vmatprep.subr.bf16.mxu0 %v10341_v58  ;;  %v10440_v57 = vld [vmem:[#allocation5 + $0x1b64] ss:$8 sps:$4 sm:$0xff]  }
 0x36e   :  { %7346 = vmatprep.subr.bf16.mxu1 %v10344_v59  ;;  %v10527_v58 = vld [vmem:[#allocation2 + $0xd4] ss:$240 sps:$4 sm:$0xff]   ;;  %v10530_v59 = vld [vmem:[#allocation2 + $0xdc] ss:$240 sps:$4 sm:$0xff]  }
 0x370   :  { %7304 = vmatpush1.bf16.msra.mxu0 %v10339_v60  ;;  %v10435_v60 = vld [vmem:[#allocation5 + $0x1a60] ss:$8 sps:$4 sm:$0xff]  }
 0x371   :  { %7347 = vmatpush1.bf16.msra.mxu1 %v10342_v61  ;;  %7305 = vmatprep.subr.bf16.mxu0 %v10347_v62  ;;  %v10438_v61 = vld [vmem:[#allocation5 + $0x1b60] ss:$8 sps:$4 sm:$0xff]   ;;  %v10443_v62 = vld [vmem:[#allocation5 + $0x1a54] ss:$8 sps:$4 sm:$0xff]  }
 0x372   :  { %7348 = vmatprep.subr.bf16.mxu1 %v10350_v63  ;;  %v10446_v63 = vld [vmem:[#allocation5 + $0x1b54] ss:$8 sps:$4 sm:$0xff]  }
 0x374   :  { %7306 = vmatpush1.bf16.msra.mxu0 %v10345_v0  ;;  %v10441_v0 = vld [vmem:[#allocation5 + $0x1a50] ss:$8 sps:$4 sm:$0xff]  }
 0x375   :  { %7349 = vmatpush1.bf16.msra.mxu1 %v10348_v1  ;;  %7307 = vmatprep.subr.bf16.mxu0 %v10353_v2  ;;  %v10444_v1 = vld [vmem:[#allocation5 + $0x1b50] ss:$8 sps:$4 sm:$0xff]   ;;  %v10449_v2 = vld [vmem:[#allocation5 + $0x1a44] ss:$8 sps:$4 sm:$0xff]  }
 0x376   :  { %7350 = vmatprep.subr.bf16.mxu1 %v10356_v3  ;;  %v10452_v3 = vld [vmem:[#allocation5 + $0x1b44] ss:$8 sps:$4 sm:$0xff]  }
 0x378   :  { %7308 = vmatpush1.bf16.msra.mxu0 %v10351_v4  ;;  %v10447_v4 = vld [vmem:[#allocation5 + $0x1a40] ss:$8 sps:$4 sm:$0xff]  }
 0x379   :  { %7351 = vmatpush1.bf16.msra.mxu1 %v10354_v5  ;;  %7309 = vmatprep.subr.bf16.mxu0 %v10359_v6  ;;  %v10450_v5 = vld [vmem:[#allocation5 + $0x1b40] ss:$8 sps:$4 sm:$0xff]   ;;  %v10455_v6 = vld [vmem:[#allocation5 + $0x1a34] ss:$8 sps:$4 sm:$0xff]  }
 0x37a   :  { %7352 = vmatprep.subr.bf16.mxu1 %v10362_v7  ;;  %v10458_v7 = vld [vmem:[#allocation5 + $0x1b34] ss:$8 sps:$4 sm:$0xff]  }
 0x37c   :  { %7310 = vmatpush1.bf16.msra.mxu0 %v10357_v8  ;;  %v10453_v8 = vld [vmem:[#allocation5 + $0x1a30] ss:$8 sps:$4 sm:$0xff]  }
 0x37d   :  { %7353 = vmatpush1.bf16.msra.mxu1 %v10360_v9  ;;  %7311 = vmatprep.subr.bf16.mxu0 %v10365_v10  ;;  %v10456_v9 = vld [vmem:[#allocation5 + $0x1b30] ss:$8 sps:$4 sm:$0xff]   ;;  %v10461_v10 = vld [vmem:[#allocation5 + $0x1a24] ss:$8 sps:$4 sm:$0xff]  }
 0x37e   :  { %7354 = vmatprep.subr.bf16.mxu1 %v10368_v11  ;;  %v10464_v11 = vld [vmem:[#allocation5 + $0x1b24] ss:$8 sps:$4 sm:$0xff]  }
 0x380   :  { %7312 = vmatpush1.bf16.msra.mxu0 %v10363_v12  ;;  %v10459_v12 = vld [vmem:[#allocation5 + $0x1a20] ss:$8 sps:$4 sm:$0xff]  }
 0x381   :  { %7355 = vmatpush1.bf16.msra.mxu1 %v10366_v13  ;;  %7313 = vmatprep.subr.bf16.mxu0 %v10371_v14  ;;  %v10462_v13 = vld [vmem:[#allocation5 + $0x1b20] ss:$8 sps:$4 sm:$0xff]   ;;  %v10467_v14 = vld [vmem:[#allocation5 + $0x1a14] ss:$8 sps:$4 sm:$0xff]  }
 0x382   :  { %7356 = vmatprep.subr.bf16.mxu1 %v10374_v15  ;;  %v10470_v15 = vld [vmem:[#allocation5 + $0x1b14] ss:$8 sps:$4 sm:$0xff]  }
 0x384   :  { %7314 = vmatpush1.bf16.msra.mxu0 %v10369_v16  ;;  %v10465_v16 = vld [vmem:[#allocation5 + $0x1a10] ss:$8 sps:$4 sm:$0xff]  }
 0x385   :  { %7357 = vmatpush1.bf16.msra.mxu1 %v10372_v17  ;;  %7315 = vmatprep.subr.bf16.mxu0 %v10377_v18  ;;  %v10468_v17 = vld [vmem:[#allocation5 + $0x1b10] ss:$8 sps:$4 sm:$0xff]   ;;  %v10473_v18 = vld [vmem:[#allocation5 + $0x1a04] ss:$8 sps:$4 sm:$0xff]  }
 0x386   :  { %7358 = vmatprep.subr.bf16.mxu1 %v10380_v19  ;;  %v10476_v19 = vld [vmem:[#allocation5 + $0x1b04] ss:$8 sps:$4 sm:$0xff]  }
 0x388   :  { %7316 = vmatpush2.bf16.msra.mxu0 %v10375_v20  ;;  %v10471_v20 = vld [vmem:[#allocation5 + $0x1a00] ss:$8 sps:$4 sm:$0xff]  }
 0x389   :  { %7359 = vmatpush2.bf16.msra.mxu1 %v10378_v21  ;;  %7317 = vmatprep.subr.bf16.mxu0 %v10383_v22  ;;  %v10474_v21 = vld [vmem:[#allocation5 + $0x1b00] ss:$8 sps:$4 sm:$0xff]   ;;  %v10479_v22 = vld [vmem:[#allocation5 + $0x1af4] ss:$8 sps:$4 sm:$0xff]  }
 0x38a   :  { %7360 = vmatprep.subr.bf16.mxu1 %v10386_v23  ;;  %v10482_v23 = vld [vmem:[#allocation5 + $0x1bf4] ss:$8 sps:$4 sm:$0xff]  }
 0x38c   :  { %7318 = vmatpush2.bf16.msra.mxu0 %v10381_v24  ;;  %v10477_v24 = vld [vmem:[#allocation5 + $0x1af0] ss:$8 sps:$4 sm:$0xff]  }
 0x38d   :  { %7361 = vmatpush2.bf16.msra.mxu1 %v10384_v25  ;;  %7319 = vmatprep.subr.bf16.mxu0 %v10389_v26  ;;  %v10480_v25 = vld [vmem:[#allocation5 + $0x1bf0] ss:$8 sps:$4 sm:$0xff]   ;;  %v10485_v26 = vld [vmem:[#allocation5 + $0x1ae4] ss:$8 sps:$4 sm:$0xff]  }
 0x38e   :  { %7362 = vmatprep.subr.bf16.mxu1 %v10392_v27  ;;  %v10488_v27 = vld [vmem:[#allocation5 + $0x1be4] ss:$8 sps:$4 sm:$0xff]  }
 0x390   :  { %7320 = vmatpush2.bf16.msra.mxu0 %v10387_v28  ;;  %v10483_v28 = vld [vmem:[#allocation5 + $0x1ae0] ss:$8 sps:$4 sm:$0xff]  }
 0x391   :  { %7363 = vmatpush2.bf16.msra.mxu1 %v10390_v29  ;;  %7321 = vmatprep.subr.bf16.mxu0 %v10395_v30  ;;  %v10486_v29 = vld [vmem:[#allocation5 + $0x1be0] ss:$8 sps:$4 sm:$0xff]   ;;  %v10491_v30 = vld [vmem:[#allocation5 + $0x1ad4] ss:$8 sps:$4 sm:$0xff]  }
 0x392   :  { %7364 = vmatprep.subr.bf16.mxu1 %v10398_v31  ;;  %v10494_v31 = vld [vmem:[#allocation5 + $0x1bd4] ss:$8 sps:$4 sm:$0xff]  }
 0x394   :  { %7322 = vmatpush2.bf16.msra.mxu0 %v10393_v32  ;;  %v10489_v32 = vld [vmem:[#allocation5 + $0x1ad0] ss:$8 sps:$4 sm:$0xff]  }
 0x395   :  { %7365 = vmatpush2.bf16.msra.mxu1 %v10396_v33  ;;  %7323 = vmatprep.subr.bf16.mxu0 %v10401_v34  ;;  %v10492_v33 = vld [vmem:[#allocation5 + $0x1bd0] ss:$8 sps:$4 sm:$0xff]   ;;  %v10497_v34 = vld [vmem:[#allocation5 + $0x1ac4] ss:$8 sps:$4 sm:$0xff]  }
 0x396   :  { %7366 = vmatprep.subr.bf16.mxu1 %v10404_v35  ;;  %v10500_v35 = vld [vmem:[#allocation5 + $0x1bc4] ss:$8 sps:$4 sm:$0xff]  }
 0x398   :  { %7324 = vmatpush2.bf16.msra.mxu0 %v10399_v36  ;;  %v10495_v36 = vld [vmem:[#allocation5 + $0x1ac0] ss:$8 sps:$4 sm:$0xff]  }
 0x399   :  { %7367 = vmatpush2.bf16.msra.mxu1 %v10402_v37  ;;  %7325 = vmatprep.subr.bf16.mxu0 %v10407_v38  ;;  %v10498_v37 = vld [vmem:[#allocation5 + $0x1bc0] ss:$8 sps:$4 sm:$0xff]   ;;  %v10503_v38 = vld [vmem:[#allocation5 + $0x1ab4] ss:$8 sps:$4 sm:$0xff]  }
 0x39a   :  { %7368 = vmatprep.subr.bf16.mxu1 %v10410_v39  ;;  %v10506_v39 = vld [vmem:[#allocation5 + $0x1bb4] ss:$8 sps:$4 sm:$0xff]  }
 0x39c   :  { %7326 = vmatpush2.bf16.msra.mxu0 %v10405_v40  ;;  %v10501_v40 = vld [vmem:[#allocation5 + $0x1ab0] ss:$8 sps:$4 sm:$0xff]  }
 0x39d   :  { %7369 = vmatpush2.bf16.msra.mxu1 %v10408_v41  ;;  %7327 = vmatprep.subr.bf16.mxu0 %v10413_v42  ;;  %v10504_v41 = vld [vmem:[#allocation5 + $0x1bb0] ss:$8 sps:$4 sm:$0xff]   ;;  %v10509_v42 = vld [vmem:[#allocation5 + $0x1aa4] ss:$8 sps:$4 sm:$0xff]  }
 0x39e   :  { %7370 = vmatprep.subr.bf16.mxu1 %v10416_v43  ;;  %v10512_v43 = vld [vmem:[#allocation5 + $0x1ba4] ss:$8 sps:$4 sm:$0xff]  }
 0x3a0   :  { %7328 = vmatpush2.bf16.msra.mxu0 %v10411_v44  ;;  %v10507_v44 = vld [vmem:[#allocation5 + $0x1aa0] ss:$8 sps:$4 sm:$0xff]  }
 0x3a1   :  { %7371 = vmatpush2.bf16.msra.mxu1 %v10414_v45  ;;  %7329 = vmatprep.subr.bf16.mxu0 %v10419_v46  ;;  %v10510_v45 = vld [vmem:[#allocation5 + $0x1ba0] ss:$8 sps:$4 sm:$0xff]   ;;  %v10515_v46 = vld [vmem:[#allocation5 + $0x1a94] ss:$8 sps:$4 sm:$0xff]  }
 0x3a2   :  { %7372 = vmatprep.subr.bf16.mxu1 %v10422_v47  ;;  %v10518_v47 = vld [vmem:[#allocation5 + $0x1b94] ss:$8 sps:$4 sm:$0xff]  }
 0x3a4   :  { %7330 = vmatpush2.bf16.msra.mxu0 %v10417_v48  ;;  %v10513_v48 = vld [vmem:[#allocation5 + $0x1a90] ss:$8 sps:$4 sm:$0xff]  }
 0x3a5   :  { %7373 = vmatpush2.bf16.msra.mxu1 %v10420_v49  ;;  %7385 = vmatprep.subr.bf16.mxu0 %v10431_v50  ;;  %v10516_v49 = vld [vmem:[#allocation5 + $0x1b90] ss:$8 sps:$4 sm:$0xff]   ;;  %v10521_v50 = vld [vmem:[#allocation5 + $0x1a84] ss:$8 sps:$4 sm:$0xff]  }
 0x3a6   :  { %7428 = vmatprep.subr.bf16.mxu1 %v10434_v51  ;;  %v10524_v51 = vld [vmem:[#allocation5 + $0x1b84] ss:$8 sps:$4 sm:$0xff]  }
 0x3a7   :  { %7332 = vmatmul.mubr.bf16.vlgmr.msra.gmra.mxu0 %v10423_v52  ;;  %v10519_v52 = vld [vmem:[#allocation5 + $0x1a80] ss:$8 sps:$4 sm:$0xff]  }
 0x3a8   :  { %7375 = vmatmul.mubr.bf16.vlgmr.msra.gmra.mxu1 %v10426_v53  ;;  %7386 = vmatpush1.bf16.msra.mxu0 %v10429_v54  ;;  %v10522_v53 = vld [vmem:[#allocation5 + $0x1b80] ss:$8 sps:$4 sm:$0xff]   ;;  %v10533_v54 = vld [vmem:[#allocation5 + $0x1c74] ss:$8 sps:$4 sm:$0xff]  }
 0x3a9   :  { %7429 = vmatpush1.bf16.msra.mxu1 %v10432_v55  ;;  %7387 = vmatprep.subr.bf16.mxu0 %v10437_v56  ;;  %v10536_v55 = vld [vmem:[#allocation5 + $0x1d74] ss:$8 sps:$4 sm:$0xff]   ;;  %v10525_v56 = vld [vmem:[#allocation2 + $0xd0] ss:$240 sps:$4 sm:$0xff]  }
 0x3aa   :  { %7430 = vmatprep.subr.bf16.mxu1 %v10440_v57  ;;  %7417 = vmatprep.mubr.bf16.mxu0 %v10527_v58  ;;  %v10528_v57 = vld [vmem:[#allocation2 + $0xd8] ss:$240 sps:$4 sm:$0xff]  }
 0x3ab   :  { %7460 = vmatprep.mubr.bf16.mxu1 %v10530_v59  ;;  %v10531_v58 = vld [vmem:[#allocation5 + $0x1c70] ss:$8 sps:$4 sm:$0xff]  }
 0x3ac   :  { %7388 = vmatpush1.bf16.msra.mxu0 %v10435_v60  ;;  %v10534_v59 = vld [vmem:[#allocation5 + $0x1d70] ss:$8 sps:$4 sm:$0xff]   ;;  %v10539_v60 = vld [vmem:[#allocation5 + $0x1c64] ss:$8 sps:$4 sm:$0xff]  }
 0x3ad   :  { %7431 = vmatpush1.bf16.msra.mxu1 %v10438_v61  ;;  %7389 = vmatprep.subr.bf16.mxu0 %v10443_v62  ;;  %v10542_v61 = vld [vmem:[#allocation5 + $0x1d64] ss:$8 sps:$4 sm:$0xff]  }
 0x3ae   :  { %7432 = vmatprep.subr.bf16.mxu1 %v10446_v63  ;;  %v10629_v62 = vld [vmem:[#allocation2 + $0xe4] ss:$240 sps:$4 sm:$0xff]   ;;  %v10632_v63 = vld [vmem:[#allocation2 + $0xec] ss:$240 sps:$4 sm:$0xff]  }
 0x3b0   :  { %7390 = vmatpush1.bf16.msra.mxu0 %v10441_v0  ;;  %v10537_v0 = vld [vmem:[#allocation5 + $0x1c60] ss:$8 sps:$4 sm:$0xff]  }
 0x3b1   :  { %7433 = vmatpush1.bf16.msra.mxu1 %v10444_v1  ;;  %7391 = vmatprep.subr.bf16.mxu0 %v10449_v2  ;;  %v10540_v1 = vld [vmem:[#allocation5 + $0x1d60] ss:$8 sps:$4 sm:$0xff]   ;;  %v10545_v2 = vld [vmem:[#allocation5 + $0x1c54] ss:$8 sps:$4 sm:$0xff]  }
 0x3b2   :  { %7434 = vmatprep.subr.bf16.mxu1 %v10452_v3  ;;  %v10548_v3 = vld [vmem:[#allocation5 + $0x1d54] ss:$8 sps:$4 sm:$0xff]  }
 0x3b4   :  { %7392 = vmatpush1.bf16.msra.mxu0 %v10447_v4  ;;  %v10543_v4 = vld [vmem:[#allocation5 + $0x1c50] ss:$8 sps:$4 sm:$0xff]  }
 0x3b5   :  { %7435 = vmatpush1.bf16.msra.mxu1 %v10450_v5  ;;  %7393 = vmatprep.subr.bf16.mxu0 %v10455_v6  ;;  %v10546_v5 = vld [vmem:[#allocation5 + $0x1d50] ss:$8 sps:$4 sm:$0xff]   ;;  %v10551_v6 = vld [vmem:[#allocation5 + $0x1c44] ss:$8 sps:$4 sm:$0xff]  }
 0x3b6   :  { %7436 = vmatprep.subr.bf16.mxu1 %v10458_v7  ;;  %v10554_v7 = vld [vmem:[#allocation5 + $0x1d44] ss:$8 sps:$4 sm:$0xff]  }
 0x3b8   :  { %7394 = vmatpush1.bf16.msra.mxu0 %v10453_v8  ;;  %v10549_v8 = vld [vmem:[#allocation5 + $0x1c40] ss:$8 sps:$4 sm:$0xff]  }
 0x3b9   :  { %7437 = vmatpush1.bf16.msra.mxu1 %v10456_v9  ;;  %7395 = vmatprep.subr.bf16.mxu0 %v10461_v10  ;;  %v10552_v9 = vld [vmem:[#allocation5 + $0x1d40] ss:$8 sps:$4 sm:$0xff]   ;;  %v10557_v10 = vld [vmem:[#allocation5 + $0x1c34] ss:$8 sps:$4 sm:$0xff]  }
 0x3ba   :  { %7438 = vmatprep.subr.bf16.mxu1 %v10464_v11  ;;  %v10560_v11 = vld [vmem:[#allocation5 + $0x1d34] ss:$8 sps:$4 sm:$0xff]  }
 0x3bc   :  { %7396 = vmatpush1.bf16.msra.mxu0 %v10459_v12  ;;  %v10555_v12 = vld [vmem:[#allocation5 + $0x1c30] ss:$8 sps:$4 sm:$0xff]  }
 0x3bd   :  { %7439 = vmatpush1.bf16.msra.mxu1 %v10462_v13  ;;  %7397 = vmatprep.subr.bf16.mxu0 %v10467_v14  ;;  %v10558_v13 = vld [vmem:[#allocation5 + $0x1d30] ss:$8 sps:$4 sm:$0xff]   ;;  %v10563_v14 = vld [vmem:[#allocation5 + $0x1c24] ss:$8 sps:$4 sm:$0xff]  }
 0x3be   :  { %7440 = vmatprep.subr.bf16.mxu1 %v10470_v15  ;;  %v10566_v15 = vld [vmem:[#allocation5 + $0x1d24] ss:$8 sps:$4 sm:$0xff]  }
 0x3c0   :  { %7398 = vmatpush1.bf16.msra.mxu0 %v10465_v16  ;;  %v10561_v16 = vld [vmem:[#allocation5 + $0x1c20] ss:$8 sps:$4 sm:$0xff]  }
 0x3c1   :  { %7441 = vmatpush1.bf16.msra.mxu1 %v10468_v17  ;;  %7399 = vmatprep.subr.bf16.mxu0 %v10473_v18  ;;  %v10564_v17 = vld [vmem:[#allocation5 + $0x1d20] ss:$8 sps:$4 sm:$0xff]   ;;  %v10569_v18 = vld [vmem:[#allocation5 + $0x1c14] ss:$8 sps:$4 sm:$0xff]  }
 0x3c2   :  { %7442 = vmatprep.subr.bf16.mxu1 %v10476_v19  ;;  %v10572_v19 = vld [vmem:[#allocation5 + $0x1d14] ss:$8 sps:$4 sm:$0xff]  }
 0x3c4   :  { %7400 = vmatpush1.bf16.msra.mxu0 %v10471_v20  ;;  %v10567_v20 = vld [vmem:[#allocation5 + $0x1c10] ss:$8 sps:$4 sm:$0xff]  }
 0x3c5   :  { %7443 = vmatpush1.bf16.msra.mxu1 %v10474_v21  ;;  %7401 = vmatprep.subr.bf16.mxu0 %v10479_v22  ;;  %v10570_v21 = vld [vmem:[#allocation5 + $0x1d10] ss:$8 sps:$4 sm:$0xff]   ;;  %v10575_v22 = vld [vmem:[#allocation5 + $0x1c04] ss:$8 sps:$4 sm:$0xff]  }
 0x3c6   :  { %7444 = vmatprep.subr.bf16.mxu1 %v10482_v23  ;;  %v10578_v23 = vld [vmem:[#allocation5 + $0x1d04] ss:$8 sps:$4 sm:$0xff]  }
 0x3c8   :  { %7402 = vmatpush2.bf16.msra.mxu0 %v10477_v24  ;;  %v10573_v24 = vld [vmem:[#allocation5 + $0x1c00] ss:$8 sps:$4 sm:$0xff]  }
 0x3c9   :  { %7445 = vmatpush2.bf16.msra.mxu1 %v10480_v25  ;;  %7403 = vmatprep.subr.bf16.mxu0 %v10485_v26  ;;  %v10576_v25 = vld [vmem:[#allocation5 + $0x1d00] ss:$8 sps:$4 sm:$0xff]   ;;  %v10581_v26 = vld [vmem:[#allocation5 + $0x1cf4] ss:$8 sps:$4 sm:$0xff]  }
 0x3ca   :  { %7446 = vmatprep.subr.bf16.mxu1 %v10488_v27  ;;  %v10584_v27 = vld [vmem:[#allocation5 + $0x1df4] ss:$8 sps:$4 sm:$0xff]  }
 0x3cc   :  { %7404 = vmatpush2.bf16.msra.mxu0 %v10483_v28  ;;  %v10579_v28 = vld [vmem:[#allocation5 + $0x1cf0] ss:$8 sps:$4 sm:$0xff]  }
 0x3cd   :  { %7447 = vmatpush2.bf16.msra.mxu1 %v10486_v29  ;;  %7405 = vmatprep.subr.bf16.mxu0 %v10491_v30  ;;  %v10582_v29 = vld [vmem:[#allocation5 + $0x1df0] ss:$8 sps:$4 sm:$0xff]   ;;  %v10587_v30 = vld [vmem:[#allocation5 + $0x1ce4] ss:$8 sps:$4 sm:$0xff]  }
 0x3ce   :  { %7448 = vmatprep.subr.bf16.mxu1 %v10494_v31  ;;  %v10590_v31 = vld [vmem:[#allocation5 + $0x1de4] ss:$8 sps:$4 sm:$0xff]  }
 0x3d0   :  { %7406 = vmatpush2.bf16.msra.mxu0 %v10489_v32  ;;  %v10585_v32 = vld [vmem:[#allocation5 + $0x1ce0] ss:$8 sps:$4 sm:$0xff]  }
 0x3d1   :  { %7449 = vmatpush2.bf16.msra.mxu1 %v10492_v33  ;;  %7407 = vmatprep.subr.bf16.mxu0 %v10497_v34  ;;  %v10588_v33 = vld [vmem:[#allocation5 + $0x1de0] ss:$8 sps:$4 sm:$0xff]   ;;  %v10593_v34 = vld [vmem:[#allocation5 + $0x1cd4] ss:$8 sps:$4 sm:$0xff]  }
 0x3d2   :  { %7450 = vmatprep.subr.bf16.mxu1 %v10500_v35  ;;  %v10596_v35 = vld [vmem:[#allocation5 + $0x1dd4] ss:$8 sps:$4 sm:$0xff]  }
 0x3d4   :  { %7408 = vmatpush2.bf16.msra.mxu0 %v10495_v36  ;;  %v10591_v36 = vld [vmem:[#allocation5 + $0x1cd0] ss:$8 sps:$4 sm:$0xff]  }
 0x3d5   :  { %7451 = vmatpush2.bf16.msra.mxu1 %v10498_v37  ;;  %7409 = vmatprep.subr.bf16.mxu0 %v10503_v38  ;;  %v10594_v37 = vld [vmem:[#allocation5 + $0x1dd0] ss:$8 sps:$4 sm:$0xff]   ;;  %v10599_v38 = vld [vmem:[#allocation5 + $0x1cc4] ss:$8 sps:$4 sm:$0xff]  }
 0x3d6   :  { %7452 = vmatprep.subr.bf16.mxu1 %v10506_v39  ;;  %v10602_v39 = vld [vmem:[#allocation5 + $0x1dc4] ss:$8 sps:$4 sm:$0xff]  }
 0x3d8   :  { %7410 = vmatpush2.bf16.msra.mxu0 %v10501_v40  ;;  %v10597_v40 = vld [vmem:[#allocation5 + $0x1cc0] ss:$8 sps:$4 sm:$0xff]  }
 0x3d9   :  { %7453 = vmatpush2.bf16.msra.mxu1 %v10504_v41  ;;  %7411 = vmatprep.subr.bf16.mxu0 %v10509_v42  ;;  %v10600_v41 = vld [vmem:[#allocation5 + $0x1dc0] ss:$8 sps:$4 sm:$0xff]   ;;  %v10605_v42 = vld [vmem:[#allocation5 + $0x1cb4] ss:$8 sps:$4 sm:$0xff]  }
 0x3da   :  { %7454 = vmatprep.subr.bf16.mxu1 %v10512_v43  ;;  %v10608_v43 = vld [vmem:[#allocation5 + $0x1db4] ss:$8 sps:$4 sm:$0xff]  }
 0x3dc   :  { %7412 = vmatpush2.bf16.msra.mxu0 %v10507_v44  ;;  %v10603_v44 = vld [vmem:[#allocation5 + $0x1cb0] ss:$8 sps:$4 sm:$0xff]  }
 0x3dd   :  { %7455 = vmatpush2.bf16.msra.mxu1 %v10510_v45  ;;  %7413 = vmatprep.subr.bf16.mxu0 %v10515_v46  ;;  %v10606_v45 = vld [vmem:[#allocation5 + $0x1db0] ss:$8 sps:$4 sm:$0xff]   ;;  %v10611_v46 = vld [vmem:[#allocation5 + $0x1ca4] ss:$8 sps:$4 sm:$0xff]  }
 0x3de   :  { %7456 = vmatprep.subr.bf16.mxu1 %v10518_v47  ;;  %v10614_v47 = vld [vmem:[#allocation5 + $0x1da4] ss:$8 sps:$4 sm:$0xff]  }
 0x3e0   :  { %7414 = vmatpush2.bf16.msra.mxu0 %v10513_v48  ;;  %v10609_v48 = vld [vmem:[#allocation5 + $0x1ca0] ss:$8 sps:$4 sm:$0xff]  }
 0x3e1   :  { %7457 = vmatpush2.bf16.msra.mxu1 %v10516_v49  ;;  %7415 = vmatprep.subr.bf16.mxu0 %v10521_v50  ;;  %v10612_v49 = vld [vmem:[#allocation5 + $0x1da0] ss:$8 sps:$4 sm:$0xff]   ;;  %v10617_v50 = vld [vmem:[#allocation5 + $0x1c94] ss:$8 sps:$4 sm:$0xff]  }
 0x3e2   :  { %7458 = vmatprep.subr.bf16.mxu1 %v10524_v51  ;;  %v10620_v51 = vld [vmem:[#allocation5 + $0x1d94] ss:$8 sps:$4 sm:$0xff]  }
 0x3e4   :  { %7416 = vmatpush2.bf16.msra.mxu0 %v10519_v52  ;;  %v10615_v52 = vld [vmem:[#allocation5 + $0x1c90] ss:$8 sps:$4 sm:$0xff]  }
 0x3e5   :  { %7459 = vmatpush2.bf16.msra.mxu1 %v10522_v53  ;;  %7471 = vmatprep.subr.bf16.mxu0 %v10533_v54  ;;  %v10618_v53 = vld [vmem:[#allocation5 + $0x1d90] ss:$8 sps:$4 sm:$0xff]   ;;  %v10623_v54 = vld [vmem:[#allocation5 + $0x1c84] ss:$8 sps:$4 sm:$0xff]  }
 0x3e6   :  { %7514 = vmatprep.subr.bf16.mxu1 %v10536_v55  ;;  %v10626_v55 = vld [vmem:[#allocation5 + $0x1d84] ss:$8 sps:$4 sm:$0xff]  }
 0x3e7   :  { %7418 = vmatmul.mubr.bf16.vlgmr.msra.gmra.mxu0 %v10525_v56  ;;  %v10621_v56 = vld [vmem:[#allocation5 + $0x1c80] ss:$8 sps:$4 sm:$0xff]  }
 0x3e8   :  { %7461 = vmatmul.mubr.bf16.vlgmr.msra.gmra.mxu1 %v10528_v57  ;;  %7472 = vmatpush1.bf16.msra.mxu0 %v10531_v58  ;;  %v10624_v57 = vld [vmem:[#allocation5 + $0x1d80] ss:$8 sps:$4 sm:$0xff]   ;;  %v10953_v58 = vpop.f32.mrf.mxu0 }
 0x3e9   :  { %7515 = vmatpush1.bf16.msra.mxu1 %v10534_v59  ;;  %7473 = vmatprep.subr.bf16.mxu0 %v10539_v60  ;;  %v10955_v59 = vpop.f32.mrf.mxu1  ;;  %v10627_v60 = vld [vmem:[#allocation2 + $0xe0] ss:$240 sps:$4 sm:$0xff]  }
 0x3ea   :  { %7516 = vmatprep.subr.bf16.mxu1 %v10542_v61  ;;  %7503 = vmatprep.mubr.bf16.mxu0 %v10629_v62  ;;  %v10630_v61 = vld [vmem:[#allocation2 + $0xe8] ss:$240 sps:$4 sm:$0xff]   ;;  %v10957_v62 = vpop.f32.mrf.mxu0 }
 0x3eb   :  { %7546 = vmatprep.mubr.bf16.mxu1 %v10632_v63  ;;  %v10959_v63 = vpop.f32.mrf.mxu1 }
 0x3ec   :  { %7474 = vmatpush1.bf16.msra.mxu0 %v10537_v0  ;;  %v10961_v0 = vpop.f32.mrf.mxu0 }
 0x3ed   :  { %7517 = vmatpush1.bf16.msra.mxu1 %v10540_v1  ;;  %7475 = vmatprep.subr.bf16.mxu0 %v10545_v2  ;;  %v10963_v1 = vpop.f32.mrf.mxu1 }
 0x3ee   :  { %7518 = vmatprep.subr.bf16.mxu1 %v10548_v3  ;;  %v10965_v2 = vpop.f32.mrf.mxu0 }
 0x3ef   :  { %v10967_v3 = vpop.f32.mrf.mxu1 }
 0x3f0   :  { %7476 = vmatpush1.bf16.msra.mxu0 %v10543_v4  ;;  %v10633_v4 = vld [vmem:[#allocation8 + $0x78] sm:$0xff]  }
 0x3f1   :  { %7519 = vmatpush1.bf16.msra.mxu1 %v10546_v5  ;;  %7477 = vmatprep.subr.bf16.mxu0 %v10551_v6  ;;  %v10634_v5 = vld [vmem:[#allocation8 + $0x38] sm:$0xff]   ;;  %v10635_v6 = vld [vmem:[#allocation8 + $0x70] sm:$0xff]  }
 0x3f2   :  { %7520 = vmatprep.subr.bf16.mxu1 %v10554_v7  ;;  %v10969_v7 = vpop.f32.mrf.mxu0 }
 0x3f4   :  { %7478 = vmatpush1.bf16.msra.mxu0 %v10549_v8  ;;  %v10971_v8 = vpop.f32.mrf.mxu1 }
 0x3f5   :  { %7521 = vmatpush1.bf16.msra.mxu1 %v10552_v9  ;;  %7479 = vmatprep.subr.bf16.mxu0 %v10557_v10  ;;  %v10636_v9 = vld [vmem:[#allocation8 + $0x30] sm:$0xff]   ;;  %v10637_v10 = vld [vmem:[#allocation8 + $0x68] sm:$0xff]  }
 0x3f6   :  { %7522 = vmatprep.subr.bf16.mxu1 %v10560_v11  ;;  %v10973_v11 = vpop.f32.mrf.mxu0 }
 0x3f8   :  { %7480 = vmatpush1.bf16.msra.mxu0 %v10555_v12  ;;  %v10975_v12 = vpop.f32.mrf.mxu1 }
 0x3f9   :  { %7523 = vmatpush1.bf16.msra.mxu1 %v10558_v13  ;;  %7481 = vmatprep.subr.bf16.mxu0 %v10563_v14  ;;  %v10638_v13 = vld [vmem:[#allocation8 + $0x28] sm:$0xff]   ;;  %v10639_v14 = vld [vmem:[#allocation8 + $0x60] sm:$0xff]  }
 0x3fa   :  { %7524 = vmatprep.subr.bf16.mxu1 %v10566_v15  ;;  %v10977_v15 = vpop.f32.mrf.mxu0 }
 0x3fc   :  { %7482 = vmatpush1.bf16.msra.mxu0 %v10561_v16  ;;  %v10979_v16 = vpop.f32.mrf.mxu1 }
 0x3fd   :  { %7525 = vmatpush1.bf16.msra.mxu1 %v10564_v17  ;;  %7483 = vmatprep.subr.bf16.mxu0 %v10569_v18  ;;  %v10640_v17 = vld [vmem:[#allocation8 + $0x20] sm:$0xff]   ;;  %v10981_v18 = vpop.f32.mrf.mxu0 }
 0x3fe   :  { %7526 = vmatprep.subr.bf16.mxu1 %v10572_v19  ;;  %v10983_v19 = vpop.f32.mrf.mxu1 }
 0x400   :  { %7484 = vmatpush1.bf16.msra.mxu0 %v10567_v20  ;;  %v10985_v20 = vpop.f32.mrf.mxu0 }
 0x401   :  { %7527 = vmatpush1.bf16.msra.mxu1 %v10570_v21  ;;  %7485 = vmatprep.subr.bf16.mxu0 %v10575_v22  ;;  %v10987_v21 = vpop.f32.mrf.mxu1 }
 0x402   :  { %7528 = vmatprep.subr.bf16.mxu1 %v10578_v23  ;;  %v10989_v22 = vpop.f32.mrf.mxu0 }
 0x403   :  { %v10991_v23 = vpop.f32.mrf.mxu1 }
 0x404   :  { %7486 = vmatpush1.bf16.msra.mxu0 %v10573_v24  ;;  %v10993_v24 = vpop.f32.mrf.mxu0 }
 0x405   :  { %7529 = vmatpush1.bf16.msra.mxu1 %v10576_v25  ;;  %7487 = vmatprep.subr.bf16.mxu0 %v10581_v26  ;;  %v10995_v25 = vpop.f32.mrf.mxu1 }
 0x406   :  { %7530 = vmatprep.subr.bf16.mxu1 %v10584_v27  ;;  %v10997_v26 = vpop.f32.mrf.mxu0 }
 0x407   :  { %v10999_v27 = vpop.f32.mrf.mxu1 }
 0x408   :  { %7488 = vmatpush2.bf16.msra.mxu0 %v10579_v28  ;;  %v11001_v28 = vpop.f32.mrf.mxu0 }
 0x409   :  { %7531 = vmatpush2.bf16.msra.mxu1 %v10582_v29  ;;  %7489 = vmatprep.subr.bf16.mxu0 %v10587_v30  ;;  %v11003_v29 = vpop.f32.mrf.mxu1 }
 0x40a   :  { %7532 = vmatprep.subr.bf16.mxu1 %v10590_v31  ;;  %v11005_v30 = vpop.f32.mrf.mxu0 }
 0x40b   :  { %v11007_v31 = vpop.f32.mrf.mxu1 }
 0x40c   :  { %7490 = vmatpush2.bf16.msra.mxu0 %v10585_v32  ;;  %v11009_v32 = vpop.f32.mrf.mxu0 }
 0x40d   :  { %7533 = vmatpush2.bf16.msra.mxu1 %v10588_v33  ;;  %7491 = vmatprep.subr.bf16.mxu0 %v10593_v34  ;;  %v11011_v33 = vpop.f32.mrf.mxu1 }
 0x40e   :  { %7534 = vmatprep.subr.bf16.mxu1 %v10596_v35  ;;  %v11013_v34 = vpop.f32.mrf.mxu0 }
 0x40f   :  { %v11015_v35 = vpop.f32.mrf.mxu1 }
 0x410   :  { %7492 = vmatpush2.bf16.msra.mxu0 %v10591_v36  ;;  %v11017_v36 = vpop.f32.mrf.mxu0 }
 0x411   :  { %7535 = vmatpush2.bf16.msra.mxu1 %v10594_v37  ;;  %7493 = vmatprep.subr.bf16.mxu0 %v10599_v38  ;;  %v11019_v37 = vpop.f32.mrf.mxu1 }
 0x412   :  { %7536 = vmatprep.subr.bf16.mxu1 %v10602_v39  ;;  %v11021_v38 = vpop.f32.mrf.mxu0 }
 0x413   :  { %v11023_v39 = vpop.f32.mrf.mxu1 }
 0x414   :  { %7494 = vmatpush2.bf16.msra.mxu0 %v10597_v40  ;;  %v11025_v40 = vpop.f32.mrf.mxu0 }
 0x415   :  { %7537 = vmatpush2.bf16.msra.mxu1 %v10600_v41  ;;  %7495 = vmatprep.subr.bf16.mxu0 %v10605_v42  ;;  %v11027_v41 = vpop.f32.mrf.mxu1  ;;  %v10641_v42 = vld [vmem:[#allocation8 + $0x58] sm:$0xff]  }
 0x416   :  { %7538 = vmatprep.subr.bf16.mxu1 %v10608_v43  ;;  %v10642_v43 = vld [vmem:[#allocation8 + $0x18] sm:$0xff]  }
 0x418   :  { %7496 = vmatpush2.bf16.msra.mxu0 %v10603_v44  ;;  %v11029_v44 = vpop.f32.mrf.mxu0 }
 0x419   :  { %7539 = vmatpush2.bf16.msra.mxu1 %v10606_v45  ;;  %7497 = vmatprep.subr.bf16.mxu0 %v10611_v46  ;;  %v11031_v45 = vpop.f32.mrf.mxu1 }
 0x41a   :  { %7540 = vmatprep.subr.bf16.mxu1 %v10614_v47  ;;  %v11033_v46 = vpop.f32.mrf.mxu0 }
 0x41b   :  { %v11035_v47 = vpop.f32.mrf.mxu1 }
 0x41c   :  { %7498 = vmatpush2.bf16.msra.mxu0 %v10609_v48  ;;  %v10643_v48 = vld [vmem:[#allocation8 + $0x50] sm:$0xff]  }
 0x41d   :  { %7541 = vmatpush2.bf16.msra.mxu1 %v10612_v49  ;;  %7499 = vmatprep.subr.bf16.mxu0 %v10617_v50  ;;  %v10644_v49 = vld [vmem:[#allocation8 + $0x10] sm:$0xff]   ;;  %v11037_v50 = vpop.f32.mrf.mxu0 }
 0x41e   :  { %7542 = vmatprep.subr.bf16.mxu1 %v10620_v51  ;;  %v11039_v51 = vpop.f32.mrf.mxu1 }
 0x420   :  { %7500 = vmatpush2.bf16.msra.mxu0 %v10615_v52  ;;  %v10645_v52 = vld [vmem:[#allocation8 + $0x48] sm:$0xff]  }
 0x421   :  { %7543 = vmatpush2.bf16.msra.mxu1 %v10618_v53  ;;  %7501 = vmatprep.subr.bf16.mxu0 %v10623_v54  ;;  %v10646_v53 = vld [vmem:[#allocation8 + $0x8] sm:$0xff]   ;;  %v11041_v54 = vpop.f32.mrf.mxu0 }
 0x422   :  { %7544 = vmatprep.subr.bf16.mxu1 %v10626_v55  ;;  %v11043_v55 = vpop.f32.mrf.mxu1 }
 0x424   :  { %7502 = vmatpush2.bf16.msra.mxu0 %v10621_v56  ;;  %v10647_v56 = vld [vmem:[#allocation8 + $0x40] sm:$0xff]  }
 0x425   :  { %7545 = vmatpush2.bf16.msra.mxu1 %v10624_v57  ;;  %9018 = vmatprep.subr.bf16.mxu0 %v10633_v4  ;;  %v10648_v57 = vld [vmem:[#allocation8] sm:$0xff]  }
 0x427   :  { %7504 = vmatmul.mubr.bf16.vlgmr.msra.gmra.mxu0 %v10627_v60  ;;  %v11045_v60 = vpop.f32.mrf.mxu0 }
 0x428   :  { %7547 = vmatmul.mubr.bf16.vlgmr.msra.gmra.mxu1 %v10630_v61  ;;  %9019 = vmatpush3.bf16.msra.mxu0 %v10634_v5  ;;  %v11047_v61 = vpop.f32.mrf.mxu1 }
 0x429   :  { %9020 = vmatprep.subr.bf16.mxu0 %v10635_v6  ;;  %11258 = vst [vmem:[#allocation23_spill] sm:$0xff] %v11047_v61  ;;  %v11049_v4 = vpop.f32.mrf.mxu0  ;;  %v10649_v6 = vld [vmem:[%s11251_s5 + $0x38] sm:$0xff]  }
 0x42a   :  { %v11051_v5 = vpop.f32.mrf.mxu1 }
 0x42b   :  { %11259 = vst [vmem:[#allocation24_spill] sm:$0xff] %v11051_v5 }
 0x42c   :  { %9021 = vmatpush3.bf16.msra.mxu0 %v10636_v9  ;;  %v11256_v9 = vmov 0.0  }
 0x42d   :  { %9022 = vmatprep.subr.bf16.mxu0 %v10637_v10  ;;  %9054 = vmatprep.subr.bf16.mxu1 %v11256_v9  ;;  %v10650_v10 = vld [vmem:[%s11251_s5 + $0x30] sm:$0xff]  }
 0x42e   :  { %9055 = vmatpush3.bf16.msra.mxu1 %v10649_v6 }
 0x42f   :  { %9056 = vmatprep.subr.bf16.mxu1 %v11256_v9 }
 0x430   :  { %9023 = vmatpush3.bf16.msra.mxu0 %v10638_v13  ;;  %v11062_v13 = vpop.f32.mrf.mxu0 }
 0x431   :  { %9024 = vmatprep.subr.bf16.mxu0 %v10639_v14  ;;  %v11064_v14 = vpop.f32.mrf.mxu1 }
 0x432   :  { %11260 = vst [vmem:[#allocation25_spill] sm:$0xff] %v11064_v14  ;;  %9057 = vmatpush3.bf16.msra.mxu1 %v10650_v10  ;;  %v1155_v14 = vld [vmem:[#allocation7] sm:$0x3] }
 0x433   :  { %9058 = vmatprep.subr.bf16.mxu1 %v11256_v9 }
 0x434   :  { %9025 = vmatpush3.bf16.msra.mxu0 %v10640_v17  ;;  %v10651_v17 = vld [vmem:[%s11251_s5 + $0x28] sm:$0xff]  }
 0x435   :  { %9026 = vmatprep.subr.bf16.mxu0 %v10641_v42  ;;  %v11070_v42 = vpop.f32.mrf.mxu0 }
 0x436   :  { %11261 = vst [vmem:[#allocation26_spill] sm:$0xff] %v11070_v42  ;;  %9059 = vmatpush3.bf16.msra.mxu1 %v10651_v17 }
 0x437   :  { %9060 = vmatprep.subr.bf16.mxu1 %v11256_v9 }
 0x438   :  { %9027 = vmatpush3.bf16.msra.mxu0 %v10642_v43  ;;  %v11072_v43 = vpop.f32.mrf.mxu1 }
 0x439   :  { %9028 = vmatprep.subr.bf16.mxu0 %v10643_v48  ;;  %11262 = vst [vmem:[#allocation27_spill] sm:$0xff] %v11072_v43  ;;  %v10652_v48 = vld [vmem:[%s11251_s5 + $0x20] sm:$0xff]  }
 0x43a   :  { %9061 = vmatpush3.bf16.msra.mxu1 %v10652_v48 }
 0x43b   :  { %9062 = vmatprep.subr.bf16.mxu1 %v11256_v9 }
 0x43c   :  { %9029 = vmatpush3.bf16.msra.mxu0 %v10644_v49  ;;  %v11078_v49 = vpop.f32.mrf.mxu0 }
 0x43d   :  { %9030 = vmatprep.subr.bf16.mxu0 %v10645_v52  ;;  %11263 = vst [vmem:[#allocation28_spill] sm:$0xff] %v11078_v49  ;;  %v11080_v52 = vpop.f32.mrf.mxu1 }
 0x43e   :  { %11264 = vst [vmem:[#allocation29_spill] sm:$0xff] %v11080_v52 }
 0x440   :  { %9031 = vmatpush3.bf16.msra.mxu0 %v10646_v53  ;;  %v11082_v53 = vpop.f32.mrf.mxu0 }
 0x441   :  { %9032 = vmatprep.subr.bf16.mxu0 %v10647_v56  ;;  %11265 = vst [vmem:[#allocation30_spill] sm:$0xff] %v11082_v53  ;;  %v11084_v56 = vpop.f32.mrf.mxu1 }
 0x442   :  { %11266 = vst [vmem:[#allocation31_spill] sm:$0xff] %v11084_v56  ;;  %v11087_v6 = vpop.f32.mrf.mxu0 }
 0x443   :  { %v11089_v10 = vpop.f32.mrf.mxu1 }
 0x444   :  { %9033 = vmatpush3.bf16.msra.mxu0 %v10648_v57  ;;  %v1157_v57 = vlaneseq  ;;  %11267 = vst [vmem:[#allocation32_spill] sm:$0xff] %v11089_v10  ;;  %v11091_v43 = vpop.f32.mrf.mxu0 }
 0x445   :  { %9074 = vmatprep.subr.bf16.mxu0 %v11256_v9  ;;  %11268 = vst [vmem:[#allocation33_spill] sm:$0xff] %v11091_v43  ;;  %v11093_v5 = vpop.f32.mrf.mxu1 }
 0x446   :  { %v1158_v17 = vshrl.u32 %v1157_v57, 7  ;;  %11269 = vst [vmem:[#allocation34_spill] sm:$0xff] %v11093_v5  ;;  %v11095_v42 = vpop.f32.mrf.mxu0 }
 0x447   :  { %11270 = vst [vmem:[#allocation35_spill] sm:$0xff] %v11095_v42  ;;  %v11097_v53 = vpop.f32.mrf.mxu1 }
 0x448   :  { %v1163_v49 = vsub.s32 1, %v1158_v17  ;;  %v1159_v52 = vsub.s32 0, %v1158_v17  ;;  %11271 = vst [vmem:[#allocation36_spill] sm:$0xff] %v11097_v53  ;;  %v11099_v61 = vpop.f32.mrf.mxu0 }
 0x449   :  { %v11101_v9 = vpop.f32.mrf.mxu1 }
 0x44a   :  { %v1164_v48 = vrot.slane %v1155_v14, %v1163_v49  ;;  %v1160_v56 = vrot.slane %v1155_v14, %v1159_v52  ;;  %11272 = vst [vmem:[#allocation37_spill] sm:$0xff] %v11101_v9  ;;  %v11105_v43 = vpop.f32.mrf.mxu0 }
 0x44b   :  { %v11107_v5 = vpop.f32.mrf.mxu1 }
 0x44c   :  { %v6304_v10 = vadd.f32 %v10957_v62, %v1164_v48  ;;  %v6302_v57 = vadd.f32 %v10953_v58, %v1160_v56  ;;  %11273 = vst [vmem:[#allocation38_spill] sm:$0xff] %v11107_v5  ;;  %v6306_v17 = vadd.f32 %v10961_v0, %v1160_v56  ;;  %v6308_v53 = vadd.f32 %v10965_v2, %v1164_v48  ;;  %v11113_v49 = vpop.f32.mrf.mxu0 }
 0x44d   :  { %v11115_v52 = vpop.f32.mrf.mxu1 }
 0x44e   :  { %v6347_v42 = vadd.f32 %v10959_v63, %v6304_v10  ;;  %v6345_v14 = vadd.f32 %v10955_v59, %v6302_v57  ;;  %v6349_v62 = vadd.f32 %v10963_v1, %v6306_v17  ;;  %v6351_v5 = vadd.f32 %v10967_v3, %v6308_v53  ;;  %v11122_v56 = vpop.f32.mrf.mxu0 }
 0x44f   :  { %v11124_v63 = vpop.f32.mrf.mxu1 }
 0x450   :  { %v6390_v58 = vadd.f32 %v10973_v11, %v6347_v42  ;;  %v6388_v9 = vadd.f32 %v10969_v7, %v6345_v14  ;;  %v6392_v0 = vadd.f32 %v10977_v15, %v6349_v62  ;;  %v6394_v2 = vadd.f32 %v10981_v18, %v6351_v5  ;;  %v11129_v48 = vpop.f32.mrf.mxu0 }
 0x451   :  { %v11131_v1 = vpop.f32.mrf.mxu1 }
 0x452   :  { %v6433_v59 = vadd.f32 %v10975_v12, %v6390_v58  ;;  %v6431_v10 = vadd.f32 %v10971_v8, %v6388_v9  ;;  %v6435_v7 = vadd.f32 %v10979_v16, %v6392_v0  ;;  %v6437_v15 = vadd.f32 %v10983_v19, %v6394_v2  ;;  %v11138_v53 = vpop.f32.mrf.mxu0 }
 0x453   :  { %v11140_v12 = vpop.f32.mrf.mxu1 }
 0x454   :  { %v6476_v3 = vadd.f32 %v10989_v22, %v6433_v59  ;;  %v6474_v11 = vadd.f32 %v10985_v20, %v6431_v10  ;;  %v6478_v42 = vadd.f32 %v10993_v24, %v6435_v7  ;;  %v6480_v18 = vadd.f32 %v10997_v26, %v6437_v15  ;;  %v11148_v9 = vpop.f32.mrf.mxu0  ;;  %v11275_v15 = vld [vmem:[#allocation26_spill] sm:$0xff] }
 0x455   :  { %v11150_v19 = vpop.f32.mrf.mxu1 }
 0x456   :  { %v6519_v8 = vadd.f32 %v10991_v23, %v6476_v3  ;;  %v6517_v5 = vadd.f32 %v10987_v21, %v6474_v11  ;;  %v6521_v16 = vadd.f32 %v10995_v25, %v6478_v42  ;;  %v6523_v24 = vadd.f32 %v10999_v27, %v6480_v18  ;;  %v11157_v17 = vpop.f32.mrf.mxu0  ;;  %v11274_v11 = vld [vmem:[#allocation23_spill] sm:$0xff]  ;;  %v11276_v18 = vld [vmem:[#allocation25_spill] sm:$0xff] }
 0x457   :  { %v11159_v25 = vpop.f32.mrf.mxu1 }
 0x458   :  { %v6562_v22 = vadd.f32 %v11005_v30, %v6519_v8  ;;  %v6560_v20 = vadd.f32 %v11001_v28, %v6517_v5  ;;  %v6564_v57 = vadd.f32 %v11009_v32, %v6521_v16  ;;  %v6566_v26 = vadd.f32 %v11013_v34, %v6523_v24  ;;  %v11164_v62 = vpop.f32.mrf.mxu0  ;;  %v11277_v5 = vld [vmem:[#allocation28_spill] sm:$0xff] }
 0x459   :  { %v11166_v27 = vpop.f32.mrf.mxu1  ;;  %v11278_v16 = vld [vmem:[#allocation24_spill] sm:$0xff] }
 0x45a   :  { %v6605_v23 = vadd.f32 %v11007_v31, %v6562_v22  ;;  %v6603_v21 = vadd.f32 %v11003_v29, %v6560_v20  ;;  %v6607_v28 = vadd.f32 %v11011_v33, %v6564_v57  ;;  %v6609_v31 = vadd.f32 %v11015_v35, %v6566_v26  ;;  %v7163_v0 = vpop.f32.mrf.mxu0  ;;  %v11279_v22 = vld [vmem:[#allocation27_spill] sm:$0xff]  ;;  %v11280_v20 = vld [vmem:[#allocation30_spill] sm:$0xff] }
 0x45b   :  { %v11173_v33 = vpop.f32.mrf.mxu1 }
 0x45c   :  { %v6648_v30 = vadd.f32 %v11021_v38, %v6605_v23  ;;  %v6646_v14 = vadd.f32 %v11017_v36, %v6603_v21  ;;  %v6650_v32 = vadd.f32 %v11025_v40, %v6607_v28  ;;  %v6652_v34 = vadd.f32 %v11029_v44, %v6609_v31  ;;  %v7165_v40 = vpop.f32.mrf.mxu0  ;;  %v11281_v23 = vld [vmem:[#allocation29_spill] sm:$0xff]  ;;  %v11284_v31 = vld [vmem:[#allocation35_spill] sm:$0xff] }
 0x45d   :  { %v7208_v10 = vpop.f32.mrf.mxu1  ;;  %v11282_v21 = vld [vmem:[#allocation33_spill] sm:$0xff] }
 0x45e   :  { %v6691_v29 = vadd.f32 %v11023_v39, %v6648_v30  ;;  %v6689_v58 = vadd.f32 %v11019_v37, %v6646_v14  ;;  %v6693_v38 = vadd.f32 %v11027_v41, %v6650_v32  ;;  %v6695_v2 = vadd.f32 %v11031_v45, %v6652_v34  ;;  %v7167_v3 = vpop.f32.mrf.mxu0  ;;  %v11283_v30 = vld [vmem:[#allocation32_spill] sm:$0xff] }
 0x460   :  { %v6734_v36 = vadd.f32 %v11037_v50, %v6691_v29  ;;  %v6732_v59 = vadd.f32 %v11033_v46, %v6689_v58  ;;  %v6736_v35 = vadd.f32 %v11041_v54, %v6693_v38  ;;  %v6738_v44 = vadd.f32 %v11045_v60, %v6695_v2  ;;  %v7210_v46 = vpop.f32.mrf.mxu1  ;;  %v7247_v42 = vpop.f32.mrf.mxu0  ;;  %v11285_v29 = vld [vmem:[#allocation31_spill] sm:$0xff] }
 0x462   :  { %v6777_v39 = vadd.f32 %v11039_v51, %v6734_v36  ;;  %v6775_v37 = vadd.f32 %v11035_v47, %v6732_v59  ;;  %v6779_v7 = vadd.f32 %v11043_v55, %v6736_v35  ;;  %v6781_v45 = vadd.f32 %v11274_v11, %v6738_v44  ;;  %v7290_v8 = vpop.f32.mrf.mxu1  ;;  %v7249_v24 = vpop.f32.mrf.mxu0  ;;  %v11286_v36 = vld [vmem:[#allocation34_spill] sm:$0xff]  ;;  %v11287_v35 = vld [vmem:[#allocation36_spill] sm:$0xff] }
 0x464   :  { %v6820_v41 = vadd.f32 %v11062_v13, %v6777_v39  ;;  %v6818_v50 = vadd.f32 %v11049_v4, %v6775_v37  ;;  %v6822_v54 = vadd.f32 %v11275_v15, %v6779_v7  ;;  %v6824_v60 = vadd.f32 %v11277_v5, %v6781_v45  ;;  %v7292_v57 = vpop.f32.mrf.mxu1  ;;  %v7251_v58 = vpop.f32.mrf.mxu0  ;;  %v11289_v45 = vld [vmem:[#allocation37_spill] sm:$0xff] }
 0x466   :  { %v6863_v51 = vadd.f32 %v11276_v18, %v6820_v41  ;;  %v6861_v47 = vadd.f32 %v11278_v16, %v6818_v50  ;;  %v6865_v55 = vadd.f32 %v11279_v22, %v6822_v54  ;;  %v6867_v26 = vadd.f32 %v11281_v23, %v6824_v60  ;;  %v7294_v38 = vpop.f32.mrf.mxu1  ;;  %v7253_v37 = vpop.f32.mrf.mxu0  ;;  %v11288_v41 = vld [vmem:[#allocation38_spill] sm:$0xff] }
 0x468   :  { %v6906_v13 = vadd.f32 %v11087_v6, %v6863_v51  ;;  %v6904_v4 = vadd.f32 %v11280_v20, %v6861_v47  ;;  %v6908_v28 = vadd.f32 %v11282_v21, %v6865_v55  ;;  %v6910_v32 = vadd.f32 %v11284_v31, %v6867_v26  ;;  %v7296_v7 = vpop.f32.mrf.mxu1  ;;  %v7333_v54 = vpop.f32.mrf.mxu0 }
 0x46a   :  { %v6949_v14 = vadd.f32 %v11283_v30, %v6906_v13  ;;  %v6947_v34 = vadd.f32 %v11285_v29, %v6904_v4  ;;  %v6951_v59 = vadd.f32 %v11286_v36, %v6908_v28  ;;  %v6953_v39 = vadd.f32 %v11287_v35, %v6910_v32  ;;  %v7376_v18 = vpop.f32.mrf.mxu1  ;;  %v7335_v60 = vpop.f32.mrf.mxu0 }
 0x46c   :  { %v6992_v6 = vadd.f32 %v11105_v43, %v6949_v14  ;;  %v6990_v2 = vadd.f32 %v11099_v61, %v6947_v34  ;;  %v6994_v44 = vadd.f32 %v11113_v49, %v6951_v59  ;;  %v6996_v11 = vadd.f32 %v11122_v56, %v6953_v39  ;;  %v7378_v16 = vpop.f32.mrf.mxu1 }
 0x46e   :  { %v7035_v50 = vadd.f32 %v11288_v41, %v6992_v6  ;;  %v7033_v15 = vadd.f32 %v11289_v45, %v6990_v2  ;;  %v7037_v51 = vadd.f32 %v11115_v52, %v6994_v44  ;;  %v7039_v5 = vadd.f32 %v11124_v63, %v6996_v11  ;;  %v7380_v20 = vpop.f32.mrf.mxu1 }
 0x470   :  { %v7078_v43 = vadd.f32 %v11138_v53, %v7035_v50  ;;  %v7076_v61 = vadd.f32 %v11129_v48, %v7033_v15  ;;  %v7080_v49 = vadd.f32 %v11148_v9, %v7037_v51  ;;  %v7082_v56 = vadd.f32 %v11157_v17, %v7039_v5  ;;  %v7337_v53 = vpop.f32.mrf.mxu0  ;;  %v7382_v26 = vpop.f32.mrf.mxu1 }
 0x472   :  { %v7121_v47 = vadd.f32 %v11140_v12, %v7078_v43  ;;  %v7119_v22 = vadd.f32 %v11131_v1, %v7076_v61  ;;  %v7123_v55 = vadd.f32 %v11150_v19, %v7080_v49  ;;  %v7125_v48 = vadd.f32 %v11159_v25, %v7082_v56  ;;  %v7339_v12 = vpop.f32.mrf.mxu0 }
 0x474   :  { %v7164_v13 = vadd.f32 %v7163_v0, %v7121_v47  ;;  %v7162_v52 = vadd.f32 %v11164_v62, %v7119_v22  ;;  %v7166_v63 = vadd.f32 %v7165_v40, %v7123_v55  ;;  %v7168_v4 = vadd.f32 %v7167_v3, %v7125_v48 }
 0x475   :  { %v11290_v48 = vmov 0.0  }
 0x476   :  { %v7207_v9 = vadd.f32 %v11173_v33, %v7164_v13  ;;  %v7205_v23 = vadd.f32 %v11166_v27, %v7162_v52  ;;  %v7209_v17 = vadd.f32 %v7208_v10, %v7166_v63  ;;  %v7211_v0 = vadd.f32 %v7210_v46, %v7168_v4  ;;  %v10654_v63 = vld [vmem:[%s11251_s5 + $0x10] sm:$0xff]   ;;  %v10656_v4 = vld [vmem:[%s11251_s5] sm:$0xff]   ;;  %9070 = vmatprep.mubr.msk.bf16.mxu1 %vm10868_vm0, %v11290_v48 }
 0x478   :  { %v7250_v21 = vadd.f32 %v7249_v24, %v7207_v9  ;;  %v7248_v1 = vadd.f32 %v7247_v42, %v7205_v23  ;;  %v7252_v30 = vadd.f32 %v7251_v58, %v7209_v17  ;;  %v7254_v14 = vadd.f32 %v7253_v37, %v7211_v0  ;;  %v10655_v9 = vld [vmem:[%s11251_s5 + $0x8] sm:$0xff]   ;;  %v10657_v23 = vld [vmem:[#allocation13 + $0x18] sm:$0xff]  }
 0x47a   :  { %v7293_v62 = vadd.f32 %v7292_v57, %v7250_v21  ;;  %v7291_v31 = vadd.f32 %v7290_v8, %v7248_v1  ;;  %v7295_v40 = vadd.f32 %v7294_v38, %v7252_v30  ;;  %v7297_v3 = vadd.f32 %v7296_v7, %v7254_v14  ;;  %v8986_v21 = vld [vmem:[#allocation10] ss:$0 sm:$0xff] }
 0x47c   :  { %v7336_v29 = vadd.f32 %v7335_v60, %v7293_v62  ;;  %v7334_v33 = vadd.f32 %v7333_v54, %v7291_v31  ;;  %v7338_v34 = vadd.f32 %v7337_v53, %v7295_v40  ;;  %v7340_v10 = vadd.f32 %v7339_v12, %v7297_v3  ;;  %v10660_v40 = vld [vmem:[#allocation13] sm:$0xff]  }
 0x47e   :  { %v7379_v59 = vadd.f32 %v7378_v16, %v7336_v29  ;;  %v7377_v24 = vadd.f32 %v7376_v18, %v7334_v33  ;;  %v7381_v42 = vadd.f32 %v7380_v20, %v7338_v34  ;;  %v7383_v57 = vadd.f32 %v7382_v26, %v7340_v10  ;;  %v10653_v20 = vld [vmem:[%s11251_s5 + $0x18] sm:$0xff]   ;;  %v9003_v29 = vld [vmem:[#allocation11] ss:$0 sm:$0xff]  ;;  %s10869_s5 = smov [#allocation16]  }
 0x47f   :  { %9063 = vmatpush3.bf16.msra.mxu1 %v10653_v20  ;;  %s7950_s25 = sshll.u32 %s10869_s5, 4  ;;  %s7951_s25 = int_to_ptr.vmem [resolvable:$true] %s7950_s25 }
 0x480   :  { %9064 = vmatprep.subr.bf16.mxu1 %v11290_v48  ;;  %s10821_s26 = scalar_lea.vmem %s7951_s25, 256  ;;  %p10826_p13 = scmp.lt.s32.totalorder %s7951_s25, %s7951_s25 }
 0x481   :  { %p10822_p12 = scmp.ne.s32.totalorder %s7951_s25, %s10821_s26  ;;  %p10827_p0 = scmp.lt.s32.totalorder %s10821_s26, %s10821_s26 }
 0x483   :  { %9065 = vmatpush3.bf16.msra.mxu1 %v10654_v63  ;;  %p10828_p1 = por %p10827_p0, %p10826_p13 }
 0x484   :  { %9066 = vmatprep.subr.bf16.mxu1 %v11290_v48 }
 0x485   :  { %p10829_p2 = pnand %p10828_p1, %p10822_p12 }
 0x487   :  { %9067 = vmatpush3.bf16.msra.mxu1 %v10655_v9 }
 0x488   :  { %9068 = vmatprep.subr.bf16.mxu1 %v11290_v48 }
 0x48b   :  { %9069 = vmatpush3.bf16.msra.mxu1 %v10656_v4 }
 0x4a7   :  { %v7419_v28 = vpop.f32.mrf.mxu0 }
 0x4a8   :  { %v7462_v19 = vpop.f32.mrf.mxu1  ;;  %v7420_v2 = vadd.f32 %v7419_v28, %v7377_v24 }
 0x4a9   :  { %v7421_v32 = vpop.f32.mrf.mxu0 }
 0x4aa   :  { %v7464_v25 = vpop.f32.mrf.mxu1  ;;  %v7422_v6 = vadd.f32 %v7421_v32, %v7379_v59  ;;  %v7463_v37 = vadd.f32 %v7462_v19, %v7420_v2  ;;  %v10658_v32 = vld [vmem:[#allocation13 + $0x10] sm:$0xff]  }
 0x4ab   :  { %v7423_v27 = vpop.f32.mrf.mxu0 }
 0x4ac   :  { %v7466_v36 = vpop.f32.mrf.mxu1  ;;  %v7424_v35 = vadd.f32 %v7423_v27, %v7381_v42  ;;  %v7465_v44 = vadd.f32 %v7464_v25, %v7422_v6  ;;  %v10659_v25 = vld [vmem:[#allocation13 + $0x8] sm:$0xff]   ;;  %v9012_v6 = vld [vmem:[#allocation14] ss:$0 sm:$0xff] }
 0x4ad   :  { %v7425_v46 = vpop.f32.mrf.mxu0 }
 0x4ae   :  { %v7468_v58 = vpop.f32.mrf.mxu1  ;;  %v7426_v38 = vadd.f32 %v7425_v46, %v7383_v57  ;;  %v7467_v50 = vadd.f32 %v7466_v36, %v7424_v35 }
 0x4b0   :  { %v7469_v18 = vadd.f32 %v7468_v58, %v7426_v38 }
 0x4e7   :  { %v7505_v8 = vpop.f32.mrf.mxu0 }
 0x4e8   :  { %v7548_v39 = vpop.f32.mrf.mxu1  ;;  %v7506_v45 = vadd.f32 %v7505_v8, %v7463_v37 }
 0x4e9   :  { %v7507_v41 = vpop.f32.mrf.mxu0 }
 0x4ea   :  { %v7550_v7 = vpop.f32.mrf.mxu1  ;;  %v7508_v11 = vadd.f32 %v7507_v41, %v7465_v44  ;;  %v7549_v60 = vadd.f32 %v7548_v39, %v7506_v45 }
 0x4eb   :  { %v7509_v15 = vpop.f32.mrf.mxu0 }
 0x4ec   :  { %v7552_v54 = vpop.f32.mrf.mxu1  ;;  %v7510_v51 = vadd.f32 %v7509_v15, %v7467_v50  ;;  %v7551_v61 = vadd.f32 %v7550_v7, %v7508_v11  ;;  %v7557_v13 = vmax.f32 %v7549_v60, 0.0 }
 0x4ed   :  { %v7511_v43 = vpop.f32.mrf.mxu0 }
 0x4ee   :  { %v7553_v5 = vadd.f32 %v7552_v54, %v7510_v51  ;;  %v7512_v49 = vadd.f32 %v7511_v43, %v7469_v18  ;;  %v7554_v16 = vpop.f32.mrf.mxu1  ;;  %v7558_v22 = vmax.f32 %v7551_v61, 0.0 }
 0x4f0   :  { %v7555_v47 = vadd.f32 %v7554_v16, %v7512_v49  ;;  %v7559_v56 = vmax.f32 %v7553_v5, 0.0 }
 0x4f2   :  { %v7560_v55 = vmax.f32 %v7555_v47, 0.0  ;;  %v7561_v53 = vpack.c.bf16 %v7559_v56, %v7557_v13 }
 0x4f4   :  { %v7562_v52 = vpack.c.bf16 %v7560_v55, %v7558_v22 }
 0x4f6   :  { %7730 = vmatprep.mubr.bf16.mxu0 %v7562_v52 }
 0x4f7   :  { %7731 = vmatmul.mubr.bf16.vlgmr.msra.gmra.mxu0 %v7561_v53 }
 0x4f8   :  { %9082 = vmatprep.mubr.msk.bf16.mxu0 %vm10868_vm0, %v11290_v48  ;;  %9075 = vmatpush3.bf16.msra.mxu0 %v10657_v23 }
 0x4f9   :  { %9076 = vmatprep.subr.bf16.mxu0 %v11290_v48 }
 0x4fc   :  { %9077 = vmatpush3.bf16.msra.mxu0 %v10658_v32 }
 0x4fd   :  { %9078 = vmatprep.subr.bf16.mxu0 %v11290_v48 }
 0x500   :  { %9079 = vmatpush3.bf16.msra.mxu0 %v10659_v25 }
 0x501   :  { %9080 = vmatprep.subr.bf16.mxu0 %v11290_v48 }
 0x504   :  { %9081 = vmatpush3.bf16.msra.mxu0 %v10660_v40 }
 0x5b7   :  { %v9034_v12 = vpop.f32.mrf.mxu0 }
 0x5b9   :  { %v9035_v26 = vpop.f32.mrf.mxu0 }
 0x5ba   :  { %v9036_v17 = vadd.f32 %v9035_v26, %v9034_v12 }
 0x5bb   :  { %v9037_v1 = vpop.f32.mrf.mxu0 }
 0x5bc   :  { %v7733_v19 = vadd.f32 %v9036_v17, %v8986_v21 }
 0x5bd   :  { %v9038_v28 = vpop.f32.mrf.mxu0 }
 0x5be   :  { %v9039_v0 = vadd.f32 %v9038_v28, %v9037_v1  ;;  %v7739_v62 = vmax.f32 %v7733_v19, 0.0 }
 0x5c0   :  { %v7736_v30 = vadd.f32 %v9039_v0, %v8986_v21 }
 0x5c2   :  { %v7740_v14 = vmax.f32 %v7736_v30, 0.0 }
 0x5c4   :  { %v7741_v31 = vpack.c.bf16 %v7740_v14, %v7739_v62 }
 0x5c6   :  { %9071 = vmatmul.mubr.bf16.vlgmr.msra.gmra.mxu1 %v7741_v31 }
 0x686   :  { %v7847_v33 = vpop.f32.mrf.mxu1 }
 0x687   :  { %v7848_v34 = vadd.f32 %v9003_v29, %v7847_v33 }
 0x688   :  { %v9072_v3 = vpop.f32.mrf.mxu1 }
 0x689   :  { %v7854_v10 = vmax.f32 %v7848_v34, 0.0 }
 0x68a   :  { %v7850_v27 = vpop.f32.mrf.mxu1 }
 0x68b   :  { %v7851_v36 = vadd.f32 %v9003_v29, %v7850_v27 }
 0x68c   :  { %v9073_v59 = vpop.f32.mrf.mxu1 }
 0x68d   :  { %v7855_v24 = vmax.f32 %v7851_v36, 0.0 }
 0x68f   :  { %v7856_v42 = vpack.c.bf16 %v7855_v24, %v7854_v10 }
 0x691   :  { %9083 = vmatmul.mubr.msk.bf16.vlgmr.msra.gmra.mxu0 %vm7896_vm1, %v7856_v42 }
 0x751   :  { %v7934_v2 = vpop.f32.mrf.mxu0 }
 0x752   :  { %v7935_v46 = vadd.f32 %v9012_v6, %v7934_v2 }
 0x753   :  { %v9084_v58 = vpop.f32.mrf.mxu0 }
 0x754   :  { %v7941_v57 = vmax.f32 %v7935_v46, 0.0 }
 0x755   :  { %v7937_v35 = vpop.f32.mrf.mxu0 }
 0x756   :  { %7943 = vst [vmem:[#allocation16] sm:$0xff] %v7941_v57  ;;  %v7938_v8 = vadd.f32 %v9012_v6, %v7937_v35 }
 0x757   :  { %v9085_v39 = vpop.f32.mrf.mxu0 }
 0x758   :  { %v7942_v44 = vmax.f32 %v7938_v8, 0.0 }
 0x75a   :  { %7944 = vst [vmem:[#allocation16 + $0x8] sm:$0xff] %v7942_v44 }
 0x75b   :  { %10832 = shalt.err (!%p10829_p2)
}
 0x75c   :  { %7956 = dma.vmem_to_hbm [thread:$0]  %s7951_s25, 256, %s11255_s9, [#allocation4], %s10854_s12, %s10854_s12, %s10855_s13  }
 0x75d   :  { %10851 = dma.done.wait [#allocation4], 256  }
 0x75e   :  { %10852 = vsyncadd [#allocation4], 4294967040 }
 0x75f   :  { %7960 = vsyncpa [#allocation3], 1 }
 0x760   :  { %7961 = vsyncpa [#allocation6], 1 }
 0x761   :  { %7962 = vsyncpa [#allocation9], 1 }
 0x762   :  { %7963 = vsyncpa [#allocation12], 1 }
 0x763   :  { %7964 = vsyncpa [#allocation15], 1 }
 0x764   :  { %7965 = vsyncpa [#allocation4], 1 }

</bundles_post_ra>
